<compile_context>
chip_gen: v5e
topology: v5e:2x2
jax: 0.10.0
libtpu: 0.0.40
codegen_flags: <defaults>
</compile_context>

<pallas_src>
import functools

import numpy as np
import jax
import jax.numpy as jnp
from jax.experimental import pallas as pl
from jax.experimental.pallas import tpu as pltpu

KSIZE = 3      # kernel_size=3 -> padding=1 (the module's default)
TOP = 8        # depth-halo rows above the data block (keeps row starts 8-aligned)
LPAD = 128     # lane halo left of the data block (keeps lane starts 128-aligned)


def spatial_attention_kernel(wm_ref, x_ref, o_ref, feat_ref, *, width):
    # wm_ref  : VMEM (2*K^3, H*W) f32  -- weight * (1/C on avg plane) * H/W boundary mask
    # x_ref   : VMEM (C, D, H*W)       -- one batch element, lane-dense spatial layout
    # o_ref   : VMEM (D, H*W)          -- sigmoid attention map (unmasked, lane-dense stores)
    # feat_ref: VMEM scratch (2*CH_ROWS, LW) f32 -- zero-padded sum/max feature planes
    C, D, HW = x_ref.shape
    ch_rows = feat_ref.shape[0] // 2
    pad = KSIZE // 2

    # 1) Zero the scratch: this is the conv's zero padding (depth halo rows and
    #    lane halo columns).  Re-done every grid step so it stays correct when
    #    the parallel grid is sharded across TensorCores; for large shapes this
    #    memset could be narrowed to just the halo strips.
    feat_ref[...] = jnp.zeros(feat_ref.shape, jnp.float32)

    # 2) Channel reduction, looping over C (only a few 2-vreg slabs live at once).
    #    The "avg" plane holds the channel SUM; the 1/C factor is folded into wm_ref.
    x0 = x_ref[0].astype(jnp.float32)
    ch_sum = x0
    ch_max = x0
    for c in range(1, C):
        xc = x_ref[c].astype(jnp.float32)
        ch_sum = ch_sum + xc
        ch_max = jnp.maximum(ch_max, xc)

    # Aligned stores: row start TOP (multiple of 8), lane start LPAD (multiple of 128).
    feat_ref[TOP:TOP + D, LPAD:LPAD + HW] = ch_sum
    feat_ref[ch_rows + TOP:ch_rows + TOP + D, LPAD:LPAD + HW] = ch_max

    # 3) 2 x K x K x K stencil.  One slab load per (plane, kd); each (kh, kw)
    #    tap is an in-register lane window multiplied by a pre-broadcast
    #    weighted-mask row (no scalar splats; invalid/out-of-image taps have
    #    weight 0, reproducing the conv's zero padding in H and W).
    acc = jnp.zeros((D, HW), jnp.float32)
    t = 0
    for c in range(2):
        base = c * ch_rows
        for kd in range(KSIZE):
            r0 = base + TOP + kd - pad          # depth-shifted slab; halo rows are zero
            slab = feat_ref[r0:r0 + D, :]       # (D, LW)
            for kh in range(KSIZE):
                for kw in range(KSIZE):
                    s = (kh - pad) * width + (kw - pad)
                    win = jax.lax.slice(slab, (0, LPAD + s), (D, LPAD + s + HW))
                    acc = acc + win * wm_ref[t:t + 1, :]
                    t += 1

    o_ref[...] = jax.nn.sigmoid(acc).astype(o_ref.dtype)


def spatial_attention(x, w):
    """x: (N, C, D, H, W) f32;  w: (1, 2, K, K, K) Conv3d weight (no bias)."""
    N, C, D, H, W = x.shape
    HW = H * W
    pad = KSIZE // 2
    assert pad * (W + 1) <= LPAD, "W too large for the fixed lane halo"

    x_flat = x.reshape(N, C, D, HW)             # lane-dense spatial layout

    # --- fold 1/C and the H/W zero-padding masks into the conv weights -------
    hh = np.repeat(np.arange(H), W)             # (HW,) h index of each lane
    ww = np.tile(np.arange(W), H)               # (HW,) w index of each lane
    kh = np.arange(KSIZE)[:, None, None]
    kw = np.arange(KSIZE)[None, :, None]
    valid = (((hh[None, None, :] + kh - pad) >= 0)
             & ((hh[None, None, :] + kh - pad) < H)
             & ((ww[None, None, :] + kw - pad) >= 0)
             & ((ww[None, None, :] + kw - pad) < W))
    valid = jnp.asarray(valid.astype(np.float32))            # (K, K, HW)

    scale = jnp.array([1.0 / C, 1.0], jnp.float32).reshape(2, 1, 1, 1)
    wt = w[0].astype(jnp.float32) * scale                    # (2, K, K, K)
    wm = wt[:, :, :, :, None] * valid[None, None]            # (2, K, K, K, HW)
    wm = wm.reshape(2 * KSIZE ** 3, HW)                      # order: [c, kd, kh, kw]

    # --- scratch geometry (all stores row-8 / lane-128 aligned) --------------
    ch_rows = TOP + ((D + 7) // 8) * 8 + 8
    lw = LPAD + HW + 128                                     # lane halo on both sides

    kernel = functools.partial(spatial_attention_kernel, width=W)
    out_flat = pl.pallas_call(
        kernel,
        out_shape=jax.ShapeDtypeStruct((N, D, HW), x.dtype),
        grid_spec=pltpu.PrefetchScalarGridSpec(
            num_scalar_prefetch=0,
            grid=(N,),
            in_specs=[
                # weights/masks: constant block index -> stays resident in VMEM
                pl.BlockSpec((2 * KSIZE ** 3, HW), lambda n: (0, 0)),
                # one batch element per grid step
                pl.BlockSpec((None, C, D, HW), lambda n: (n, 0, 0, 0)),
            ],
            out_specs=pl.BlockSpec((None, D, HW), lambda n: (n, 0, 0)),
            scratch_shapes=[pltpu.VMEM((2 * ch_rows, lw), jnp.float32)],
        ),
        compiler_params=pltpu.CompilerParams(
            dimension_semantics=("parallel",)),
    )(wm, x_flat)

    # layout plumbing only: present the PyTorch (N, 1, D, H, W) shape
    return out_flat.reshape(N, 1, D, H, W)


def spatial_attention_reference(x, w):
    avg = jnp.mean(x, axis=1, keepdims=True)
    mx = jnp.max(x, axis=1, keepdims=True)
    feat = jnp.concatenate([avg, mx], axis=1)
    out = jax.lax.conv_general_dilated(
        feat, w, window_strides=(1, 1, 1),
        padding=((1, 1), (1, 1), (1, 1)),
        dimension_numbers=("NCDHW", "OIDHW", "NCDHW"))
    return jax.nn.sigmoid(out)


if __name__ == "__main__":
    key = jax.random.PRNGKey(0)
    kx, kwgt = jax.random.split(key)

    # Small 3D volume: N=2, C=4, D=8, H=16, W=16 (Conv3d => 5D input).
    x = jax.random.normal(kx, (2, 4, 8, 16, 16), dtype=jnp.float32)

    # Deterministic Conv3d(2, 1, 3, bias=False) weight, PyTorch-style init:
    # U(-b, b) with b = 1/sqrt(fan_in) = 1/sqrt(2*3*3*3).
    bound = 1.0 / np.sqrt(2 * KSIZE ** 3)
    w = jax.random.uniform(kwgt, (1, 2, KSIZE, KSIZE, KSIZE), jnp.float32,
                           -bound, bound)

    out = jax.block_until_ready(spatial_attention(x, w))
    ref = spatial_attention_reference(x, w)
    assert out.shape == (2, 1, 8, 16, 16)
    np.testing.assert_allclose(np.asarray(out), np.asarray(ref),
                               atol=1e-5, rtol=1e-5)
    print("KERNEL_OK")
</pallas_src>

<mosaic_0001>
module attributes {stable_mosaic.version = 11 : i64} {
  func.func @spatial_attention_kernel(%arg0: i32, %arg1: memref<54x256xf32, #tpu.memory_space<vmem>>, %arg2: memref<1x4x8x256xf32, #tpu.memory_space<vmem>>, %arg3: memref<1x8x256xf32, #tpu.memory_space<vmem>>, %arg4: memref<48x512xf32, #tpu.memory_space<vmem>>) attributes {dimension_semantics = [#tpu.dimension_semantics<parallel>], iteration_bounds = array<i64: 2>, scalar_prefetch = 0 : i64, scratch_operands = 1 : i64, tpu.core_type = #tpu.core_type<tc>, window_params = [{pipeline_mode = #tpu.pipeline_mode<synchronous>, transform_indices = @transform_0, window_bounds = array<i64: 54, 256>}, {transform_indices = @transform_1, window_bounds = array<i64: 1, 4, 8, 256>}, {transform_indices = @transform_2, window_bounds = array<i64: 1, 8, 256>}]} {
    %cst = arith.constant 0.000000e+00 : f32
    %0 = vector.broadcast %cst : f32 to vector<48x512xf32>
    %c0 = arith.constant 0 : index
    %c0_0 = arith.constant 0 : index
    %1 = vector.load %arg4[%c0, %c0_0] : memref<48x512xf32, #tpu.memory_space<vmem>>, vector<48x512xf32>
    tpu.vector_store %arg4[%c0, %c0_0], %0 {strides = array<i32>} : memref<48x512xf32, #tpu.memory_space<vmem>>, vector<48x512xf32>,
    %c0_1 = arith.constant 0 : index
    %c0_2 = arith.constant 0 : index
    %c0_3 = arith.constant 0 : index
    %c0_4 = arith.constant 0 : index
    %2 = vector.load %arg2[%c0_1, %c0_2, %c0_3, %c0_4] : memref<1x4x8x256xf32, #tpu.memory_space<vmem>>, vector<1x1x8x256xf32>
    %3 = vector.shape_cast %2 : vector<1x1x8x256xf32> to vector<8x256xf32>
    %c0_5 = arith.constant 0 : index
    %c1 = arith.constant 1 : index
    %c0_6 = arith.constant 0 : index
    %c0_7 = arith.constant 0 : index
    %4 = vector.load %arg2[%c0_5, %c1, %c0_6, %c0_7] : memref<1x4x8x256xf32, #tpu.memory_space<vmem>>, vector<1x1x8x256xf32>
    %5 = vector.shape_cast %4 : vector<1x1x8x256xf32> to vector<8x256xf32>
    %6 = arith.addf %3, %5 : vector<8x256xf32>
    %7 = arith.maximumf %3, %5 : vector<8x256xf32>
    %c0_8 = arith.constant 0 : index
    %c2 = arith.constant 2 : index
    %c0_9 = arith.constant 0 : index
    %c0_10 = arith.constant 0 : index
    %8 = vector.load %arg2[%c0_8, %c2, %c0_9, %c0_10] : memref<1x4x8x256xf32, #tpu.memory_space<vmem>>, vector<1x1x8x256xf32>
    %9 = vector.shape_cast %8 : vector<1x1x8x256xf32> to vector<8x256xf32>
    %10 = arith.addf %6, %9 : vector<8x256xf32>
    %11 = arith.maximumf %7, %9 : vector<8x256xf32>
    %c0_11 = arith.constant 0 : index
    %c3 = arith.constant 3 : index
    %c0_12 = arith.constant 0 : index
    %c0_13 = arith.constant 0 : index
    %12 = vector.load %arg2[%c0_11, %c3, %c0_12, %c0_13] : memref<1x4x8x256xf32, #tpu.memory_space<vmem>>, vector<1x1x8x256xf32>
    %13 = vector.shape_cast %12 : vector<1x1x8x256xf32> to vector<8x256xf32>
    %14 = arith.addf %10, %13 : vector<8x256xf32>
    %15 = arith.maximumf %11, %13 : vector<8x256xf32>
    %c8 = arith.constant 8 : index
    %c128 = arith.constant 128 : index
    %16 = vector.load %arg4[%c8, %c128] : memref<48x512xf32, #tpu.memory_space<vmem>>, vector<8x256xf32>
    tpu.vector_store %arg4[%c8, %c128], %14 {strides = array<i32>} : memref<48x512xf32, #tpu.memory_space<vmem>>, vector<8x256xf32>,
    %c32 = arith.constant 32 : index
    %c128_14 = arith.constant 128 : index
    %17 = vector.load %arg4[%c32, %c128_14] : memref<48x512xf32, #tpu.memory_space<vmem>>, vector<8x256xf32>
    tpu.vector_store %arg4[%c32, %c128_14], %15 {strides = array<i32>} : memref<48x512xf32, #tpu.memory_space<vmem>>, vector<8x256xf32>,
    %cst_15 = arith.constant 0.000000e+00 : f32
    %18 = vector.broadcast %cst_15 : f32 to vector<8x256xf32>
    %c7 = arith.constant 7 : index
    %c0_16 = arith.constant 0 : index
    %19 = vector.load %arg4[%c7, %c0_16] : memref<48x512xf32, #tpu.memory_space<vmem>>, vector<8x512xf32>
    %20 = vector.extract_strided_slice %19 {offsets = [0, 111], sizes = [8, 256], strides = [1, 1]} : vector<8x512xf32> to vector<8x256xf32>
    %c0_17 = arith.constant 0 : index
    %c0_18 = arith.constant 0 : index
    %21 = vector.load %arg1[%c0_17, %c0_18] : memref<54x256xf32, #tpu.memory_space<vmem>>, vector<1x256xf32>
    %22 = vector.broadcast %21 : vector<1x256xf32> to vector<8x256xf32>
    %23 = arith.mulf %20, %22 : vector<8x256xf32>
    %24 = arith.addf %18, %23 : vector<8x256xf32>
    %25 = vector.extract_strided_slice %19 {offsets = [0, 112], sizes = [8, 256], strides = [1, 1]} : vector<8x512xf32> to vector<8x256xf32>
    %c1_19 = arith.constant 1 : index
    %c0_20 = arith.constant 0 : index
    %26 = vector.load %arg1[%c1_19, %c0_20] : memref<54x256xf32, #tpu.memory_space<vmem>>, vector<1x256xf32>
    %27 = vector.broadcast %26 : vector<1x256xf32> to vector<8x256xf32>
    %28 = arith.mulf %25, %27 : vector<8x256xf32>
    %29 = arith.addf %24, %28 : vector<8x256xf32>
    %30 = vector.extract_strided_slice %19 {offsets = [0, 113], sizes = [8, 256], strides = [1, 1]} : vector<8x512xf32> to vector<8x256xf32>
    %c2_21 = arith.constant 2 : index
    %c0_22 = arith.constant 0 : index
    %31 = vector.load %arg1[%c2_21, %c0_22] : memref<54x256xf32, #tpu.memory_space<vmem>>, vector<1x256xf32>
    %32 = vector.broadcast %31 : vector<1x256xf32> to vector<8x256xf32>
    %33 = arith.mulf %30, %32 : vector<8x256xf32>
    %34 = arith.addf %29, %33 : vector<8x256xf32>
    %35 = vector.extract_strided_slice %19 {offsets = [0, 127], sizes = [8, 256], strides = [1, 1]} : vector<8x512xf32> to vector<8x256xf32>
    %c3_23 = arith.constant 3 : index
    %c0_24 = arith.constant 0 : index
    %36 = vector.load %arg1[%c3_23, %c0_24] : memref<54x256xf32, #tpu.memory_space<vmem>>, vector<1x256xf32>
    %37 = vector.broadcast %36 : vector<1x256xf32> to vector<8x256xf32>
    %38 = arith.mulf %35, %37 : vector<8x256xf32>
    %39 = arith.addf %34, %38 : vector<8x256xf32>
    %40 = vector.extract_strided_slice %19 {offsets = [0, 128], sizes = [8, 256], strides = [1, 1]} : vector<8x512xf32> to vector<8x256xf32>
    %c4 = arith.constant 4 : index
    %c0_25 = arith.constant 0 : index
    %41 = vector.load %arg1[%c4, %c0_25] : memref<54x256xf32, #tpu.memory_space<vmem>>, vector<1x256xf32>
    %42 = vector.broadcast %41 : vector<1x256xf32> to vector<8x256xf32>
    %43 = arith.mulf %40, %42 : vector<8x256xf32>
    %44 = arith.addf %39, %43 : vector<8x256xf32>
    %45 = vector.extract_strided_slice %19 {offsets = [0, 129], sizes = [8, 256], strides = [1, 1]} : vector<8x512xf32> to vector<8x256xf32>
    %c5 = arith.constant 5 : index
    %c0_26 = arith.constant 0 : index
    %46 = vector.load %arg1[%c5, %c0_26] : memref<54x256xf32, #tpu.memory_space<vmem>>, vector<1x256xf32>
    %47 = vector.broadcast %46 : vector<1x256xf32> to vector<8x256xf32>
    %48 = arith.mulf %45, %47 : vector<8x256xf32>
    %49 = arith.addf %44, %48 : vector<8x256xf32>
    %50 = vector.extract_strided_slice %19 {offsets = [0, 143], sizes = [8, 256], strides = [1, 1]} : vector<8x512xf32> to vector<8x256xf32>
    %c6 = arith.constant 6 : index
    %c0_27 = arith.constant 0 : index
    %51 = vector.load %arg1[%c6, %c0_27] : memref<54x256xf32, #tpu.memory_space<vmem>>, vector<1x256xf32>
    %52 = vector.broadcast %51 : vector<1x256xf32> to vector<8x256xf32>
    %53 = arith.mulf %50, %52 : vector<8x256xf32>
    %54 = arith.addf %49, %53 : vector<8x256xf32>
    %55 = vector.extract_strided_slice %19 {offsets = [0, 144], sizes = [8, 256], strides = [1, 1]} : vector<8x512xf32> to vector<8x256xf32>
    %c7_28 = arith.constant 7 : index
    %c0_29 = arith.constant 0 : index
    %56 = vector.load %arg1[%c7_28, %c0_29] : memref<54x256xf32, #tpu.memory_space<vmem>>, vector<1x256xf32>
    %57 = vector.broadcast %56 : vector<1x256xf32> to vector<8x256xf32>
    %58 = arith.mulf %55, %57 : vector<8x256xf32>
    %59 = arith.addf %54, %58 : vector<8x256xf32>
    %60 = vector.extract_strided_slice %19 {offsets = [0, 145], sizes = [8, 256], strides = [1, 1]} : vector<8x512xf32> to vector<8x256xf32>
    %c8_30 = arith.constant 8 : index
    %c0_31 = arith.constant 0 : index
    %61 = vector.load %arg1[%c8_30, %c0_31] : memref<54x256xf32, #tpu.memory_space<vmem>>, vector<1x256xf32>
    %62 = vector.broadcast %61 : vector<1x256xf32> to vector<8x256xf32>
    %63 = arith.mulf %60, %62 : vector<8x256xf32>
    %64 = arith.addf %59, %63 : vector<8x256xf32>
    %c8_32 = arith.constant 8 : index
    %c0_33 = arith.constant 0 : index
    %65 = vector.load %arg4[%c8_32, %c0_33] : memref<48x512xf32, #tpu.memory_space<vmem>>, vector<8x512xf32>
    %66 = vector.extract_strided_slice %65 {offsets = [0, 111], sizes = [8, 256], strides = [1, 1]} : vector<8x512xf32> to vector<8x256xf32>
    %c9 = arith.constant 9 : index
    %c0_34 = arith.constant 0 : index
    %67 = vector.load %arg1[%c9, %c0_34] : memref<54x256xf32, #tpu.memory_space<vmem>>, vector<1x256xf32>
    %68 = vector.broadcast %67 : vector<1x256xf32> to vector<8x256xf32>
    %69 = arith.mulf %66, %68 : vector<8x256xf32>
    %70 = arith.addf %64, %69 : vector<8x256xf32>
    %71 = vector.extract_strided_slice %65 {offsets = [0, 112], sizes = [8, 256], strides = [1, 1]} : vector<8x512xf32> to vector<8x256xf32>
    %c10 = arith.constant 10 : index
    %c0_35 = arith.constant 0 : index
    %72 = vector.load %arg1[%c10, %c0_35] : memref<54x256xf32, #tpu.memory_space<vmem>>, vector<1x256xf32>
    %73 = vector.broadcast %72 : vector<1x256xf32> to vector<8x256xf32>
    %74 = arith.mulf %71, %73 : vector<8x256xf32>
    %75 = arith.addf %70, %74 : vector<8x256xf32>
    %76 = vector.extract_strided_slice %65 {offsets = [0, 113], sizes = [8, 256], strides = [1, 1]} : vector<8x512xf32> to vector<8x256xf32>
    %c11 = arith.constant 11 : index
    %c0_36 = arith.constant 0 : index
    %77 = vector.load %arg1[%c11, %c0_36] : memref<54x256xf32, #tpu.memory_space<vmem>>, vector<1x256xf32>
    %78 = vector.broadcast %77 : vector<1x256xf32> to vector<8x256xf32>
    %79 = arith.mulf %76, %78 : vector<8x256xf32>
    %80 = arith.addf %75, %79 : vector<8x256xf32>
    %81 = vector.extract_strided_slice %65 {offsets = [0, 127], sizes = [8, 256], strides = [1, 1]} : vector<8x512xf32> to vector<8x256xf32>
    %c12 = arith.constant 12 : index
    %c0_37 = arith.constant 0 : index
    %82 = vector.load %arg1[%c12, %c0_37] : memref<54x256xf32, #tpu.memory_space<vmem>>, vector<1x256xf32>
    %83 = vector.broadcast %82 : vector<1x256xf32> to vector<8x256xf32>
    %84 = arith.mulf %81, %83 : vector<8x256xf32>
    %85 = arith.addf %80, %84 : vector<8x256xf32>
    %86 = vector.extract_strided_slice %65 {offsets = [0, 128], sizes = [8, 256], strides = [1, 1]} : vector<8x512xf32> to vector<8x256xf32>
    %c13 = arith.constant 13 : index
    %c0_38 = arith.constant 0 : index
    %87 = vector.load %arg1[%c13, %c0_38] : memref<54x256xf32, #tpu.memory_space<vmem>>, vector<1x256xf32>
    %88 = vector.broadcast %87 : vector<1x256xf32> to vector<8x256xf32>
    %89 = arith.mulf %86, %88 : vector<8x256xf32>
    %90 = arith.addf %85, %89 : vector<8x256xf32>
    %91 = vector.extract_strided_slice %65 {offsets = [0, 129], sizes = [8, 256], strides = [1, 1]} : vector<8x512xf32> to vector<8x256xf32>
    %c14 = arith.constant 14 : index
    %c0_39 = arith.constant 0 : index
    %92 = vector.load %arg1[%c14, %c0_39] : memref<54x256xf32, #tpu.memory_space<vmem>>, vector<1x256xf32>
    %93 = vector.broadcast %92 : vector<1x256xf32> to vector<8x256xf32>
    %94 = arith.mulf %91, %93 : vector<8x256xf32>
    %95 = arith.addf %90, %94 : vector<8x256xf32>
    %96 = vector.extract_strided_slice %65 {offsets = [0, 143], sizes = [8, 256], strides = [1, 1]} : vector<8x512xf32> to vector<8x256xf32>
    %c15 = arith.constant 15 : index
    %c0_40 = arith.constant 0 : index
    %97 = vector.load %arg1[%c15, %c0_40] : memref<54x256xf32, #tpu.memory_space<vmem>>, vector<1x256xf32>
    %98 = vector.broadcast %97 : vector<1x256xf32> to vector<8x256xf32>
    %99 = arith.mulf %96, %98 : vector<8x256xf32>
    %100 = arith.addf %95, %99 : vector<8x256xf32>
    %101 = vector.extract_strided_slice %65 {offsets = [0, 144], sizes = [8, 256], strides = [1, 1]} : vector<8x512xf32> to vector<8x256xf32>
    %c16 = arith.constant 16 : index
    %c0_41 = arith.constant 0 : index
    %102 = vector.load %arg1[%c16, %c0_41] : memref<54x256xf32, #tpu.memory_space<vmem>>, vector<1x256xf32>
    %103 = vector.broadcast %102 : vector<1x256xf32> to vector<8x256xf32>
    %104 = arith.mulf %101, %103 : vector<8x256xf32>
    %105 = arith.addf %100, %104 : vector<8x256xf32>
    %106 = vector.extract_strided_slice %65 {offsets = [0, 145], sizes = [8, 256], strides = [1, 1]} : vector<8x512xf32> to vector<8x256xf32>
    %c17 = arith.constant 17 : index
    %c0_42 = arith.constant 0 : index
    %107 = vector.load %arg1[%c17, %c0_42] : memref<54x256xf32, #tpu.memory_space<vmem>>, vector<1x256xf32>
    %108 = vector.broadcast %107 : vector<1x256xf32> to vector<8x256xf32>
    %109 = arith.mulf %106, %108 : vector<8x256xf32>
    %110 = arith.addf %105, %109 : vector<8x256xf32>
    %c9_43 = arith.constant 9 : index
    %c0_44 = arith.constant 0 : index
    %111 = vector.load %arg4[%c9_43, %c0_44] : memref<48x512xf32, #tpu.memory_space<vmem>>, vector<8x512xf32>
    %112 = vector.extract_strided_slice %111 {offsets = [0, 111], sizes = [8, 256], strides = [1, 1]} : vector<8x512xf32> to vector<8x256xf32>
    %c18 = arith.constant 18 : index
    %c0_45 = arith.constant 0 : index
    %113 = vector.load %arg1[%c18, %c0_45] : memref<54x256xf32, #tpu.memory_space<vmem>>, vector<1x256xf32>
    %114 = vector.broadcast %113 : vector<1x256xf32> to vector<8x256xf32>
    %115 = arith.mulf %112, %114 : vector<8x256xf32>
    %116 = arith.addf %110, %115 : vector<8x256xf32>
    %117 = vector.extract_strided_slice %111 {offsets = [0, 112], sizes = [8, 256], strides = [1, 1]} : vector<8x512xf32> to vector<8x256xf32>
    %c19 = arith.constant 19 : index
    %c0_46 = arith.constant 0 : index
    %118 = vector.load %arg1[%c19, %c0_46] : memref<54x256xf32, #tpu.memory_space<vmem>>, vector<1x256xf32>
    %119 = vector.broadcast %118 : vector<1x256xf32> to vector<8x256xf32>
    %120 = arith.mulf %117, %119 : vector<8x256xf32>
    %121 = arith.addf %116, %120 : vector<8x256xf32>
    %122 = vector.extract_strided_slice %111 {offsets = [0, 113], sizes = [8, 256], strides = [1, 1]} : vector<8x512xf32> to vector<8x256xf32>
    %c20 = arith.constant 20 : index
    %c0_47 = arith.constant 0 : index
    %123 = vector.load %arg1[%c20, %c0_47] : memref<54x256xf32, #tpu.memory_space<vmem>>, vector<1x256xf32>
    %124 = vector.broadcast %123 : vector<1x256xf32> to vector<8x256xf32>
    %125 = arith.mulf %122, %124 : vector<8x256xf32>
    %126 = arith.addf %121, %125 : vector<8x256xf32>
    %127 = vector.extract_strided_slice %111 {offsets = [0, 127], sizes = [8, 256], strides = [1, 1]} : vector<8x512xf32> to vector<8x256xf32>
    %c21 = arith.constant 21 : index
    %c0_48 = arith.constant 0 : index
    %128 = vector.load %arg1[%c21, %c0_48] : memref<54x256xf32, #tpu.memory_space<vmem>>, vector<1x256xf32>
    %129 = vector.broadcast %128 : vector<1x256xf32> to vector<8x256xf32>
    %130 = arith.mulf %127, %129 : vector<8x256xf32>
    %131 = arith.addf %126, %130 : vector<8x256xf32>
    %132 = vector.extract_strided_slice %111 {offsets = [0, 128], sizes = [8, 256], strides = [1, 1]} : vector<8x512xf32> to vector<8x256xf32>
    %c22 = arith.constant 22 : index
    %c0_49 = arith.constant 0 : index
    %133 = vector.load %arg1[%c22, %c0_49] : memref<54x256xf32, #tpu.memory_space<vmem>>, vector<1x256xf32>
    %134 = vector.broadcast %133 : vector<1x256xf32> to vector<8x256xf32>
    %135 = arith.mulf %132, %134 : vector<8x256xf32>
    %136 = arith.addf %131, %135 : vector<8x256xf32>
    %137 = vector.extract_strided_slice %111 {offsets = [0, 129], sizes = [8, 256], strides = [1, 1]} : vector<8x512xf32> to vector<8x256xf32>
    %c23 = arith.constant 23 : index
    %c0_50 = arith.constant 0 : index
    %138 = vector.load %arg1[%c23, %c0_50] : memref<54x256xf32, #tpu.memory_space<vmem>>, vector<1x256xf32>
    %139 = vector.broadcast %138 : vector<1x256xf32> to vector<8x256xf32>
    %140 = arith.mulf %137, %139 : vector<8x256xf32>
    %141 = arith.addf %136, %140 : vector<8x256xf32>
    %142 = vector.extract_strided_slice %111 {offsets = [0, 143], sizes = [8, 256], strides = [1, 1]} : vector<8x512xf32> to vector<8x256xf32>
    %c24 = arith.constant 24 : index
    %c0_51 = arith.constant 0 : index
    %143 = vector.load %arg1[%c24, %c0_51] : memref<54x256xf32, #tpu.memory_space<vmem>>, vector<1x256xf32>
    %144 = vector.broadcast %143 : vector<1x256xf32> to vector<8x256xf32>
    %145 = arith.mulf %142, %144 : vector<8x256xf32>
    %146 = arith.addf %141, %145 : vector<8x256xf32>
    %147 = vector.extract_strided_slice %111 {offsets = [0, 144], sizes = [8, 256], strides = [1, 1]} : vector<8x512xf32> to vector<8x256xf32>
    %c25 = arith.constant 25 : index
    %c0_52 = arith.constant 0 : index
    %148 = vector.load %arg1[%c25, %c0_52] : memref<54x256xf32, #tpu.memory_space<vmem>>, vector<1x256xf32>
    %149 = vector.broadcast %148 : vector<1x256xf32> to vector<8x256xf32>
    %150 = arith.mulf %147, %149 : vector<8x256xf32>
    %151 = arith.addf %146, %150 : vector<8x256xf32>
    %152 = vector.extract_strided_slice %111 {offsets = [0, 145], sizes = [8, 256], strides = [1, 1]} : vector<8x512xf32> to vector<8x256xf32>
    %c26 = arith.constant 26 : index
    %c0_53 = arith.constant 0 : index
    %153 = vector.load %arg1[%c26, %c0_53] : memref<54x256xf32, #tpu.memory_space<vmem>>, vector<1x256xf32>
    %154 = vector.broadcast %153 : vector<1x256xf32> to vector<8x256xf32>
    %155 = arith.mulf %152, %154 : vector<8x256xf32>
    %156 = arith.addf %151, %155 : vector<8x256xf32>
    %c31 = arith.constant 31 : index
    %c0_54 = arith.constant 0 : index
    %157 = vector.load %arg4[%c31, %c0_54] : memref<48x512xf32, #tpu.memory_space<vmem>>, vector<8x512xf32>
    %158 = vector.extract_strided_slice %157 {offsets = [0, 111], sizes = [8, 256], strides = [1, 1]} : vector<8x512xf32> to vector<8x256xf32>
    %c27 = arith.constant 27 : index
    %c0_55 = arith.constant 0 : index
    %159 = vector.load %arg1[%c27, %c0_55] : memref<54x256xf32, #tpu.memory_space<vmem>>, vector<1x256xf32>
    %160 = vector.broadcast %159 : vector<1x256xf32> to vector<8x256xf32>
    %161 = arith.mulf %158, %160 : vector<8x256xf32>
    %162 = arith.addf %156, %161 : vector<8x256xf32>
    %163 = vector.extract_strided_slice %157 {offsets = [0, 112], sizes = [8, 256], strides = [1, 1]} : vector<8x512xf32> to vector<8x256xf32>
    %c28 = arith.constant 28 : index
    %c0_56 = arith.constant 0 : index
    %164 = vector.load %arg1[%c28, %c0_56] : memref<54x256xf32, #tpu.memory_space<vmem>>, vector<1x256xf32>
    %165 = vector.broadcast %164 : vector<1x256xf32> to vector<8x256xf32>
    %166 = arith.mulf %163, %165 : vector<8x256xf32>
    %167 = arith.addf %162, %166 : vector<8x256xf32>
    %168 = vector.extract_strided_slice %157 {offsets = [0, 113], sizes = [8, 256], strides = [1, 1]} : vector<8x512xf32> to vector<8x256xf32>
    %c29 = arith.constant 29 : index
    %c0_57 = arith.constant 0 : index
    %169 = vector.load %arg1[%c29, %c0_57] : memref<54x256xf32, #tpu.memory_space<vmem>>, vector<1x256xf32>
    %170 = vector.broadcast %169 : vector<1x256xf32> to vector<8x256xf32>
    %171 = arith.mulf %168, %170 : vector<8x256xf32>
    %172 = arith.addf %167, %171 : vector<8x256xf32>
    %173 = vector.extract_strided_slice %157 {offsets = [0, 127], sizes = [8, 256], strides = [1, 1]} : vector<8x512xf32> to vector<8x256xf32>
    %c30 = arith.constant 30 : index
    %c0_58 = arith.constant 0 : index
    %174 = vector.load %arg1[%c30, %c0_58] : memref<54x256xf32, #tpu.memory_space<vmem>>, vector<1x256xf32>
    %175 = vector.broadcast %174 : vector<1x256xf32> to vector<8x256xf32>
    %176 = arith.mulf %173, %175 : vector<8x256xf32>
    %177 = arith.addf %172, %176 : vector<8x256xf32>
    %178 = vector.extract_strided_slice %157 {offsets = [0, 128], sizes = [8, 256], strides = [1, 1]} : vector<8x512xf32> to vector<8x256xf32>
    %c31_59 = arith.constant 31 : index
    %c0_60 = arith.constant 0 : index
    %179 = vector.load %arg1[%c31_59, %c0_60] : memref<54x256xf32, #tpu.memory_space<vmem>>, vector<1x256xf32>
    %180 = vector.broadcast %179 : vector<1x256xf32> to vector<8x256xf32>
    %181 = arith.mulf %178, %180 : vector<8x256xf32>
    %182 = arith.addf %177, %181 : vector<8x256xf32>
    %183 = vector.extract_strided_slice %157 {offsets = [0, 129], sizes = [8, 256], strides = [1, 1]} : vector<8x512xf32> to vector<8x256xf32>
    %c32_61 = arith.constant 32 : index
    %c0_62 = arith.constant 0 : index
    %184 = vector.load %arg1[%c32_61, %c0_62] : memref<54x256xf32, #tpu.memory_space<vmem>>, vector<1x256xf32>
    %185 = vector.broadcast %184 : vector<1x256xf32> to vector<8x256xf32>
    %186 = arith.mulf %183, %185 : vector<8x256xf32>
    %187 = arith.addf %182, %186 : vector<8x256xf32>
    %188 = vector.extract_strided_slice %157 {offsets = [0, 143], sizes = [8, 256], strides = [1, 1]} : vector<8x512xf32> to vector<8x256xf32>
    %c33 = arith.constant 33 : index
    %c0_63 = arith.constant 0 : index
    %189 = vector.load %arg1[%c33, %c0_63] : memref<54x256xf32, #tpu.memory_space<vmem>>, vector<1x256xf32>
    %190 = vector.broadcast %189 : vector<1x256xf32> to vector<8x256xf32>
    %191 = arith.mulf %188, %190 : vector<8x256xf32>
    %192 = arith.addf %187, %191 : vector<8x256xf32>
    %193 = vector.extract_strided_slice %157 {offsets = [0, 144], sizes = [8, 256], strides = [1, 1]} : vector<8x512xf32> to vector<8x256xf32>
    %c34 = arith.constant 34 : index
    %c0_64 = arith.constant 0 : index
    %194 = vector.load %arg1[%c34, %c0_64] : memref<54x256xf32, #tpu.memory_space<vmem>>, vector<1x256xf32>
    %195 = vector.broadcast %194 : vector<1x256xf32> to vector<8x256xf32>
    %196 = arith.mulf %193, %195 : vector<8x256xf32>
    %197 = arith.addf %192, %196 : vector<8x256xf32>
    %198 = vector.extract_strided_slice %157 {offsets = [0, 145], sizes = [8, 256], strides = [1, 1]} : vector<8x512xf32> to vector<8x256xf32>
    %c35 = arith.constant 35 : index
    %c0_65 = arith.constant 0 : index
    %199 = vector.load %arg1[%c35, %c0_65] : memref<54x256xf32, #tpu.memory_space<vmem>>, vector<1x256xf32>
    %200 = vector.broadcast %199 : vector<1x256xf32> to vector<8x256xf32>
    %201 = arith.mulf %198, %200 : vector<8x256xf32>
    %202 = arith.addf %197, %201 : vector<8x256xf32>
    %c32_66 = arith.constant 32 : index
    %c0_67 = arith.constant 0 : index
    %203 = vector.load %arg4[%c32_66, %c0_67] : memref<48x512xf32, #tpu.memory_space<vmem>>, vector<8x512xf32>
    %204 = vector.extract_strided_slice %203 {offsets = [0, 111], sizes = [8, 256], strides = [1, 1]} : vector<8x512xf32> to vector<8x256xf32>
    %c36 = arith.constant 36 : index
    %c0_68 = arith.constant 0 : index
    %205 = vector.load %arg1[%c36, %c0_68] : memref<54x256xf32, #tpu.memory_space<vmem>>, vector<1x256xf32>
    %206 = vector.broadcast %205 : vector<1x256xf32> to vector<8x256xf32>
    %207 = arith.mulf %204, %206 : vector<8x256xf32>
    %208 = arith.addf %202, %207 : vector<8x256xf32>
    %209 = vector.extract_strided_slice %203 {offsets = [0, 112], sizes = [8, 256], strides = [1, 1]} : vector<8x512xf32> to vector<8x256xf32>
    %c37 = arith.constant 37 : index
    %c0_69 = arith.constant 0 : index
    %210 = vector.load %arg1[%c37, %c0_69] : memref<54x256xf32, #tpu.memory_space<vmem>>, vector<1x256xf32>
    %211 = vector.broadcast %210 : vector<1x256xf32> to vector<8x256xf32>
    %212 = arith.mulf %209, %211 : vector<8x256xf32>
    %213 = arith.addf %208, %212 : vector<8x256xf32>
    %214 = vector.extract_strided_slice %203 {offsets = [0, 113], sizes = [8, 256], strides = [1, 1]} : vector<8x512xf32> to vector<8x256xf32>
    %c38 = arith.constant 38 : index
    %c0_70 = arith.constant 0 : index
    %215 = vector.load %arg1[%c38, %c0_70] : memref<54x256xf32, #tpu.memory_space<vmem>>, vector<1x256xf32>
    %216 = vector.broadcast %215 : vector<1x256xf32> to vector<8x256xf32>
    %217 = arith.mulf %214, %216 : vector<8x256xf32>
    %218 = arith.addf %213, %217 : vector<8x256xf32>
    %219 = vector.extract_strided_slice %203 {offsets = [0, 127], sizes = [8, 256], strides = [1, 1]} : vector<8x512xf32> to vector<8x256xf32>
    %c39 = arith.constant 39 : index
    %c0_71 = arith.constant 0 : index
    %220 = vector.load %arg1[%c39, %c0_71] : memref<54x256xf32, #tpu.memory_space<vmem>>, vector<1x256xf32>
    %221 = vector.broadcast %220 : vector<1x256xf32> to vector<8x256xf32>
    %222 = arith.mulf %219, %221 : vector<8x256xf32>
    %223 = arith.addf %218, %222 : vector<8x256xf32>
    %224 = vector.extract_strided_slice %203 {offsets = [0, 128], sizes = [8, 256], strides = [1, 1]} : vector<8x512xf32> to vector<8x256xf32>
    %c40 = arith.constant 40 : index
    %c0_72 = arith.constant 0 : index
    %225 = vector.load %arg1[%c40, %c0_72] : memref<54x256xf32, #tpu.memory_space<vmem>>, vector<1x256xf32>
    %226 = vector.broadcast %225 : vector<1x256xf32> to vector<8x256xf32>
    %227 = arith.mulf %224, %226 : vector<8x256xf32>
    %228 = arith.addf %223, %227 : vector<8x256xf32>
    %229 = vector.extract_strided_slice %203 {offsets = [0, 129], sizes = [8, 256], strides = [1, 1]} : vector<8x512xf32> to vector<8x256xf32>
    %c41 = arith.constant 41 : index
    %c0_73 = arith.constant 0 : index
    %230 = vector.load %arg1[%c41, %c0_73] : memref<54x256xf32, #tpu.memory_space<vmem>>, vector<1x256xf32>
    %231 = vector.broadcast %230 : vector<1x256xf32> to vector<8x256xf32>
    %232 = arith.mulf %229, %231 : vector<8x256xf32>
    %233 = arith.addf %228, %232 : vector<8x256xf32>
    %234 = vector.extract_strided_slice %203 {offsets = [0, 143], sizes = [8, 256], strides = [1, 1]} : vector<8x512xf32> to vector<8x256xf32>
    %c42 = arith.constant 42 : index
    %c0_74 = arith.constant 0 : index
    %235 = vector.load %arg1[%c42, %c0_74] : memref<54x256xf32, #tpu.memory_space<vmem>>, vector<1x256xf32>
    %236 = vector.broadcast %235 : vector<1x256xf32> to vector<8x256xf32>
    %237 = arith.mulf %234, %236 : vector<8x256xf32>
    %238 = arith.addf %233, %237 : vector<8x256xf32>
    %239 = vector.extract_strided_slice %203 {offsets = [0, 144], sizes = [8, 256], strides = [1, 1]} : vector<8x512xf32> to vector<8x256xf32>
    %c43 = arith.constant 43 : index
    %c0_75 = arith.constant 0 : index
    %240 = vector.load %arg1[%c43, %c0_75] : memref<54x256xf32, #tpu.memory_space<vmem>>, vector<1x256xf32>
    %241 = vector.broadcast %240 : vector<1x256xf32> to vector<8x256xf32>
    %242 = arith.mulf %239, %241 : vector<8x256xf32>
    %243 = arith.addf %238, %242 : vector<8x256xf32>
    %244 = vector.extract_strided_slice %203 {offsets = [0, 145], sizes = [8, 256], strides = [1, 1]} : vector<8x512xf32> to vector<8x256xf32>
    %c44 = arith.constant 44 : index
    %c0_76 = arith.constant 0 : index
    %245 = vector.load %arg1[%c44, %c0_76] : memref<54x256xf32, #tpu.memory_space<vmem>>, vector<1x256xf32>
    %246 = vector.broadcast %245 : vector<1x256xf32> to vector<8x256xf32>
    %247 = arith.mulf %244, %246 : vector<8x256xf32>
    %248 = arith.addf %243, %247 : vector<8x256xf32>
    %c33_77 = arith.constant 33 : index
    %c0_78 = arith.constant 0 : index
    %249 = vector.load %arg4[%c33_77, %c0_78] : memref<48x512xf32, #tpu.memory_space<vmem>>, vector<8x512xf32>
    %250 = vector.extract_strided_slice %249 {offsets = [0, 111], sizes = [8, 256], strides = [1, 1]} : vector<8x512xf32> to vector<8x256xf32>
    %c45 = arith.constant 45 : index
    %c0_79 = arith.constant 0 : index
    %251 = vector.load %arg1[%c45, %c0_79] : memref<54x256xf32, #tpu.memory_space<vmem>>, vector<1x256xf32>
    %252 = vector.broadcast %251 : vector<1x256xf32> to vector<8x256xf32>
    %253 = arith.mulf %250, %252 : vector<8x256xf32>
    %254 = arith.addf %248, %253 : vector<8x256xf32>
    %255 = vector.extract_strided_slice %249 {offsets = [0, 112], sizes = [8, 256], strides = [1, 1]} : vector<8x512xf32> to vector<8x256xf32>
    %c46 = arith.constant 46 : index
    %c0_80 = arith.constant 0 : index
    %256 = vector.load %arg1[%c46, %c0_80] : memref<54x256xf32, #tpu.memory_space<vmem>>, vector<1x256xf32>
    %257 = vector.broadcast %256 : vector<1x256xf32> to vector<8x256xf32>
    %258 = arith.mulf %255, %257 : vector<8x256xf32>
    %259 = arith.addf %254, %258 : vector<8x256xf32>
    %260 = vector.extract_strided_slice %249 {offsets = [0, 113], sizes = [8, 256], strides = [1, 1]} : vector<8x512xf32> to vector<8x256xf32>
    %c47 = arith.constant 47 : index
    %c0_81 = arith.constant 0 : index
    %261 = vector.load %arg1[%c47, %c0_81] : memref<54x256xf32, #tpu.memory_space<vmem>>, vector<1x256xf32>
    %262 = vector.broadcast %261 : vector<1x256xf32> to vector<8x256xf32>
    %263 = arith.mulf %260, %262 : vector<8x256xf32>
    %264 = arith.addf %259, %263 : vector<8x256xf32>
    %265 = vector.extract_strided_slice %249 {offsets = [0, 127], sizes = [8, 256], strides = [1, 1]} : vector<8x512xf32> to vector<8x256xf32>
    %c48 = arith.constant 48 : index
    %c0_82 = arith.constant 0 : index
    %266 = vector.load %arg1[%c48, %c0_82] : memref<54x256xf32, #tpu.memory_space<vmem>>, vector<1x256xf32>
    %267 = vector.broadcast %266 : vector<1x256xf32> to vector<8x256xf32>
    %268 = arith.mulf %265, %267 : vector<8x256xf32>
    %269 = arith.addf %264, %268 : vector<8x256xf32>
    %270 = vector.extract_strided_slice %249 {offsets = [0, 128], sizes = [8, 256], strides = [1, 1]} : vector<8x512xf32> to vector<8x256xf32>
    %c49 = arith.constant 49 : index
    %c0_83 = arith.constant 0 : index
    %271 = vector.load %arg1[%c49, %c0_83] : memref<54x256xf32, #tpu.memory_space<vmem>>, vector<1x256xf32>
    %272 = vector.broadcast %271 : vector<1x256xf32> to vector<8x256xf32>
    %273 = arith.mulf %270, %272 : vector<8x256xf32>
    %274 = arith.addf %269, %273 : vector<8x256xf32>
    %275 = vector.extract_strided_slice %249 {offsets = [0, 129], sizes = [8, 256], strides = [1, 1]} : vector<8x512xf32> to vector<8x256xf32>
    %c50 = arith.constant 50 : index
    %c0_84 = arith.constant 0 : index
    %276 = vector.load %arg1[%c50, %c0_84] : memref<54x256xf32, #tpu.memory_space<vmem>>, vector<1x256xf32>
    %277 = vector.broadcast %276 : vector<1x256xf32> to vector<8x256xf32>
    %278 = arith.mulf %275, %277 : vector<8x256xf32>
    %279 = arith.addf %274, %278 : vector<8x256xf32>
    %280 = vector.extract_strided_slice %249 {offsets = [0, 143], sizes = [8, 256], strides = [1, 1]} : vector<8x512xf32> to vector<8x256xf32>
    %c51 = arith.constant 51 : index
    %c0_85 = arith.constant 0 : index
    %281 = vector.load %arg1[%c51, %c0_85] : memref<54x256xf32, #tpu.memory_space<vmem>>, vector<1x256xf32>
    %282 = vector.broadcast %281 : vector<1x256xf32> to vector<8x256xf32>
    %283 = arith.mulf %280, %282 : vector<8x256xf32>
    %284 = arith.addf %279, %283 : vector<8x256xf32>
    %285 = vector.extract_strided_slice %249 {offsets = [0, 144], sizes = [8, 256], strides = [1, 1]} : vector<8x512xf32> to vector<8x256xf32>
    %c52 = arith.constant 52 : index
    %c0_86 = arith.constant 0 : index
    %286 = vector.load %arg1[%c52, %c0_86] : memref<54x256xf32, #tpu.memory_space<vmem>>, vector<1x256xf32>
    %287 = vector.broadcast %286 : vector<1x256xf32> to vector<8x256xf32>
    %288 = arith.mulf %285, %287 : vector<8x256xf32>
    %289 = arith.addf %284, %288 : vector<8x256xf32>
    %290 = vector.extract_strided_slice %249 {offsets = [0, 145], sizes = [8, 256], strides = [1, 1]} : vector<8x512xf32> to vector<8x256xf32>
    %c53 = arith.constant 53 : index
    %c0_87 = arith.constant 0 : index
    %291 = vector.load %arg1[%c53, %c0_87] : memref<54x256xf32, #tpu.memory_space<vmem>>, vector<1x256xf32>
    %292 = vector.broadcast %291 : vector<1x256xf32> to vector<8x256xf32>
    %293 = arith.mulf %290, %292 : vector<8x256xf32>
    %294 = arith.addf %289, %293 : vector<8x256xf32>
    %295 = arith.negf %294 : vector<8x256xf32>
    %296 = math.exp %295 : vector<8x256xf32>
    %cst_88 = arith.constant 1.000000e+00 : f32
    %297 = vector.broadcast %cst_88 : f32 to vector<8x256xf32>
    %298 = arith.addf %297, %296 : vector<8x256xf32>
    %299 = arith.divf %297, %298 : vector<8x256xf32>
    %c0_89 = arith.constant 0 : index
    %c0_90 = arith.constant 0 : index
    %c0_91 = arith.constant 0 : index
    %300 = vector.load %arg3[%c0_89, %c0_90, %c0_91] : memref<1x8x256xf32, #tpu.memory_space<vmem>>, vector<1x8x256xf32>
    %301 = vector.shape_cast %300 : vector<1x8x256xf32> to vector<8x256xf32>
    %302 = vector.shape_cast %299 : vector<8x256xf32> to vector<1x8x256xf32>
    tpu.vector_store %arg3[%c0_89, %c0_90, %c0_91], %302 {strides = array<i32>} : memref<1x8x256xf32, #tpu.memory_space<vmem>>, vector<1x8x256xf32>,
    return
  }
  func.func @transform_0(%arg0: i32) -> (i32, i32) {
    %c0_i32 = arith.constant 0 : i32
    %c0_i32_0 = arith.constant 0 : i32
    %c0_i32_1 = arith.constant 0 : i32
    return %c0_i32, %c0_i32_0 : i32, i32
  }
  func.func @transform_1(%arg0: i32) -> (i32, i32, i32, i32) {
    %c0_i32 = arith.constant 0 : i32
    %c0_i32_0 = arith.constant 0 : i32
    %c0_i32_1 = arith.constant 0 : i32
    %c0_i32_2 = arith.constant 0 : i32
    return %arg0, %c0_i32, %c0_i32_0, %c0_i32_1 : i32, i32, i32, i32
  }
  func.func @transform_2(%arg0: i32) -> (i32, i32, i32) {
    %c0_i32 = arith.constant 0 : i32
    %c0_i32_0 = arith.constant 0 : i32
    %c0_i32_1 = arith.constant 0 : i32
    return %arg0, %c0_i32, %c0_i32_0 : i32, i32, i32
  }
}

</mosaic_0001>

<bundles_post_ra>
// kernel: tpu_custom_call.1
= control target key start
LH: loop header
LB: loop body
LE: loop exit
PB: predicated region body
PF: predicated region fallthrough
CT: control target
= control target key end

     0   :  { %7 = vsyncpa [#allocation4], 0  ;;  %s5190_s0 = inlined_call_operand.hbm [shape: f32[54,256], index: 0, kind: input, shape index: {}]   ;;  %s5191_s1 = inlined_call_operand.hbm [shape: f32[2,4,8,256], index: 1, kind: input, shape index: {}]   ;;  %s5192_s2 = inlined_call_operand.hbm [shape: f32[2,8,256], index: 2, kind: output, shape index: {}]  }
   0x1   :  { %8 = vsyncpa [#allocation7], 0 }
   0x2   :  { %10 = vsyncpa [#allocation7 + $0x1], 0 }
   0x3   :  { %11 = vsyncpa [#allocation5], 0 }
   0x4   :  { %13 = vsyncpa [#allocation5 + $0x1], 0  ;;  %s3412_s9 = smov 0   ;;  %s3414_s10 = smov 0  }
   0x5   :  { %s3416_s11 = smov 0   ;;  %s3418_s12 = smov 0  }
   0x6 LB: > { %s3433_s13 = sadd.s32 4294967295, %s3378_s12   ;;  %s3100_s14 = sadd.s32 4294967294, %s3378_s12   ;;  %s3378_s12 = sphi %s3418_s12, %s5476_s12   ;;  %s3374_s11 = sphi %s3416_s11, %s5475_s11   ;;  %s3370_s10 = sphi %s3414_s10, %s5474_s10   ;;  %s3366_s9 = sphi %s3412_s9, %s5473_s9  }
   0x7   : > { %p60_p0 = scmp.ne.s32.totalorder %s3370_s10, %s3366_s9  ;;  %p61_p1 = scmp.eq.s32.totalorder %s3433_s13, 0 }
   0x8   : > { %p84_p2 = scmp.eq.s32.totalorder %s3433_s13, 1  ;;  %p90_p3 = scmp.eq.s32.totalorder %s3100_s14, 1 }
   0x9   : > { %p3442_p4 = por %p61_p1, %p60_p0  ;;  %p3101_p5 = scmp.ge.s32.totalorder %s3378_s12, 1 }
   0xa   : > { %p3447_p6 = por %p90_p3, %p60_p0  ;;  %p97_p7 = scmp.lt.s32.totalorder %s3378_s12, 3 }
   0xb   : > { %s108_s19 = sshll.u32 %s5190_s0, 4  ;;  %s3380_s21 = smov [#allocation3]   ;;  %s109_s19 = int_to_ptr.hbm [resolvable:$true] %s108_s19 }
   0xc   : > { %p3455_p8 = pnand %p3101_p5, %p97_p7  ;;  %s110_s22 = sshll.u32 %s3380_s21, 4  ;;  %s111_s22 = int_to_ptr.vmem [resolvable:$true] %s110_s22 }
   0xd   : > { %s3465_s23 = sadd.s32 1, %s3378_s12   ;;  %s3381_s24 = smov 256  }
   0xe   : > { %p3138_p9 = pneg %p3455_p8  ;;  %s3382_s25 = smov 16  }
   0xf   : > { %s44_s26 = ssub.s32 %s3378_s12, %s3465_s23  ;;  %s47_s27 = sadd.s32 1, %s3374_s11 }
  0x10   : > { %p3139_p10 = pnand %p3138_p9, %p61_p1  ;;  %p45_p12 = scmp.eq.s32.totalorder %s44_s26, 0 }
  0x11   : > { %p54_p13 = scmp.ne.s32.totalorder %s3374_s11, %s3370_s10  ;;  %p55_p0 = scmp.eq.s32.totalorder %s3378_s12, 0 }
  0x12   : > { %3141 = dma.hbm_to_vmem [thread:$0]  (!%p3139_p10), %s109_s19, 1792, %s111_s22, [#allocation4], %s3381_s24, %s3381_s24, %s3382_s25  }
  0x13   : > { %s3477_s28 = scalar_select %p45_p12, %s3374_s11, %s47_s27  }
  0x14   : > { %p3481_p3 = por %p84_p2, %p54_p13  ;;  %p3151_p5 = scmp.lt.s32.totalorder %s3378_s12, 2 }
  0x15   : > { %s124_s30 = sand.u32 1, %s3374_s11   ;;  %s3128_s3 = sshll.u32 %s3378_s12, 6 }
  0x16   : > { %p56_p7 = por %p55_p0, %p54_p13  ;;  %s3104_s4 = sshll.u32 %s124_s30, 6 }
  0x17   : > { %s133_s7 = scalar_lea.hbm %s5191_s1, %s3128_s3  ;;  %s128_s14 = scalar_lea.vmem [#allocation6], %s3104_s4 }
  0x18   : > { %s134_s8 = sshll.u32 %s133_s7, 4  ;;  %s136_s17 = sshll.u32 %s128_s14, 4  ;;  %s135_s8 = int_to_ptr.hbm [resolvable:$true] %s134_s8  ;;  %s137_s17 = int_to_ptr.vmem [resolvable:$true] %s136_s17 }
  0x19   : > { %p3491_p9 = pnand %p3151_p5, %p56_p7  ;;  %s125_s19 = scalar_lea.sflag [#allocation7], %s124_s30 }
  0x1a   : > { %s3278_s21 = sshra.s32 %s135_s8, 4  ;;  %s3285_s3 = scalar_lea.hbm %s5191_s1, 128  ;;  %s3279_s21 = int_to_ptr.hbm [resolvable:$true] %s3278_s21 }
  0x1b   : > { %s3280_s22 = scalar_lea.hbm %s3279_s21, 64  ;;  %p3282_p10 = pneg %p3491_p9 }
  0x1c   : > { %p3281_p2 = scmp.ne.s32.totalorder %s3279_s21, %s3280_s22  ;;  %p3286_p0 = scmp.lt.s32.totalorder %s3279_s21, %s5191_s1 }
  0x1d   : > { %p3287_p5 = scmp.lt.s32.totalorder %s3285_s3, %s3280_s22 }
  0x1e   : > { %p3283_p12 = pnand %p3282_p10, %p3281_p2 }
  0x1f   : > { %p3288_p7 = por %p3287_p5, %p3286_p0 }
  0x20   : > { %p3284_p13 = pneg %p3283_p12 }
  0x22   : > { %p3289_p11 = pnand %p3288_p7, %p3284_p13 }
  0x24   : > { %3292 = shalt.err (!%p3289_p11)
}
  0x25   : > { %3145 = dma.hbm_to_vmem [thread:$0]  (!%p3491_p9), %s135_s8, 1024, %s137_s17, %s125_s19, %s3381_s24, %s3381_s24, %s3382_s25  }
  0x26   : > { %148 = sbr.rel (%p3455_p8) target bundleno = 4575 (0x11df), region = 28 }
  0x2b   : > { %3353 = dma.done.wait (%p61_p1), [#allocation4], 1792  }
  0x2c   : > { %3355 = vsyncadd (%p61_p1), [#allocation4], 4294965504  ;;  %s3515_s30 = sand.u32 1, %s3370_s10  }
  0x2d   : > { %s3109_s6 = sshll.u32 %s3515_s30, 6  ;;  %s156_s7 = scalar_lea.sflag [#allocation7], %s3515_s30 }
  0x2e   : > { %s3519_s14 = scalar_lea.vmem [#allocation6], %s3109_s6 }
  0x2f   : > { %3357 = dma.done.wait (%p3442_p4), %s156_s7, 1024  }
  0x30   : > { %3359 = vsyncadd (%p3442_p4), %s156_s7, 4294966272  ;;  %v3383_v0 = vmov 0.0   ;;  %v266_v1 = vld [vmem:[#allocation3 + $0x1] ss:$8 sm:$0x3]  ;;  %s3384_s20 = smov 112  }
  0x31   : > { %183 = vst [vmem:[#allocation2 + $0x10] sm:$0xff] %v3383_v0  ;;  %v240_v2 = vld [vmem:[#allocation3] ss:$8 sm:$0x3]  ;;  %v268_v3 = vperm.slane %v266_v1, 0  ;;  %s3385_s24 = smov 111  }
  0x32   : > { %181 = vst [vmem:[#allocation2 + $0xb0] sm:$0xff] %v3383_v0  ;;  %v242_v4 = vperm.slane %v240_v2, 0  ;;  %v321_v5 = vld [vmem:[#allocation3 + $0x2] ss:$8 sm:$0x3]  ;;  %v205_v7 = vld [vmem:[%s3519_s14] sm:$0xff] }
  0x33   : > { %182 = vst [vmem:[#allocation2] sm:$0xff] %v3383_v0  ;;  %270 = vrot.lane.b32.xlu1 %v268_v3, %s3384_s20  ;;  %v324_v6 = vperm.slane %v321_v5, 1  ;;  %v3111_v8 = vld [vmem:[%s3519_s14 + $0x10] sm:$0xff]  ;;  %s3386_s15 = smov 113   ;;  %v269_v10 = vperm.slane %v266_v1, 1  ;;  %v243_v11 = vperm.slane %v240_v2, 1 }
  0x34   : > { %184 = vst [vmem:[#allocation2 + $0x48] sm:$0xff] %v3383_v0  ;;  %244 = vrot.lane.b32.xlu0 %v242_v4, %s3385_s24  ;;  %v210_v9 = vadd.f32 %v3111_v8, %v205_v7  ;;  %v212_v12 = vmax.f32 %v205_v7, %v3111_v8  ;;  %v3113_v13 = vld [vmem:[%s3519_s14 + $0x20] sm:$0xff]  ;;  %v429_v14 = vld [vmem:[#allocation3 + $0x4] ss:$8 sm:$0x3]  ;;  %v206_v17 = vld [vmem:[%s3519_s14 + $0x8] sm:$0xff] }
  0x35   : > { %185 = vst [vmem:[#allocation2 + $0x60] sm:$0xff] %v3383_v0  ;;  %327 = vrot.lane.b32.xlu2 %v324_v6, %s3386_s15  ;;  %v431_v16 = vperm.slane %v429_v14, 0  ;;  %v3112_v18 = vld [vmem:[%s3519_s14 + $0x18] sm:$0xff]  ;;  %v3115_v20 = vld [vmem:[%s3519_s14 + $0x30] sm:$0xff]  ;;  %v3114_v25 = vld [vmem:[%s3519_s14 + $0x28] sm:$0xff]  ;;  %v323_v29 = vperm.slane %v321_v5, 0 }
  0x36   : > { %188 = vst [vmem:[#allocation2 + $0x78] sm:$0xff] %v3383_v0  ;;  %v217_v15 = vadd.f32 %v3113_v13, %v210_v9  ;;  %v219_v19 = vmax.f32 %v212_v12, %v3113_v13  ;;  %v211_v22 = vadd.f32 %v3112_v18, %v206_v17  ;;  %v376_v23 = vld [vmem:[#allocation3 + $0x3] ss:$8 sm:$0x3]  ;;  %s3387_s25 = smov 127   ;;  %v432_v33 = vperm.slane %v429_v14, 1 }
  0x37   : > { %189 = vst [vmem:[#allocation2 + $0x88] sm:$0xff] %v3383_v0  ;;  %v3116_v28 = vld [vmem:[%s3519_s14 + $0x38] sm:$0xff]  ;;  %v378_v30 = vperm.slane %v376_v23, 0  ;;  %v379_v35 = vperm.slane %v376_v23, 1  ;;  %s3388_s8 = smov 1   ;;  %s3389_s17 = smov 15  }
  0x38   : > { %190 = vst [vmem:[#allocation2 + $0x90] sm:$0xff] %v3383_v0  ;;  %v218_v26 = vadd.f32 %v3114_v25, %v211_v22  ;;  %v3540_v27 = vadd.f32 %v3115_v20, %v217_v15  ;;  %v226_v31 = vmax.f32 %v219_v19, %v3115_v20  ;;  %v3549_v34 = vld [vmem:[#allocation2 + $0x10] sm:$0x80]  ;;  %v466_v39 = vld [vmem:[#allocation3 + $0x5] ss:$8 sm:$0x3] }
  0x39   : > { %191 = vst [vmem:[#allocation2 + $0x18] sm:$0xff] %v3383_v0  ;;  %v436_v36 = vmul.f32 %v432_v33, %v3549_v34  ;;  %v468_v42 = vperm.slane %v466_v39, 0  ;;  %v521_v43 = vld [vmem:[#allocation3 + $0x6] ss:$8 sm:$0x3]  ;;  %v469_v45 = vperm.slane %v466_v39, 1 }
  0x3a   : > { %192 = vst [vmem:[#allocation2 + $0x98] sm:$0xff] %v3383_v0  ;;  %v3536_v21 = vld [vmem:[#allocation2] sm:$0x80]  ;;  %v3544_v32 = vadd.f32 %v3116_v28, %v218_v26  ;;  %v523_v44 = vperm.slane %v521_v43, 0  ;;  %v524_v46 = vperm.slane %v521_v43, 1  ;;  %s3390_s18 = smov 16  }
  0x3b   : > { %193 = vst [vmem:[#allocation2 + $0x38] sm:$0xff] %v3383_v0  ;;  %272 = vrot.lane.b32.xlu1 %v269_v10, %s3384_s20  ;;  %v435_v24 = vmul.f32 %v431_v16, %v3536_v21  ;;  %v576_v47 = vld [vmem:[#allocation3 + $0x7] ss:$8 sm:$0x3]  ;;  %v232_v50 = vld [vmem:[#allocation2 + $0xb0] sm:$0x80] }
  0x3c   : > { %194 = vst [vmem:[#allocation2 + $0x50] sm:$0xff] %v3383_v0  ;;  %246 = vrot.lane.b32.xlu0 %v243_v11, %s3385_s24  ;;  %v579_v48 = vperm.slane %v576_v47, 1  ;;  %v578_v49 = vperm.slane %v576_v47, 0  ;;  %v236_v51 = vld [vmem:[#allocation2 + $0x60] sm:$0x7f]  ;;  %s3391_s19 = smov 126  }
  0x3d   : > { %195 = vst [vmem:[#allocation2 + $0x70] sm:$0xff] %v3383_v0  ;;  %443 = vrot.lane.b32.xlu2 %v435_v24, %s3385_s24  ;;  %v3611_v13 = vld [vmem:[#allocation2 + $0x48] sm:$0x80]  ;;  %s3392_s21 = smov 110   ;;  %s3393_s22 = smov 96   ;;  %vm303_vm0 = vcmask 1039360  }
  0x3e   : > { %196 = vst [vmem:[#allocation2 + $0xa0] sm:$0xff] %v3383_v0  ;;  %v3619_v20 = vld [vmem:[#allocation2 + $0x78] sm:$0x7f]  ;;  %s3394_s26 = smov 95   ;;  %vm274_vm1 = vcmask 916480   ;;  %vm329_vm2 = vcmask 924672  }
  0x3f   : > { %197 = vst [vmem:[#allocation2 + $0xa8] sm:$0xff] %v3383_v0  ;;  %vm474_vm3 = vcmask 7168   ;;  %vm529_vm4 = vcmask 121856   ;;  %vm584_vm5 = vcmask 130048   ;;  %s3395_s27 = smov 17   ;;  %vm639_vm6 = vcmask 138240  }
  0x40   : > { %200 = vst [vmem:[#allocation2 + $0x58] sm:$0xff] %v3383_v0  ;;  %s3396_s3 = smov 94   ;;  %vm1053_vm7 = vcmask 1045504   ;;  %vm358_vm8 = vcmask 1031168   ;;  %vm248_vm9 = vcmask 908288   ;;  %vm503_vm10 = vcmask 900096  }
  0x41   : > { %201 = vst [vmem:[#allocation2 + $0x80] sm:$0xff] %v3383_v0  ;;  %vm558_vm11 = vcmask 785408   ;;  %vm613_vm12 = vcmask 777216   ;;  %vm668_vm13 = vcmask 769024   ;;  %s3110_s4 = sshll.u32 %s3515_s30, 4  ;;  %s3129_s5 = sshll.u32 %s3433_s13, 4 }
  0x42   : > { %202 = vst [vmem:[#allocation2 + $0xb8] sm:$0xff] %v3383_v0  ;;  %s3002_s13 = scalar_lea.sflag [#allocation5], %s3515_s30 }
  0x43   : > { %203 = vst [vmem:[#allocation2 + $0x20] sm:$0xff] %v3383_v0  ;;  %325 = vrot.lane.b32.xlu1 %v323_v29, %s3386_s15 }
  0x44   : > { %204 = vst [vmem:[#allocation2 + $0x8] sm:$0xff] %v3383_v0  ;;  %380 = vrot.lane.b32.xlu0 %v378_v30, %s3387_s25 }
  0x45   : > { %228 = vst [vmem:[#allocation2 + $0x28] sm:$0xff] %v3540_v27 }
  0x46   : > { %230 = vst [vmem:[#allocation2 + $0x68] sm:$0xff] %v226_v31 }
  0x47   : > { %229 = vst [vmem:[#allocation2 + $0x40] sm:$0xff] %v3544_v32 }
  0x4b   : > { %382 = vrot.lane.b32.xlu1 %v379_v35, %s3387_s25 }
  0x4c   : > { %445 = vrot.lane.b32.xlu0 %v436_v36, %s3385_s24  ;;  %v3557_v38 = vld [vmem:[#allocation2 + $0x28] sm:$0x7f] }
  0x4d   : > { %v437_v41 = vmul.f32 %v431_v16, %v3557_v38 }
  0x4e   : > { %v3555_v37 = vld [vmem:[#allocation2 + $0x40] sm:$0x7f] }
  0x4f   : > { %v438_v40 = vmul.f32 %v432_v33, %v3555_v37 }
  0x51   : > { %449 = vrot.lane.b32.xlu2 %v438_v40, %s3385_s24 }
  0x53   : > { %447 = vrot.lane.b32.xlu1 %v437_v41, %s3385_s24 }
  0x54   : > { %470 = vrot.lane.b32.xlu0 %v468_v42, %s3388_s8 }
  0x59   : > { %525 = vrot.lane.b32.xlu2 %v523_v44, %s3389_s17 }
  0x5b   : > { %472 = vrot.lane.b32.xlu1 %v469_v45, %s3388_s8 }
  0x5c   : > { %527 = vrot.lane.b32.xlu0 %v524_v46, %s3389_s17 }
  0x61   : > { %582 = vrot.lane.b32.xlu2 %v579_v48, %s3390_s18 }
  0x63   : > { %580 = vrot.lane.b32.xlu1 %v578_v49, %s3390_s18 }
  0x8f   : > { %v3577_v56 = vpop.permute.xlu2 %327 }
  0x90   : > { %v336_v57 = vmul.f32 %v3577_v56, %v3549_v34  ;;  %v339_v61 = vmul.f32 %v3577_v56, %v3555_v37 }
  0x97   : > { %v3595_v4 = vpop.permute.xlu2 %443 }
  0xa5   : > { %v3569_v52 = vpop.permute.xlu1 %270 }
  0xa6   : > { %v3571_v53 = vpop.permute.xlu0 %244  ;;  %v282_v54 = vmul.f32 %v3569_v52, %v236_v51  ;;  %v279_v55 = vmul.f32 %v3569_v52, %v232_v50 }
  0xa8   : > { %297 = vrot.lane.b32.xlu1 %v282_v54, %s3387_s25  ;;  %291 = vrot.lane.b32.xlu2 %v279_v55, %s3387_s25 }
  0xab   : > { %v3606_v12 = vpop.permute.xlu2 %449 }
  0xad   : > { %v273_v58 = vpop.permute.xlu1 %272 }
  0xae   : > { %v3581_v59 = vpop.permute.xlu0 %246  ;;  %v281_v60 = vmul.f32 %v273_v58, %v3549_v34  ;;  %v284_v0 = vmul.f32 %v273_v58, %v3555_v37  ;;  %v275_v33 = vsel %vm274_vm1, %v3569_v52, %v273_v58 }
  0xaf   : > { %v280_v39 = vmul.f32 %v275_v33, %v3536_v21  ;;  %v283_v43 = vmul.f32 %v275_v33, %v3557_v38 }
  0xb0   : > { %295 = vrot.lane.b32.xlu0 %v281_v60, %s3387_s25  ;;  %350 = vrot.lane.b32.xlu2 %v336_v57, %s3391_s19  ;;  %v631_v57 = vld [vmem:[#allocation3 + $0x10] ss:$8 sm:$0x3] }
  0xb1   : > { %v634_v58 = vperm.slane %v631_v57, 1  ;;  %v633_v60 = vperm.slane %v631_v57, 0 }
  0xb3   : > { %v526_v19 = vpop.permute.xlu2 %525 }
  0xb4   : > { %v534_v28 = vmul.f32 %v526_v19, %v3536_v21  ;;  %v537_v35 = vmul.f32 %v526_v19, %v3557_v38 }
  0xb5   : > { %v3588_v62 = vpop.permute.xlu1 %325 }
  0xb6   : > { %v381_v63 = vpop.permute.xlu0 %380  ;;  %v334_v6 = vmul.f32 %v3588_v62, %v232_v50  ;;  %v337_v11 = vmul.f32 %v3588_v62, %v236_v51  ;;  %v330_v40 = vsel %vm329_vm2, %v3588_v62, %v3577_v56 }
  0xb7   : > { %v388_v3 = vmul.f32 %v381_v63, %v232_v50  ;;  %v391_v9 = vmul.f32 %v381_v63, %v236_v51  ;;  %v335_v41 = vmul.f32 %v330_v40, %v3536_v21  ;;  %v338_v46 = vmul.f32 %v330_v40, %v3557_v38 }
  0xb8   : > { %301 = vrot.lane.b32.xlu0 %v284_v0, %s3387_s25  ;;  %356 = vrot.lane.b32.xlu2 %v339_v61, %s3391_s19 }
  0xbb   : > { %v583_v26 = vpop.permute.xlu2 %582 }
  0xbc   : > { %v591_v30 = vmul.f32 %v583_v26, %v3611_v13  ;;  %v594_v56 = vmul.f32 %v583_v26, %v3619_v20 }
  0xbd   : > { %v383_v1 = vpop.permute.xlu1 %382 }
  0xbe   : > { %v3593_v2 = vpop.permute.xlu0 %445  ;;  %v390_v5 = vmul.f32 %v383_v1, %v3549_v34  ;;  %v393_v10 = vmul.f32 %v383_v1, %v3555_v37  ;;  %v384_v31 = vsel %vm303_vm0, %v381_v63, %v383_v1 }
  0xbf   : > { %v389_v36 = vmul.f32 %v384_v31, %v3536_v21  ;;  %v392_v42 = vmul.f32 %v384_v31, %v3557_v38 }
  0xc0   : > { %404 = vrot.lane.b32.xlu1 %v390_v5, %s3384_s20  ;;  %346 = vrot.lane.b32.xlu0 %v334_v6, %s3391_s19 }
  0xc1   : > { %400 = vrot.lane.b32.xlu2 %v388_v3, %s3384_s20 }
  0xc5   : > { %v3602_v7 = vpop.permute.xlu1 %447 }
  0xc6   : > { %v471_v8 = vpop.permute.xlu0 %470 }
  0xc7   : > { %v479_v16 = vmul.f32 %v471_v8, %v3536_v21  ;;  %v482_v23 = vmul.f32 %v471_v8, %v3557_v38 }
  0xc8   : > { %410 = vrot.lane.b32.xlu1 %v393_v10, %s3384_s20  ;;  %352 = vrot.lane.b32.xlu0 %v337_v11, %s3391_s19 }
  0xc9   : > { %406 = vrot.lane.b32.xlu2 %v391_v9, %s3384_s20 }
  0xcd   : > { %v473_v14 = vpop.permute.xlu1 %472 }
  0xce   : > { %v528_v15 = vpop.permute.xlu0 %527  ;;  %v481_v17 = vmul.f32 %v473_v14, %v3611_v13  ;;  %v484_v24 = vmul.f32 %v473_v14, %v3619_v20  ;;  %v475_v44 = vsel %vm474_vm3, %v471_v8, %v473_v14 }
  0xcf   : > { %v536_v18 = vmul.f32 %v528_v15, %v3611_v13  ;;  %v539_v22 = vmul.f32 %v528_v15, %v3619_v20  ;;  %v530_v45 = vsel %vm529_vm4, %v526_v19, %v528_v15  ;;  %v480_v47 = vmul.f32 %v475_v44, %v3549_v34 }
  0xd0   : > { %495 = vrot.lane.b32.xlu1 %v481_v17, %s3392_s21  ;;  %v535_v48 = vmul.f32 %v530_v45, %v3549_v34  ;;  %v483_v51 = vmul.f32 %v475_v44, %v3555_v37  ;;  %v538_v52 = vmul.f32 %v530_v45, %v3555_v37 }
  0xd1   : > { %550 = vrot.lane.b32.xlu0 %v536_v18, %s3393_s22  ;;  %491 = vrot.lane.b32.xlu2 %v479_v16, %s3392_s21 }
  0xd5   : > { %v581_v25 = vpop.permute.xlu1 %580 }
  0xd6   : > { %v589_v29 = vmul.f32 %v581_v25, %v3536_v21  ;;  %v585_v49 = vsel %vm584_vm5, %v581_v25, %v583_v26  ;;  %v592_v55 = vmul.f32 %v581_v25, %v3557_v38 }
  0xd7   : > { %v590_v50 = vmul.f32 %v585_v49, %v3549_v34  ;;  %v593_v54 = vmul.f32 %v585_v49, %v3555_v37 }
  0xd8   : > { %501 = vrot.lane.b32.xlu1 %v484_v24, %s3392_s21 }
  0xd9   : > { %556 = vrot.lane.b32.xlu0 %v539_v22, %s3393_s22  ;;  %497 = vrot.lane.b32.xlu2 %v482_v23, %s3392_s21 }
  0xe0   : > { %546 = vrot.lane.b32.xlu1 %v534_v28, %s3393_s22 }
  0xe1   : > { %601 = vrot.lane.b32.xlu0 %v589_v29, %s3394_s26  ;;  %605 = vrot.lane.b32.xlu2 %v591_v30, %s3394_s26 }
  0xe8   : > { %552 = vrot.lane.b32.xlu1 %v537_v35, %s3393_s22 }
  0xe9   : > { %402 = vrot.lane.b32.xlu0 %v389_v36, %s3384_s20  ;;  %293 = vrot.lane.b32.xlu2 %v280_v39, %s3387_s25 }
  0xf0   : > { %348 = vrot.lane.b32.xlu1 %v335_v41, %s3391_s19 }
  0xf1   : > { %408 = vrot.lane.b32.xlu0 %v392_v42, %s3384_s20  ;;  %299 = vrot.lane.b32.xlu2 %v283_v43, %s3387_s25 }
  0xf8   : > { %354 = vrot.lane.b32.xlu1 %v338_v46, %s3391_s19 }
  0xf9   : > { %493 = vrot.lane.b32.xlu0 %v480_v47, %s3392_s21  ;;  %548 = vrot.lane.b32.xlu2 %v535_v48, %s3393_s22 }
 0x100   : > { %603 = vrot.lane.b32.xlu1 %v590_v50, %s3394_s26 }
 0x101   : > { %499 = vrot.lane.b32.xlu0 %v483_v51, %s3392_s21  ;;  %554 = vrot.lane.b32.xlu2 %v538_v52, %s3393_s22 }
 0x102   : > { %v3704_v17 = vpop.permute.xlu2 %291 }
 0x108   : > { %609 = vrot.lane.b32.xlu1 %v593_v54, %s3394_s26 }
 0x109   : > { %607 = vrot.lane.b32.xlu0 %v592_v55, %s3394_s26  ;;  %611 = vrot.lane.b32.xlu2 %v594_v56, %s3394_s26 }
 0x10a   : > { %v3710_v22 = vpop.permute.xlu2 %350 }
 0x110   : > { %637 = vrot.lane.b32.xlu1 %v634_v58, %s3395_s27 }
 0x111   : > { %635 = vrot.lane.b32.xlu0 %v633_v60, %s3395_s27 }
 0x112   : > { %v3720_v28 = vpop.permute.xlu2 %356 }
 0x11a   : > { %v3676_v62 = vpop.permute.xlu1 %297 }
 0x11b   : > { %v3726_v31 = vpop.permute.xlu2 %400 }
 0x122   : > { %v3674_v61 = vpop.permute.xlu0 %295 }
 0x123   : > { %v3735_v42 = vpop.permute.xlu2 %406 }
 0x12a   : > { %v3678_v63 = vpop.permute.xlu0 %301 }
 0x12b   : > { %v3743_v45 = vpop.permute.xlu2 %491 }
 0x132   : > { %v3680_v0 = vpop.permute.xlu1 %404  ;;  %v3682_v1 = vpop.permute.xlu0 %346 }
 0x13a   : > { %v3684_v3 = vpop.permute.xlu1 %410  ;;  %v3686_v5 = vpop.permute.xlu0 %352 }
 0x142   : > { %v3688_v6 = vpop.permute.xlu1 %495 }
 0x143   : > { %v3690_v8 = vpop.permute.xlu0 %550 }
 0x14a   : > { %v3692_v9 = vpop.permute.xlu1 %501 }
 0x14b   : > { %5268 = vst [vmem:[#allocation12_spill] sm:$0xff] %v3692_v9  ;;  %v3694_v10 = vpop.permute.xlu0 %556 }
 0x14c   : > { %5269 = vst [vmem:[#allocation13_spill] sm:$0xff] %v3694_v10 }
 0x152   : > { %v3696_v11 = vpop.permute.xlu1 %546 }
 0x153   : > { %v3698_v14 = vpop.permute.xlu0 %601 }
 0x15a   : > { %v3700_v15 = vpop.permute.xlu1 %552 }
 0x15b   : > { %v3702_v16 = vpop.permute.xlu0 %402 }
 0x162   : > { %v3706_v18 = vpop.permute.xlu1 %348 }
 0x163   : > { %v3708_v19 = vpop.permute.xlu0 %408 }
 0x16a   : > { %v3712_v23 = vpop.permute.xlu1 %354 }
 0x16b   : > { %v3714_v24 = vpop.permute.xlu0 %493 }
 0x172   : > { %v3716_v25 = vpop.permute.xlu1 %603 }
 0x173   : > { %v3718_v26 = vpop.permute.xlu0 %499 }
 0x17a   : > { %v3722_v29 = vpop.permute.xlu1 %609 }
 0x17b   : > { %v3724_v30 = vpop.permute.xlu0 %607 }
 0x17c   : > { %5270 = vst [vmem:[#allocation14_spill] sm:$0xff] %v3724_v30 }
 0x182   : > { %v638_v33 = vpop.permute.xlu1 %637 }
 0x183   : > { %v636_v35 = vpop.permute.xlu0 %635  ;;  %v646_v36 = vmul.f32 %v638_v33, %v3611_v13  ;;  %v649_v44 = vmul.f32 %v638_v33, %v3619_v20 }
 0x184   : > { %v644_v39 = vmul.f32 %v636_v35, %v3536_v21  ;;  %v640_v40 = vsel %vm639_vm6, %v636_v35, %v638_v33  ;;  %v647_v43 = vmul.f32 %v636_v35, %v3557_v38  ;;  %v721_v21 = vld [vmem:[#allocation3 + $0x12] ss:$8 sm:$0x3]  ;;  %v3748_v38 = vpop.permute.xlu2 %497 }
 0x185   : > { %v645_v41 = vmul.f32 %v640_v40, %v3549_v34  ;;  %660 = vrot.lane.b32.xlu1 %v646_v36, %s3396_s3  ;;  %v648_v13 = vmul.f32 %v640_v40, %v3555_v37  ;;  %v690_v34 = vld [vmem:[#allocation3 + $0x11] ss:$8 sm:$0x3]  ;;  %v723_v46 = vperm.slane %v721_v21, 0  ;;  %v724_v37 = vperm.slane %v721_v21, 1 }
 0x186   : > { %656 = vrot.lane.b32.xlu2 %v644_v39, %s3396_s3  ;;  %v692_v47 = vperm.slane %v690_v34, 0  ;;  %v693_v48 = vperm.slane %v690_v34, 1  ;;  %v760_v21 = vld [vmem:[#allocation3 + $0x13] ss:$8 sm:$0x3] }
 0x187   : > { %658 = vrot.lane.b32.xlu0 %v645_v41, %s3396_s3  ;;  %v762_v34 = vperm.slane %v760_v21, 0 }
 0x18c   : > { %v3751_v20 = vpop.permute.xlu2 %605 }
 0x18d   : > { %666 = vrot.lane.b32.xlu1 %v649_v44, %s3396_s3 }
 0x18e   : > { %662 = vrot.lane.b32.xlu2 %v647_v43, %s3396_s3 }
 0x18f   : > { %664 = vrot.lane.b32.xlu0 %v648_v13, %s3396_s3 }
 0x194   : > { %v3753_v49 = vpop.permute.xlu2 %293 }
 0x195   : > { %725 = vrot.lane.b32.xlu1 %v723_v46, %s3384_s20  ;;  %v763_v46 = vperm.slane %v760_v21, 1 }
 0x196   : > { %694 = vrot.lane.b32.xlu2 %v692_v47, %s3385_s24 }
 0x197   : > { %696 = vrot.lane.b32.xlu0 %v693_v48, %s3385_s24 }
 0x19c   : > { %v3755_v50 = vpop.permute.xlu2 %299 }
 0x19e   : > { %727 = vrot.lane.b32.xlu2 %v724_v37, %s3384_s20 }
 0x1a4   : > { %v3757_v51 = vpop.permute.xlu2 %548 }
 0x1ac   : > { %v3759_v52 = vpop.permute.xlu2 %554 }
 0x1b4   : > { %v3761_v54 = vpop.permute.xlu2 %611 }
 0x1b5   : > { %5271 = vst [vmem:[#allocation15_spill] sm:$0xff] %v3761_v54 }
 0x1e0   : > { %v3763_v55 = vpop.permute.xlu2 %656 }
 0x1e8   : > { %v3765_v56 = vpop.permute.xlu2 %662 }
 0x1e9   : > { %5272 = vst [vmem:[#allocation16_spill] sm:$0xff] %v3765_v56 }
 0x1f0   : > { %v3767_v57 = vpop.permute.xlu2 %694 }
 0x1f7   : > { %v3769_v58 = vpop.permute.xlu1 %660 }
 0x1f8   : > { %v728_v60 = vpop.permute.xlu2 %727 }
 0x1f9   : > { %v735_v33 = vmul.f32 %v728_v60, %v3544_v32  ;;  %v3781_v47 = vpop.permute.xlu0 %658 }
 0x1fb   : > { %v741_v35 = vrot.slane %v735_v33, 1 }
 0x1fd   : > { %746 = vrot.lane.b32.xlu2 %v741_v35, %s3387_s25 }
 0x1ff   : > { %v3773_v36 = vpop.permute.xlu1 %666 }
 0x200   : > { %5273 = vst [vmem:[#allocation17_spill] sm:$0xff] %v3773_v36 }
 0x201   : > { %v3783_v48 = vpop.permute.xlu0 %664 }
 0x202   : > { %5274 = vst [vmem:[#allocation18_spill] sm:$0xff] %v3783_v48 }
 0x207   : > { %v726_v39 = vpop.permute.xlu1 %725 }
 0x208   : > { %v729_v40 = vsel %vm274_vm1, %v726_v39, %v728_v60  ;;  %v733_v41 = vmul.f32 0.0, %v726_v39 }
 0x209   : > { %v734_v43 = vmul.f32 %v729_v40, %v3540_v27  ;;  %v3785_v37 = vpop.permute.xlu0 %696 }
 0x20a   : > { %v739_v44 = vrot.slane %v733_v41, 1 }
 0x20b   : > { %v740_v13 = vrot.slane %v734_v43, 1 }
 0x20c   : > { %742 = vrot.lane.b32.xlu0 %v739_v44, %s3387_s25 }
 0x20d   : > { %744 = vrot.lane.b32.xlu1 %v740_v13, %s3387_s25 }
 0x214   : > { %764 = vrot.lane.b32.xlu0 %v762_v34, %s3386_s15 }
 0x215   : > { %766 = vrot.lane.b32.xlu1 %v763_v46, %s3386_s15  ;;  %v799_v46 = vld [vmem:[#allocation3 + $0x14] ss:$8 sm:$0x3] }
 0x216   : > { %v801_v36 = vperm.slane %v799_v46, 0  ;;  %v802_v54 = vperm.slane %v799_v46, 1  ;;  %v865_v46 = vld [vmem:[#allocation3 + $0x16] ss:$8 sm:$0x3] }
 0x27e   : > { %v3787_v60 = vpop.permute.xlu0 %742 }
 0x27f   : > { %5275 = vst [vmem:[#allocation19_spill] sm:$0xff] %v3787_v60  ;;  %v3789_v33 = vpop.permute.xlu1 %744 }
 0x280   : > { %5276 = vst [vmem:[#allocation20_spill] sm:$0xff] %v3789_v33 }
 0x286   : > { %v765_v35 = vpop.permute.xlu0 %764 }
 0x287   : > { %v772_v39 = vmul.f32 0.0, %v765_v35  ;;  %v767_v40 = vpop.permute.xlu1 %766 }
 0x288   : > { %v768_v41 = vsel %vm329_vm2, %v765_v35, %v767_v40  ;;  %v774_v43 = vmul.f32 %v767_v40, %v3544_v32  ;;  %v3799_v35 = vpop.permute.xlu2 %746  ;;  %v838_v40 = vld [vmem:[#allocation3 + $0x15] ss:$8 sm:$0x3] }
 0x289   : > { %v778_v44 = vrot.slane %v772_v39, 1  ;;  %v773_v13 = vmul.f32 %v768_v41, %v3540_v27  ;;  %5277 = vst [vmem:[#allocation21_spill] sm:$0xff] %v3799_v35 }
 0x28a   : > { %v780_v21 = vrot.slane %v774_v43, 1 }
 0x28b   : > { %781 = vrot.lane.b32.xlu2 %v778_v44, %s3391_s19  ;;  %v779_v34 = vrot.slane %v773_v13, 1  ;;  %v840_v44 = vperm.slane %v838_v40, 0 }
 0x28c   : > { %785 = vrot.lane.b32.xlu1 %v780_v21, %s3391_s19 }
 0x28d   : > { %783 = vrot.lane.b32.xlu0 %v779_v34, %s3391_s19  ;;  %v844_v21 = vmul.f32 %v840_v44, %v3540_v27 }
 0x28f   : > { %v848_v34 = vrot.slane %v844_v21, 1  ;;  %v867_v21 = vperm.slane %v865_v46, 0 }
 0x293   : > { %803 = vrot.lane.b32.xlu2 %v801_v36, %s3387_s25  ;;  %v868_v36 = vperm.slane %v865_v46, 1 }
 0x295   : > { %805 = vrot.lane.b32.xlu0 %v802_v54, %s3387_s25 }
 0x2e5   : > { %v3801_v39 = vpop.permute.xlu2 %781 }
 0x2e6   : > { %5278 = vst [vmem:[#allocation22_spill] sm:$0xff] %v3801_v39  ;;  %v841_v39 = vperm.slane %v838_v40, 1 }
 0x2e8   : > { %v845_v44 = vmul.f32 %v841_v39, %v3544_v32 }
 0x2ed   : > { %v804_v41 = vpop.permute.xlu2 %803 }
 0x2ee   : > { %v811_v43 = vmul.f32 0.0, %v804_v41 }
 0x2f0   : > { %v817_v13 = vrot.slane %v811_v43, 1 }
 0x2f2   : > { %820 = vrot.lane.b32.xlu1 %v817_v13, %s3384_s20 }
 0x2fa   : > { %850 = vrot.lane.b32.xlu1 %v848_v34, %s3385_s24  ;;  %v849_v34 = vrot.slane %v845_v44, 1 }
 0x2ff   : > { %v3806_v10 = vpop.permute.xlu0 %783 }
 0x300   : > { %5279 = vst [vmem:[#allocation23_spill] sm:$0xff] %v3806_v10 }
 0x302   : > { %871 = vrot.lane.b32.xlu1 %v868_v36, %s3388_s8 }
 0x307   : > { %v806_v54 = vpop.permute.xlu0 %805 }
 0x308   : > { %v807_v9 = vsel %vm303_vm0, %v804_v41, %v806_v54  ;;  %v813_v35 = vmul.f32 %v806_v54, %v3544_v32  ;;  %v3817_v41 = vpop.permute.xlu1 %785 }
 0x309   : > { %v812_v43 = vmul.f32 %v807_v9, %v3540_v27  ;;  %5280 = vst [vmem:[#allocation24_spill] sm:$0xff] %v3817_v41 }
 0x30a   : > { %v819_v13 = vrot.slane %v813_v35, 1 }
 0x30b   : > { %v818_v56 = vrot.slane %v812_v43, 1 }
 0x30c   : > { %824 = vrot.lane.b32.xlu0 %v819_v13, %s3384_s20 }
 0x30d   : > { %822 = vrot.lane.b32.xlu2 %v818_v56, %s3384_s20 }
 0x314   : > { %869 = vrot.lane.b32.xlu0 %v867_v21, %s3388_s8 }
 0x315   : > { %852 = vrot.lane.b32.xlu2 %v849_v34, %s3385_s24  ;;  %v904_v34 = vld [vmem:[#allocation3 + $0x17] ss:$8 sm:$0x3] }
 0x364   : > { %v3819_v36 = vpop.permute.xlu1 %820 }
 0x365   : > { %5281 = vst [vmem:[#allocation25_spill] sm:$0xff] %v3819_v36 }
 0x36c   : > { %v3821_v9 = vpop.permute.xlu1 %850 }
 0x36d   : > { %5282 = vst [vmem:[#allocation26_spill] sm:$0xff] %v3821_v9  ;;  %v906_v9 = vperm.slane %v904_v34, 0 }
 0x374   : > { %v872_v35 = vpop.permute.xlu1 %871 }
 0x375   : > { %v879_v40 = vmul.f32 0.0, %v872_v35 }
 0x377   : > { %v885_v54 = vrot.slane %v879_v40, 1  ;;  %v907_v40 = vperm.slane %v904_v34, 1 }
 0x379   : > { %890 = vrot.lane.b32.xlu1 %v885_v54, %s3392_s21  ;;  %v3833_v54 = vpop.permute.xlu2 %822 }
 0x37a   : > { %5284 = vst [vmem:[#allocation28_spill] sm:$0xff] %v3833_v54 }
 0x37e   : > { %v3824_v56 = vpop.permute.xlu0 %824 }
 0x37f   : > { %5283 = vst [vmem:[#allocation27_spill] sm:$0xff] %v3824_v56 }
 0x386   : > { %v870_v39 = vpop.permute.xlu0 %869 }
 0x387   : > { %v873_v46 = vsel %vm474_vm3, %v870_v39, %v872_v35  ;;  %v877_v43 = vmul.f32 %v870_v39, %v3540_v27  ;;  %v3835_v35 = vpop.permute.xlu2 %852 }
 0x388   : > { %v878_v13 = vmul.f32 %v873_v46, %v3544_v32  ;;  %5285 = vst [vmem:[#allocation29_spill] sm:$0xff] %v3835_v35 }
 0x389   : > { %v883_v44 = vrot.slane %v877_v43, 1 }
 0x38a   : > { %v884_v21 = vrot.slane %v878_v13, 1 }
 0x38b   : > { %886 = vrot.lane.b32.xlu2 %v883_v44, %s3392_s21  ;;  %v943_v44 = vld [vmem:[#allocation3 + $0x20] ss:$8 sm:$0x3] }
 0x38c   : > { %888 = vrot.lane.b32.xlu0 %v884_v21, %s3392_s21  ;;  %v945_v21 = vperm.slane %v943_v44, 0 }
 0x393   : > { %908 = vrot.lane.b32.xlu2 %v906_v9, %s3389_s17 }
 0x394   : > { %910 = vrot.lane.b32.xlu0 %v907_v40, %s3389_s17 }
 0x3e5   : > { %v3837_v39 = vpop.permute.xlu2 %886 }
 0x3e6   : > { %5286 = vst [vmem:[#allocation30_spill] sm:$0xff] %v3837_v39 }
 0x3ed   : > { %v909_v46 = vpop.permute.xlu2 %908 }
 0x3ee   : > { %v916_v43 = vmul.f32 %v909_v46, %v3540_v27 }
 0x3f0   : > { %v922_v13 = vrot.slane %v916_v43, 1  ;;  %v946_v43 = vperm.slane %v943_v44, 1 }
 0x3f2   : > { %925 = vrot.lane.b32.xlu1 %v922_v13, %s3393_s22  ;;  %v3849_v13 = vpop.permute.xlu1 %890 }
 0x3f3   : > { %5288 = vst [vmem:[#allocation32_spill] sm:$0xff] %v3849_v13 }
 0x3fa   : > { %947 = vrot.lane.b32.xlu1 %v945_v21, %s3390_s18 }
 0x3fe   : > { %v3842_v34 = vpop.permute.xlu0 %888 }
 0x3ff   : > { %5287 = vst [vmem:[#allocation31_spill] sm:$0xff] %v3842_v34 }
 0x406   : > { %v911_v9 = vpop.permute.xlu0 %910 }
 0x407   : > { %v912_v40 = vsel %vm529_vm4, %v909_v46, %v911_v9  ;;  %v918_v56 = vmul.f32 0.0, %v911_v9 }
 0x408   : > { %v917_v35 = vmul.f32 %v912_v40, %v3544_v32 }
 0x409   : > { %v924_v41 = vrot.slane %v918_v56, 1 }
 0x40a   : > { %v923_v39 = vrot.slane %v917_v35, 1 }
 0x40b   : > { %929 = vrot.lane.b32.xlu0 %v924_v41, %s3393_s22 }
 0x40c   : > { %927 = vrot.lane.b32.xlu2 %v923_v39, %s3393_s22 }
 0x414   : > { %949 = vrot.lane.b32.xlu2 %v946_v43, %s3390_s18  ;;  %v982_v43 = vld [vmem:[#allocation3 + $0x21] ss:$8 sm:$0x3] }
 0x415   : > { %v985_v13 = vperm.slane %v982_v43, 1 }
 0x464   : > { %v3851_v21 = vpop.permute.xlu1 %925 }
 0x465   : > { %5289 = vst [vmem:[#allocation33_spill] sm:$0xff] %v3851_v21 }
 0x466   : > { %v3853_v34 = vpop.permute.xlu2 %927 }
 0x467   : > { %5290 = vst [vmem:[#allocation34_spill] sm:$0xff] %v3853_v34  ;;  %v984_v34 = vperm.slane %v982_v43, 0 }
 0x46c   : > { %v948_v36 = vpop.permute.xlu1 %947 }
 0x46d   : > { %v955_v46 = vmul.f32 %v948_v36, %v3540_v27 }
 0x46e   : > { %v950_v9 = vpop.permute.xlu2 %949 }
 0x46f   : > { %v951_v56 = vsel %vm584_vm5, %v948_v36, %v950_v9  ;;  %v957_v35 = vmul.f32 0.0, %v950_v9  ;;  %v961_v40 = vrot.slane %v955_v46, 1 }
 0x470   : > { %v956_v41 = vmul.f32 %v951_v56, %v3544_v32 }
 0x471   : > { %964 = vrot.lane.b32.xlu0 %v961_v40, %s3394_s26  ;;  %v963_v39 = vrot.slane %v957_v35, 1 }
 0x472   : > { %v962_v44 = vrot.slane %v956_v41, 1 }
 0x473   : > { %968 = vrot.lane.b32.xlu2 %v963_v39, %s3394_s26 }
 0x474   : > { %966 = vrot.lane.b32.xlu1 %v962_v44, %s3394_s26 }
 0x479   : > { %986 = vrot.lane.b32.xlu0 %v984_v34, %s3395_s27 }
 0x47c   : > { %988 = vrot.lane.b32.xlu1 %v985_v13, %s3395_s27  ;;  %v1029_v13 = vld [vmem:[#allocation3 + $0x22] ss:$8 sm:$0x3] }
 0x47d   : > { %v3863_v36 = vpop.permute.xlu0 %929 }
 0x47e   : > { %5291 = vst [vmem:[#allocation35_spill] sm:$0xff] %v3863_v36  ;;  %v1076_v36 = vld [vmem:[#allocation3 + $0x23] ss:$8 sm:$0x3] }
 0x4e3   : > { %v3865_v46 = vpop.permute.xlu0 %964 }
 0x4e4   : > { %5292 = vst [vmem:[#allocation36_spill] sm:$0xff] %v3865_v46  ;;  %v1078_v46 = vperm.slane %v1076_v36, 0 }
 0x4e6   : > { %v3867_v9 = vpop.permute.xlu1 %966 }
 0x4e7   : > { %5293 = vst [vmem:[#allocation37_spill] sm:$0xff] %v3867_v9  ;;  %v1031_v9 = vperm.slane %v1029_v13, 0 }
 0x4eb   : > { %v987_v56 = vpop.permute.xlu0 %986 }
 0x4ec   : > { %v994_v35 = vmul.f32 %v987_v56, %v3540_v27  ;;  %v1032_v27 = vperm.slane %v1029_v13, 1  ;;  %v3896_v13 = vld [vmem:[#allocation2 + $0x28] sm:$0xfe] }
 0x4ee   : > { %v989_v40 = vpop.permute.xlu1 %988  ;;  %v1000_v41 = vrot.slane %v994_v35, 1 }
 0x4ef   : > { %v990_v39 = vsel %vm639_vm6, %v987_v56, %v989_v40  ;;  %v996_v44 = vmul.f32 0.0, %v989_v40  ;;  %v1079_v56 = vperm.slane %v1076_v36, 1 }
 0x4f0   : > { %1003 = vrot.lane.b32.xlu2 %v1000_v41, %s3396_s3  ;;  %v995_v34 = vmul.f32 %v990_v39, %v3544_v32  ;;  %v3879_v32 = vpop.permute.xlu2 %968  ;;  %v3887_v41 = vld [vmem:[#allocation2 + $0x18] sm:$0x1] }
 0x4f1   : > { %v1002_v43 = vrot.slane %v996_v44, 1  ;;  %5294 = vst [vmem:[#allocation38_spill] sm:$0xff] %v3879_v32 }
 0x4f2   : > { %v1001_v21 = vrot.slane %v995_v34, 1 }
 0x4f3   : > { %1007 = vrot.lane.b32.xlu1 %v1002_v43, %s3396_s3 }
 0x4f4   : > { %1005 = vrot.lane.b32.xlu0 %v1001_v21, %s3396_s3  ;;  %v3885_v21 = vld [vmem:[#allocation2 + $0x40] sm:$0xfe] }
 0x4f8   : > { %1033 = vrot.lane.b32.xlu2 %v1031_v9, %s3385_s24 }
 0x4fb   : > { %1080 = vrot.lane.b32.xlu1 %v1078_v46, %s3384_s20 }
 0x4fc   : > { %1035 = vrot.lane.b32.xlu0 %v1032_v27, %s3385_s24  ;;  %v3898_v27 = vld [vmem:[#allocation2 + $0x60] sm:$0xfe] }
 0x4fd   : > { %5298 = vst [vmem:[#allocation42_spill] sm:$0xff] %v3898_v27 }
 0x500   : > { %1082 = vrot.lane.b32.xlu2 %v1079_v56, %s3384_s20 }
 0x54a   : > { %v3881_v35 = vpop.permute.xlu2 %1003 }
 0x54b   : > { %5295 = vst [vmem:[#allocation39_spill] sm:$0xff] %v3881_v35 }
 0x552   : > { %v3883_v40 = vpop.permute.xlu2 %1033 }
 0x553   : > { %5296 = vst [vmem:[#allocation40_spill] sm:$0xff] %v3883_v40  ;;  %v3905_v40 = vld [vmem:[#allocation2 + $0x88] sm:$0x1] }
 0x554   : > { %5299 = vst [vmem:[#allocation43_spill] sm:$0xff] %v3905_v40 }
 0x55a   : > { %v1083_v39 = vpop.permute.xlu2 %1082 }
 0x55b   : > { %v1090_v9 = vmul.f32 %v1083_v39, %v3885_v21  ;;  %v1093_v46 = vmul.f32 %v1083_v39, %v3887_v41 }
 0x55d   : > { %v1102_v44 = vrot.slane %v1090_v9, 2  ;;  %v1107_v36 = vrot.slane %v1093_v46, 2  ;;  %v3902_v9 = vld [vmem:[#allocation2 + $0x90] sm:$0x1] }
 0x55f   : > { %1113 = vrot.lane.b32.xlu2 %v1102_v44, %s3387_s25  ;;  %v1108_v34 = vsel %vm1053_vm7, %v1102_v44, %v1107_v36 }
 0x565   : > { %v3893_v43 = vpop.permute.xlu1 %1007 }
 0x566   : > { %5297 = vst [vmem:[#allocation41_spill] sm:$0xff] %v3893_v43 }
 0x567   : > { %1119 = vrot.lane.b32.xlu2 %v1108_v34, %s3387_s25 }
 0x56d   : > { %v1081_v56 = vpop.permute.xlu1 %1080 }
 0x56e   : > { %v1088_v32 = vmul.f32 %v1081_v56, %v3898_v27  ;;  %v1084_v35 = vsel %vm274_vm1, %v1081_v56, %v1083_v39  ;;  %v1091_v36 = vmul.f32 %v1081_v56, %v3905_v40 }
 0x56f   : > { %v1089_v46 = vmul.f32 %v1084_v35, %v3896_v13  ;;  %v1092_v34 = vmul.f32 %v1084_v35, %v3902_v9  ;;  %v3917_v35 = vpop.permute.xlu0 %1005 }
 0x570   : > { %v1100_v44 = vrot.slane %v1088_v32, 2  ;;  %v1103_v54 = vrot.slane %v1091_v36, 2  ;;  %v1138_v32 = vld [vmem:[#allocation3 + $0x24] ss:$8 sm:$0x3]  ;;  %5300 = vst [vmem:[#allocation44_spill] sm:$0xff] %v3917_v35 }
 0x571   : > { %v1101_v43 = vrot.slane %v1089_v46, 2  ;;  %v1105_v10 = vrot.slane %v1092_v34, 2  ;;  %v1140_v60 = vperm.slane %v1138_v32, 0  ;;  %v1141_v56 = vperm.slane %v1138_v32, 1 }
 0x572   : > { %1109 = vrot.lane.b32.xlu0 %v1100_v44, %s3387_s25  ;;  %v1104_v39 = vsel %vm1053_vm7, %v1100_v44, %v1103_v54 }
 0x573   : > { %1111 = vrot.lane.b32.xlu1 %v1101_v43, %s3387_s25  ;;  %v1106_v48 = vsel %vm1053_vm7, %v1101_v43, %v1105_v10 }
 0x577   : > { %v3919_v46 = vpop.permute.xlu0 %1035 }
 0x578   : > { %5301 = vst [vmem:[#allocation45_spill] sm:$0xff] %v3919_v46 }
 0x57a   : > { %1115 = vrot.lane.b32.xlu0 %v1104_v39, %s3387_s25 }
 0x57b   : > { %1117 = vrot.lane.b32.xlu1 %v1106_v48, %s3387_s25 }
 0x582   : > { %1142 = vrot.lane.b32.xlu0 %v1140_v60, %s3386_s15 }
 0x583   : > { %1144 = vrot.lane.b32.xlu1 %v1141_v56, %s3386_s15 }
 0x5e4   : > { %v3921_v36 = vpop.permute.xlu0 %1109 }
 0x5e5   : > { %5302 = vst [vmem:[#allocation46_spill] sm:$0xff] %v3921_v36  ;;  %v3923_v54 = vpop.permute.xlu1 %1111 }
 0x5e6   : > { %5303 = vst [vmem:[#allocation47_spill] sm:$0xff] %v3923_v54 }
 0x5ec   : > { %v3925_v44 = vpop.permute.xlu0 %1115 }
 0x5ed   : > { %5304 = vst [vmem:[#allocation48_spill] sm:$0xff] %v3925_v44  ;;  %v3927_v10 = vpop.permute.xlu1 %1117 }
 0x5ee   : > { %5305 = vst [vmem:[#allocation49_spill] sm:$0xff] %v3927_v10 }
 0x5f4   : > { %v1143_v48 = vpop.permute.xlu0 %1142 }
 0x5f5   : > { %v1145_v43 = vpop.permute.xlu1 %1144  ;;  %v1150_v34 = vmul.f32 %v1143_v48, %v3898_v27  ;;  %v1153_v35 = vmul.f32 %v1143_v48, %v3905_v40 }
 0x5f6   : > { %v1152_v60 = vmul.f32 %v1145_v43, %v3885_v21  ;;  %v1146_v39 = vsel %vm329_vm2, %v1143_v48, %v1145_v43  ;;  %v1155_v54 = vmul.f32 %v1145_v43, %v3887_v41 }
 0x5f7   : > { %v1162_v32 = vrot.slane %v1150_v34, 2  ;;  %v1151_v56 = vmul.f32 %v1146_v39, %v3896_v13  ;;  %v1154_v10 = vmul.f32 %v1146_v39, %v3902_v9  ;;  %v1165_v46 = vrot.slane %v1153_v35, 2  ;;  %v3947_v35 = vpop.permute.xlu2 %1113 }
 0x5f8   : > { %v1164_v36 = vrot.slane %v1152_v60, 2  ;;  %v1169_v33 = vrot.slane %v1155_v54, 2  ;;  %v1200_v60 = vld [vmem:[#allocation3 + $0x25] ss:$8 sm:$0x3]  ;;  %5306 = vst [vmem:[#allocation50_spill] sm:$0xff] %v3947_v35 }
 0x5f9   : > { %1171 = vrot.lane.b32.xlu2 %v1162_v32, %s3391_s19  ;;  %v1163_v44 = vrot.slane %v1151_v56, 2  ;;  %v1167_v30 = vrot.slane %v1154_v10, 2  ;;  %v1166_v34 = vsel %vm1053_vm7, %v1162_v32, %v1165_v46  ;;  %v1202_v56 = vperm.slane %v1200_v60, 0 }
 0x5fa   : > { %1175 = vrot.lane.b32.xlu1 %v1164_v36, %s3391_s19  ;;  %v1170_v48 = vsel %vm1053_vm7, %v1164_v36, %v1169_v33  ;;  %v1203_v39 = vperm.slane %v1200_v60, 1 }
 0x5fb   : > { %1173 = vrot.lane.b32.xlu0 %v1163_v44, %s3391_s19  ;;  %v1168_v43 = vsel %vm1053_vm7, %v1163_v44, %v1167_v30 }
 0x5ff   : > { %v3949_v46 = vpop.permute.xlu2 %1119 }
 0x600   : > { %5307 = vst [vmem:[#allocation51_spill] sm:$0xff] %v3949_v46 }
 0x601   : > { %1177 = vrot.lane.b32.xlu2 %v1166_v34, %s3391_s19  ;;  %v1262_v34 = vld [vmem:[#allocation3 + $0x26] ss:$8 sm:$0x3] }
 0x602   : > { %1181 = vrot.lane.b32.xlu1 %v1170_v48, %s3391_s19  ;;  %v1264_v48 = vperm.slane %v1262_v34, 0 }
 0x603   : > { %1179 = vrot.lane.b32.xlu0 %v1168_v43, %s3391_s19 }
 0x609   : > { %1204 = vrot.lane.b32.xlu2 %v1202_v56, %s3387_s25  ;;  %v1268_v56 = vmul.f32 %v1264_v48, %v3896_v13 }
 0x60b   : > { %1206 = vrot.lane.b32.xlu0 %v1203_v39, %s3387_s25  ;;  %v1265_v39 = vperm.slane %v1262_v34, 1  ;;  %v1276_v46 = vrot.slane %v1268_v56, 2 }
 0x653   : > { %v3951_v54 = vpop.permute.xlu2 %1171 }
 0x654   : > { %5308 = vst [vmem:[#allocation52_spill] sm:$0xff] %v3951_v54 }
 0x65b   : > { %v3953_v33 = vpop.permute.xlu2 %1177 }
 0x65c   : > { %5309 = vst [vmem:[#allocation53_spill] sm:$0xff] %v3953_v33  ;;  %v1269_v33 = vmul.f32 %v1265_v39, %v3885_v21 }
 0x663   : > { %v1205_v36 = vpop.permute.xlu2 %1204 }
 0x664   : > { %v1212_v30 = vmul.f32 %v1205_v36, %v3898_v27  ;;  %v1215_v44 = vmul.f32 %v1205_v36, %v3905_v40 }
 0x666   : > { %v1224_v10 = vrot.slane %v1212_v30, 2  ;;  %v1227_v32 = vrot.slane %v1215_v44, 2  ;;  %v1271_v30 = vmul.f32 %v1265_v39, %v3887_v41  ;;  %v1277_v44 = vrot.slane %v1269_v33, 2 }
 0x668   : > { %1233 = vrot.lane.b32.xlu1 %v1224_v10, %s3384_s20  ;;  %v1228_v60 = vsel %vm1053_vm7, %v1224_v10, %v1227_v32  ;;  %v1280_v54 = vrot.slane %v1271_v30, 2  ;;  %v1270_v30 = vmul.f32 %v1264_v48, %v3902_v9 }
 0x66d   : > { %v3958_v43 = vpop.permute.xlu0 %1173 }
 0x66e   : > { %5310 = vst [vmem:[#allocation54_spill] sm:$0xff] %v3958_v43  ;;  %v1281_v43 = vsel %vm1053_vm7, %v1277_v44, %v1280_v54 }
 0x670   : > { %1239 = vrot.lane.b32.xlu1 %v1228_v60, %s3384_s20 }
 0x675   : > { %v3963_v35 = vpop.permute.xlu0 %1179 }
 0x676   : > { %5311 = vst [vmem:[#allocation55_spill] sm:$0xff] %v3963_v35 }
 0x678   : > { %1282 = vrot.lane.b32.xlu1 %v1276_v46, %s3385_s24 }
 0x67d   : > { %v1207_v40 = vpop.permute.xlu0 %1206 }
 0x67e   : > { %v1214_v10 = vmul.f32 %v1207_v40, %v3885_v21  ;;  %v1208_v32 = vsel %vm303_vm0, %v1205_v36, %v1207_v40  ;;  %v1217_v56 = vmul.f32 %v1207_v40, %v3887_v41  ;;  %v1278_v40 = vrot.slane %v1270_v30, 2 }
 0x67f   : > { %v1213_v34 = vmul.f32 %v1208_v32, %v3896_v13  ;;  %v1216_v33 = vmul.f32 %v1208_v32, %v3902_v9  ;;  %v1305_v32 = vld [vmem:[#allocation3 + $0x27] ss:$8 sm:$0x3] }
 0x680   : > { %v1226_v60 = vrot.slane %v1214_v10, 2  ;;  %1288 = vrot.lane.b32.xlu1 %v1281_v43, %s3385_s24  ;;  %v1231_v39 = vrot.slane %v1217_v56, 2  ;;  %v1279_v43 = vsel %vm1053_vm7, %v1276_v46, %v1278_v40  ;;  %v1307_v56 = vperm.slane %v1305_v32, 0  ;;  %v1367_v40 = vld [vmem:[#allocation3 + $0x30] ss:$8 sm:$0x3] }
 0x681   : > { %v1225_v35 = vrot.slane %v1213_v34, 2  ;;  %v1229_v54 = vrot.slane %v1216_v33, 2  ;;  %v1308_v34 = vperm.slane %v1305_v32, 1  ;;  %v1369_v32 = vperm.slane %v1367_v40, 0 }
 0x682   : > { %1237 = vrot.lane.b32.xlu0 %v1226_v60, %s3384_s20  ;;  %v1232_v36 = vsel %vm1053_vm7, %v1226_v60, %v1231_v39 }
 0x683   : > { %1235 = vrot.lane.b32.xlu2 %v1225_v35, %s3384_s20  ;;  %v1230_v10 = vsel %vm1053_vm7, %v1225_v35, %v1229_v54 }
 0x68a   : > { %1243 = vrot.lane.b32.xlu0 %v1232_v36, %s3384_s20 }
 0x68b   : > { %1241 = vrot.lane.b32.xlu2 %v1230_v10, %s3384_s20 }
 0x692   : > { %1286 = vrot.lane.b32.xlu0 %v1279_v43, %s3385_s24 }
 0x693   : > { %1284 = vrot.lane.b32.xlu2 %v1277_v44, %s3385_s24 }
 0x69a   : > { %1311 = vrot.lane.b32.xlu0 %v1308_v34, %s3388_s8  ;;  %v4005_v34 = vld [vmem:[#allocation2 + $0x78] sm:$0xfe] }
 0x69b   : > { %1309 = vrot.lane.b32.xlu2 %v1307_v56, %s3388_s8 }
 0x6dd   : > { %v3987_v48 = vpop.permute.xlu2 %1235 }
 0x6de   : > { %5312 = vst [vmem:[#allocation56_spill] sm:$0xff] %v3987_v48 }
 0x6e5   : > { %v3989_v60 = vpop.permute.xlu2 %1241 }
 0x6e6   : > { %5313 = vst [vmem:[#allocation57_spill] sm:$0xff] %v3989_v60 }
 0x6ed   : > { %v3991_v35 = vpop.permute.xlu2 %1284 }
 0x6ee   : > { %5314 = vst [vmem:[#allocation58_spill] sm:$0xff] %v3991_v35 }
 0x6f4   : > { %v3993_v33 = vpop.permute.xlu0 %1237 }
 0x6f5   : > { %5315 = vst [vmem:[#allocation59_spill] sm:$0xff] %v3993_v33  ;;  %v1310_v46 = vpop.permute.xlu2 %1309 }
 0x6f6   : > { %v1317_v39 = vmul.f32 %v1310_v46, %v3896_v13  ;;  %v1320_v44 = vmul.f32 %v1310_v46, %v3902_v9 }
 0x6f8   : > { %v1329_v54 = vrot.slane %v1317_v39, 2  ;;  %v1332_v36 = vrot.slane %v1320_v44, 2  ;;  %v4007_v39 = vld [vmem:[#allocation2 + $0x98] sm:$0x1] }
 0x6fa   : > { %1338 = vrot.lane.b32.xlu1 %v1329_v54, %s3392_s21  ;;  %v1333_v10 = vsel %vm1053_vm7, %v1329_v54, %v1332_v36 }
 0x6fc   : > { %v3998_v30 = vpop.permute.xlu0 %1243 }
 0x6fd   : > { %5316 = vst [vmem:[#allocation60_spill] sm:$0xff] %v3998_v30 }
 0x702   : > { %1344 = vrot.lane.b32.xlu1 %v1333_v10, %s3392_s21 }
 0x704   : > { %v4002_v43 = vpop.permute.xlu0 %1286 }
 0x705   : > { %5317 = vst [vmem:[#allocation61_spill] sm:$0xff] %v4002_v43 }
 0x70a   : > { %1371 = vrot.lane.b32.xlu1 %v1369_v32, %s3389_s17 }
 0x70c   : > { %v1312_v56 = vpop.permute.xlu0 %1311 }
 0x70d   : > { %v1319_v35 = vmul.f32 %v1312_v56, %v4005_v34  ;;  %v1313_v30 = vsel %vm474_vm3, %v1310_v46, %v1312_v56  ;;  %v1322_v36 = vmul.f32 %v1312_v56, %v4007_v39  ;;  %v4021_v56 = vpop.permute.xlu1 %1175 }
 0x70e   : > { %v1318_v44 = vmul.f32 %v1313_v30, %v3885_v21  ;;  %v1321_v43 = vmul.f32 %v1313_v30, %v3887_v41  ;;  %5318 = vst [vmem:[#allocation62_spill] sm:$0xff] %v4021_v56 }
 0x70f   : > { %v1331_v54 = vrot.slane %v1319_v35, 2  ;;  %v1336_v32 = vrot.slane %v1322_v36, 2  ;;  %v1370_v35 = vperm.slane %v1367_v40, 1 }
 0x710   : > { %v1330_v10 = vrot.slane %v1318_v44, 2  ;;  %v1334_v33 = vrot.slane %v1321_v43, 2 }
 0x711   : > { %1342 = vrot.lane.b32.xlu0 %v1331_v54, %s3392_s21  ;;  %v1337_v60 = vsel %vm1053_vm7, %v1331_v54, %v1336_v32 }
 0x712   : > { %1340 = vrot.lane.b32.xlu2 %v1330_v10, %s3392_s21  ;;  %v1335_v46 = vsel %vm1053_vm7, %v1330_v10, %v1334_v33 }
 0x715   : > { %v4023_v44 = vpop.permute.xlu1 %1181 }
 0x716   : > { %5319 = vst [vmem:[#allocation63_spill] sm:$0xff] %v4023_v44 }
 0x719   : > { %1348 = vrot.lane.b32.xlu0 %v1337_v60, %s3392_s21 }
 0x71a   : > { %1346 = vrot.lane.b32.xlu2 %v1335_v46, %s3392_s21 }
 0x71d   : > { %v4025_v30 = vpop.permute.xlu1 %1233 }
 0x71e   : > { %5320 = vst [vmem:[#allocation64_spill] sm:$0xff] %v4025_v30 }
 0x722   : > { %1373 = vrot.lane.b32.xlu2 %v1370_v35, %s3389_s17 }
 0x725   : > { %v4027_v48 = vpop.permute.xlu1 %1239 }
 0x726   : > { %5321 = vst [vmem:[#allocation65_spill] sm:$0xff] %v4027_v48 }
 0x72d   : > { %v4029_v43 = vpop.permute.xlu1 %1282 }
 0x72e   : > { %5322 = vst [vmem:[#allocation66_spill] sm:$0xff] %v4029_v43 }
 0x735   : > { %v4031_v54 = vpop.permute.xlu1 %1288 }
 0x736   : > { %5323 = vst [vmem:[#allocation67_spill] sm:$0xff] %v4031_v54 }
 0x76c   : > { %v4033_v60 = vpop.permute.xlu1 %1338  ;;  %v4035_v33 = vpop.permute.xlu2 %1340 }
 0x76d   : > { %5324 = vst [vmem:[#allocation68_spill] sm:$0xff] %v4033_v60 }
 0x76e   : > { %5325 = vst [vmem:[#allocation69_spill] sm:$0xff] %v4035_v33 }
 0x774   : > { %v4037_v36 = vpop.permute.xlu1 %1344  ;;  %v4039_v40 = vpop.permute.xlu2 %1346 }
 0x775   : > { %5326 = vst [vmem:[#allocation70_spill] sm:$0xff] %v4037_v36 }
 0x776   : > { %5327 = vst [vmem:[#allocation71_spill] sm:$0xff] %v4039_v40 }
 0x77c   : > { %v1372_v10 = vpop.permute.xlu1 %1371  ;;  %v1374_v32 = vpop.permute.xlu2 %1373 }
 0x77d   : > { %v1379_v46 = vmul.f32 %v1372_v10, %v3896_v13  ;;  %v1381_v35 = vmul.f32 %v1374_v32, %v4005_v34  ;;  %v1375_v44 = vsel %vm529_vm4, %v1372_v10, %v1374_v32  ;;  %v1382_v60 = vmul.f32 %v1372_v10, %v3902_v9 }
 0x77e   : > { %v1380_v54 = vmul.f32 %v1375_v44, %v3885_v21  ;;  %v1384_v33 = vmul.f32 %v1374_v32, %v4007_v39  ;;  %v1383_v36 = vmul.f32 %v1375_v44, %v3887_v41  ;;  %v1429_v32 = vld [vmem:[#allocation3 + $0x31] ss:$8 sm:$0x3] }
 0x77f   : > { %v1391_v56 = vrot.slane %v1379_v46, 2  ;;  %v1393_v48 = vrot.slane %v1381_v35, 2  ;;  %v1394_v43 = vrot.slane %v1382_v60, 2  ;;  %v1432_v44 = vperm.slane %v1429_v32, 1 }
 0x780   : > { %v1392_v40 = vrot.slane %v1380_v54, 2  ;;  %v1398_v30 = vrot.slane %v1384_v33, 2  ;;  %v1396_v27 = vrot.slane %v1383_v36, 2  ;;  %v1431_v54 = vperm.slane %v1429_v32, 0 }
 0x781   : > { %1400 = vrot.lane.b32.xlu0 %v1391_v56, %s3393_s22  ;;  %1404 = vrot.lane.b32.xlu2 %v1393_v48, %s3393_s22  ;;  %v1395_v46 = vsel %vm1053_vm7, %v1391_v56, %v1394_v43 }
 0x782   : > { %1402 = vrot.lane.b32.xlu1 %v1392_v40, %s3393_s22  ;;  %v1399_v35 = vsel %vm1053_vm7, %v1393_v48, %v1398_v30  ;;  %v1397_v10 = vsel %vm1053_vm7, %v1392_v40, %v1396_v27 }
 0x783   : > { %v4059_v60 = vpop.permute.xlu0 %1342 }
 0x784   : > { %5328 = vst [vmem:[#allocation72_spill] sm:$0xff] %v4059_v60 }
 0x789   : > { %1406 = vrot.lane.b32.xlu0 %v1395_v46, %s3393_s22  ;;  %1410 = vrot.lane.b32.xlu2 %v1399_v35, %s3393_s22 }
 0x78a   : > { %1408 = vrot.lane.b32.xlu1 %v1397_v10, %s3393_s22 }
 0x78b   : > { %v4061_v56 = vpop.permute.xlu0 %1348 }
 0x78c   : > { %5329 = vst [vmem:[#allocation73_spill] sm:$0xff] %v4061_v56 }
 0x791   : > { %1433 = vrot.lane.b32.xlu0 %v1431_v54, %s3390_s18 }
 0x792   : > { %1435 = vrot.lane.b32.xlu1 %v1432_v44, %s3390_s18 }
 0x7f3   : > { %v4063_v48 = vpop.permute.xlu0 %1400 }
 0x7f4   : > { %5330 = vst [vmem:[#allocation74_spill] sm:$0xff] %v4063_v48  ;;  %v4065_v30 = vpop.permute.xlu1 %1402 }
 0x7f5   : > { %5331 = vst [vmem:[#allocation75_spill] sm:$0xff] %v4065_v30 }
 0x7fb   : > { %v4067_v43 = vpop.permute.xlu0 %1406 }
 0x7fc   : > { %5332 = vst [vmem:[#allocation76_spill] sm:$0xff] %v4067_v43  ;;  %v4069_v27 = vpop.permute.xlu1 %1408 }
 0x7fd   : > { %5333 = vst [vmem:[#allocation77_spill] sm:$0xff] %v4069_v27 }
 0x803   : > { %v1434_v33 = vpop.permute.xlu0 %1433 }
 0x804   : > { %v1441_v36 = vmul.f32 %v1434_v33, %v3896_v13  ;;  %v1436_v40 = vpop.permute.xlu1 %1435  ;;  %v1444_v32 = vmul.f32 %v1434_v33, %v3902_v9 }
 0x805   : > { %v1437_v35 = vsel %vm584_vm5, %v1434_v33, %v1436_v40  ;;  %v1443_v10 = vmul.f32 %v1436_v40, %v4005_v34  ;;  %v1446_v56 = vmul.f32 %v1436_v40, %v4007_v39 }
 0x806   : > { %v1453_v46 = vrot.slane %v1441_v36, 2  ;;  %v1442_v54 = vmul.f32 %v1437_v35, %v3885_v21  ;;  %v1445_v27 = vmul.f32 %v1437_v35, %v3887_v41  ;;  %v1456_v43 = vrot.slane %v1444_v32, 2 }
 0x807   : > { %v1455_v44 = vrot.slane %v1443_v10, 2  ;;  %v1460_v36 = vrot.slane %v1446_v56, 2  ;;  %v1491_v10 = vld [vmem:[#allocation3 + $0x32] ss:$8 sm:$0x3]  ;;  %v4089_v56 = vpop.permute.xlu2 %1404 }
 0x808   : > { %1462 = vrot.lane.b32.xlu2 %v1453_v46, %s3394_s26  ;;  %v1454_v30 = vrot.slane %v1442_v54, 2  ;;  %v1458_v60 = vrot.slane %v1445_v27, 2  ;;  %v1457_v48 = vsel %vm1053_vm7, %v1453_v46, %v1456_v43  ;;  %v1493_v35 = vperm.slane %v1491_v10, 0  ;;  %5334 = vst [vmem:[#allocation78_spill] sm:$0xff] %v4089_v56 }
 0x809   : > { %1466 = vrot.lane.b32.xlu1 %v1455_v44, %s3394_s26  ;;  %v1461_v33 = vsel %vm1053_vm7, %v1455_v44, %v1460_v36  ;;  %v1494_v54 = vperm.slane %v1491_v10, 1  ;;  %v1561_v10 = vld [vmem:[#allocation3 + $0x33] ss:$8 sm:$0x3] }
 0x80a   : > { %1464 = vrot.lane.b32.xlu0 %v1454_v30, %s3394_s26  ;;  %v1459_v40 = vsel %vm1053_vm7, %v1454_v30, %v1458_v60 }
 0x80f   : > { %v4091_v43 = vpop.permute.xlu2 %1410 }
 0x810   : > { %1468 = vrot.lane.b32.xlu2 %v1457_v48, %s3394_s26  ;;  %5335 = vst [vmem:[#allocation79_spill] sm:$0xff] %v4091_v43 }
 0x811   : > { %1472 = vrot.lane.b32.xlu1 %v1461_v33, %s3394_s26 }
 0x812   : > { %1470 = vrot.lane.b32.xlu0 %v1459_v40, %s3394_s26  ;;  %v1563_v40 = vperm.slane %v1561_v10, 0 }
 0x818   : > { %1495 = vrot.lane.b32.xlu2 %v1493_v35, %s3395_s27 }
 0x81a   : > { %1497 = vrot.lane.b32.xlu0 %v1494_v54, %s3395_s27  ;;  %v1586_v54 = vld [vmem:[#allocation3 + $0x34] ss:$8 sm:$0x3] }
 0x81b   : > { %v1589_v43 = vperm.slane %v1586_v54, 1 }
 0x862   : > { %v4093_v48 = vpop.permute.xlu2 %1462 }
 0x86a   : > { %v4095_v27 = vpop.permute.xlu2 %1468 }
 0x86b   : > { %5336 = vst [vmem:[#allocation80_spill] sm:$0xff] %v4095_v27 }
 0x872   : > { %v1496_v46 = vpop.permute.xlu2 %1495 }
 0x873   : > { %v1503_v32 = vmul.f32 %v1496_v46, %v3896_v13  ;;  %v1506_v60 = vmul.f32 %v1496_v46, %v3902_v9 }
 0x875   : > { %v1515_v30 = vrot.slane %v1503_v32, 2  ;;  %v1518_v44 = vrot.slane %v1506_v60, 2 }
 0x877   : > { %1524 = vrot.lane.b32.xlu1 %v1515_v30, %s3396_s3  ;;  %v1519_v36 = vsel %vm1053_vm7, %v1515_v30, %v1518_v44 }
 0x87c   : > { %v4101_v33 = vpop.permute.xlu0 %1464 }
 0x87d   : > { %5337 = vst [vmem:[#allocation81_spill] sm:$0xff] %v4101_v33 }
 0x87f   : > { %1530 = vrot.lane.b32.xlu1 %v1519_v36, %s3396_s3 }
 0x884   : > { %v4104_v35 = vpop.permute.xlu0 %1470 }
 0x885   : > { %5338 = vst [vmem:[#allocation82_spill] sm:$0xff] %v4104_v35 }
 0x887   : > { %1565 = vrot.lane.b32.xlu1 %v1563_v40, %s3385_s24  ;;  %v3228_v40 = vld [vmem:[%s3519_s14 + $0x18] sm:$0xff] }
 0x88c   : > { %v1498_v27 = vpop.permute.xlu0 %1497 }
 0x88d   : > { %v1499_v32 = vsel %vm639_vm6, %v1496_v46, %v1498_v27  ;;  %v1505_v56 = vmul.f32 %v1498_v27, %v4005_v34  ;;  %v1508_v44 = vmul.f32 %v1498_v27, %v4007_v39  ;;  %v1588_v39 = vperm.slane %v1586_v54, 0  ;;  %v3227_v27 = vld [vmem:[%s3519_s14 + $0x8] sm:$0xff] }
 0x88e   : > { %v1504_v60 = vmul.f32 %v1499_v32, %v3885_v21  ;;  %v1507_v35 = vmul.f32 %v1499_v32, %v3887_v41  ;;  %v4121_v41 = vpop.permute.xlu1 %1466  ;;  %v213_v32 = vmax.f32 %v3227_v27, %v3228_v40 }
 0x88f   : > { %1592 = vrot.lane.b32.xlu1 %v1589_v43, %s3384_s20  ;;  %v1517_v30 = vrot.slane %v1505_v56, 2  ;;  %v1522_v46 = vrot.slane %v1508_v44, 2  ;;  %v1564_v43 = vperm.slane %v1561_v10, 1  ;;  %5339 = vst [vmem:[#allocation83_spill] sm:$0xff] %v4121_v41 }
 0x890   : > { %v1516_v36 = vrot.slane %v1504_v60, 2  ;;  %v1520_v34 = vrot.slane %v1507_v35, 2  ;;  %v3229_v35 = vld [vmem:[%s3519_s14 + $0x28] sm:$0xff] }
 0x891   : > { %1528 = vrot.lane.b32.xlu0 %v1517_v30, %s3396_s3  ;;  %v1523_v21 = vsel %vm1053_vm7, %v1517_v30, %v1522_v46  ;;  %v220_v60 = vmax.f32 %v213_v32, %v3229_v35  ;;  %v3230_v30 = vld [vmem:[%s3519_s14 + $0x38] sm:$0xff]  ;;  %v4147_v32 = vld [vmem:[#allocation2 + $0x38] sm:$0x80]  ;;  %s3013_s14 = scalar_lea.hbm %s5192_s2, %s3129_s5 }
 0x892   : > { %1526 = vrot.lane.b32.xlu2 %v1516_v36, %s3396_s3  ;;  %v1521_v56 = vsel %vm1053_vm7, %v1516_v36, %v1520_v34  ;;  %v4135_v34 = vld [vmem:[#allocation2 + $0x70] sm:$0x80] }
 0x893   : > { %v227_v44 = vmax.f32 %v220_v60, %v3230_v30  ;;  %v4149_v60 = vld [vmem:[#allocation2 + $0x50] sm:$0x80] }
 0x895   : > { %231 = vst [vmem:[#allocation2 + $0x30] sm:$0xff] %v227_v44 }
 0x896   : > { %v4127_v46 = vpop.permute.xlu1 %1472 }
 0x897   : > { %5340 = vst [vmem:[#allocation84_spill] sm:$0xff] %v4127_v46 }
 0x899   : > { %1534 = vrot.lane.b32.xlu0 %v1523_v21, %s3396_s3 }
 0x89a   : > { %1532 = vrot.lane.b32.xlu2 %v1521_v56, %s3396_s3 }
 0x8a1   : > { %1590 = vrot.lane.b32.xlu0 %v1588_v39, %s3384_s20 }
 0x8a2   : > { %1567 = vrot.lane.b32.xlu2 %v1564_v43, %s3385_s24  ;;  %v4141_v43 = vld [vmem:[#allocation2 + $0x30] sm:$0x7f] }
 0x8e9   : > { %v4129_v36 = vpop.permute.xlu1 %1524 }
 0x8ea   : > { %5341 = vst [vmem:[#allocation85_spill] sm:$0xff] %v4129_v36 }
 0x8f1   : > { %v4131_v54 = vpop.permute.xlu1 %1530 }
 0x8f2   : > { %5342 = vst [vmem:[#allocation86_spill] sm:$0xff] %v4131_v54 }
 0x8f9   : > { %v4133_v10 = vpop.permute.xlu1 %1565 }
 0x8fa   : > { %5343 = vst [vmem:[#allocation87_spill] sm:$0xff] %v4133_v10 }
 0x901   : > { %v1593_v21 = vpop.permute.xlu1 %1592 }
 0x902   : > { %v1600_v56 = vmul.f32 %v1593_v21, %v4135_v34  ;;  %v1603_v27 = vmul.f32 %v1593_v21, %v4141_v43 }
 0x903   : > { %v4138_v39 = vpop.permute.xlu0 %1528 }
 0x904   : > { %5344 = vst [vmem:[#allocation88_spill] sm:$0xff] %v4138_v39  ;;  %1614 = vrot.lane.b32.xlu1 %v1600_v56, %s3387_s25  ;;  %v4156_v56 = vld [vmem:[#allocation2 + $0xa8] sm:$0x7f] }
 0x90b   : > { %v4144_v40 = vpop.permute.xlu0 %1534 }
 0x90c   : > { %5345 = vst [vmem:[#allocation89_spill] sm:$0xff] %v4144_v40  ;;  %1620 = vrot.lane.b32.xlu1 %v1603_v27, %s3387_s25  ;;  %v4158_v40 = vld [vmem:[#allocation2 + $0x68] sm:$0x7f] }
 0x913   : > { %v1591_v35 = vpop.permute.xlu0 %1590 }
 0x914   : > { %v1594_v30 = vsel %vm274_vm1, %v1591_v35, %v1593_v21  ;;  %v1598_v44 = vmul.f32 %v1591_v35, %v4147_v32  ;;  %v1601_v27 = vmul.f32 %v1591_v35, %v4156_v56  ;;  %v1639_v21 = vld [vmem:[#allocation3 + $0x35] ss:$8 sm:$0x3] }
 0x915   : > { %v1599_v46 = vmul.f32 %v1594_v30, %v4149_v60  ;;  %v1602_v39 = vmul.f32 %v1594_v30, %v4158_v40  ;;  %v1641_v54 = vperm.slane %v1639_v21, 0  ;;  %v1642_v33 = vperm.slane %v1639_v21, 1 }
 0x916   : > { %1610 = vrot.lane.b32.xlu2 %v1598_v44, %s3387_s25 }
 0x917   : > { %1612 = vrot.lane.b32.xlu0 %v1599_v46, %s3387_s25  ;;  %v4166_v46 = vpop.permute.xlu2 %1526 }
 0x918   : > { %5346 = vst [vmem:[#allocation90_spill] sm:$0xff] %v4166_v46 }
 0x91e   : > { %1616 = vrot.lane.b32.xlu2 %v1601_v27, %s3387_s25 }
 0x91f   : > { %1618 = vrot.lane.b32.xlu0 %v1602_v39, %s3387_s25  ;;  %v4168_v44 = vpop.permute.xlu2 %1532 }
 0x920   : > { %5347 = vst [vmem:[#allocation91_spill] sm:$0xff] %v4168_v44 }
 0x926   : > { %1643 = vrot.lane.b32.xlu2 %v1641_v54, %s3386_s15 }
 0x927   : > { %1645 = vrot.lane.b32.xlu0 %v1642_v33, %s3386_s15  ;;  %v4170_v41 = vpop.permute.xlu2 %1567  ;;  %v1692_v33 = vld [vmem:[#allocation3 + $0x36] ss:$8 sm:$0x3] }
 0x928   : > { %5348 = vst [vmem:[#allocation92_spill] sm:$0xff] %v4170_v41  ;;  %v1694_v46 = vperm.slane %v1692_v33, 0 }
 0x970   : > { %v4172_v35 = vpop.permute.xlu2 %1610 }
 0x971   : > { %5349 = vst [vmem:[#allocation93_spill] sm:$0xff] %v4172_v35 }
 0x978   : > { %v4174_v30 = vpop.permute.xlu2 %1616 }
 0x979   : > { %5350 = vst [vmem:[#allocation94_spill] sm:$0xff] %v4174_v30 }
 0x980   : > { %v1644_v27 = vpop.permute.xlu2 %1643 }
 0x981   : > { %v1651_v39 = vmul.f32 %v1644_v27, %v4147_v32  ;;  %v1654_v21 = vmul.f32 %v1644_v27, %v4156_v56 }
 0x983   : > { %1663 = vrot.lane.b32.xlu1 %v1651_v39, %s3391_s19 }
 0x989   : > { %v4179_v54 = vpop.permute.xlu0 %1612 }
 0x98a   : > { %5351 = vst [vmem:[#allocation95_spill] sm:$0xff] %v4179_v54 }
 0x98b   : > { %1669 = vrot.lane.b32.xlu1 %v1654_v21, %s3391_s19 }
 0x991   : > { %v4182_v44 = vpop.permute.xlu0 %1618 }
 0x992   : > { %5352 = vst [vmem:[#allocation96_spill] sm:$0xff] %v4182_v44 }
 0x993   : > { %1696 = vrot.lane.b32.xlu1 %v1694_v46, %s3387_s25  ;;  %v1695_v46 = vperm.slane %v1692_v33, 1 }
 0x999   : > { %v1646_v41 = vpop.permute.xlu0 %1645 }
 0x99a   : > { %v1647_v30 = vsel %vm329_vm2, %v1644_v27, %v1646_v41  ;;  %v1653_v35 = vmul.f32 %v1646_v41, %v4135_v34  ;;  %v1656_v39 = vmul.f32 %v1646_v41, %v4141_v43  ;;  %v4195_v27 = vpop.permute.xlu1 %1614 }
 0x99b   : > { %v1652_v36 = vmul.f32 %v1647_v30, %v4149_v60  ;;  %v1655_v21 = vmul.f32 %v1647_v30, %v4158_v40  ;;  %5353 = vst [vmem:[#allocation97_spill] sm:$0xff] %v4195_v27 }
 0x99c   : > { %1667 = vrot.lane.b32.xlu0 %v1653_v35, %s3391_s19 }
 0x99d   : > { %1665 = vrot.lane.b32.xlu2 %v1652_v36, %s3391_s19 }
 0x9a2   : > { %v4197_v44 = vpop.permute.xlu1 %1620 }
 0x9a3   : > { %5354 = vst [vmem:[#allocation98_spill] sm:$0xff] %v4197_v44  ;;  %v1745_v44 = vld [vmem:[#allocation3 + $0x37] ss:$8 sm:$0x3] }
 0x9a4   : > { %1673 = vrot.lane.b32.xlu0 %v1656_v39, %s3391_s19 }
 0x9a5   : > { %1671 = vrot.lane.b32.xlu2 %v1655_v21, %s3391_s19 }
 0x9ad   : > { %1698 = vrot.lane.b32.xlu2 %v1695_v46, %s3387_s25 }
 0x9f5   : > { %v4199_v54 = vpop.permute.xlu1 %1663 }
 0x9f6   : > { %5355 = vst [vmem:[#allocation99_spill] sm:$0xff] %v4199_v54 }
 0x9f7   : > { %v4201_v35 = vpop.permute.xlu2 %1665 }
 0x9f8   : > { %5356 = vst [vmem:[#allocation100_spill] sm:$0xff] %v4201_v35 }
 0x9fd   : > { %v4203_v36 = vpop.permute.xlu1 %1669 }
 0x9fe   : > { %5357 = vst [vmem:[#allocation101_spill] sm:$0xff] %v4203_v36 }
 0x9ff   : > { %v4205_v41 = vpop.permute.xlu2 %1671 }
 0xa00   : > { %5358 = vst [vmem:[#allocation102_spill] sm:$0xff] %v4205_v41  ;;  %v1747_v41 = vperm.slane %v1745_v44, 0 }
 0xa02   : > { %v1751_v35 = vmul.f32 %v1747_v41, %v4149_v60 }
 0xa05   : > { %v1697_v30 = vpop.permute.xlu1 %1696 }
 0xa06   : > { %v1704_v39 = vmul.f32 %v1697_v30, %v4147_v32  ;;  %v1707_v27 = vmul.f32 %v1697_v30, %v4156_v56 }
 0xa07   : > { %v1699_v10 = vpop.permute.xlu2 %1698 }
 0xa08   : > { %v1700_v33 = vsel %vm303_vm0, %v1697_v30, %v1699_v10  ;;  %v1706_v21 = vmul.f32 %v1699_v10, %v4135_v34  ;;  %1716 = vrot.lane.b32.xlu0 %v1704_v39, %s3384_s20  ;;  %v1709_v36 = vmul.f32 %v1699_v10, %v4141_v43  ;;  %v1748_v39 = vperm.slane %v1745_v44, 1 }
 0xa09   : > { %v1705_v46 = vmul.f32 %v1700_v33, %v4149_v60  ;;  %v1708_v54 = vmul.f32 %v1700_v33, %v4158_v40  ;;  %v304_v44 = vsel %vm303_vm0, %v3704_v17, %v3753_v49  ;;  %v249_v33 = vsel %vm248_vm9, %v3571_v53, %v3581_v59 }
 0xa0a   : > { %1720 = vrot.lane.b32.xlu2 %v1706_v21, %s3384_s20  ;;  %v1753_v21 = vmul.f32 %v1747_v41, %v4158_v40  ;;  %v1754_v10 = vmul.f32 %v1748_v39, %v4141_v43  ;;  %v359_v41 = vsel %vm358_vm8, %v3682_v1, %v3706_v18  ;;  %v306_v17 = vsel %vm303_vm0, %v3676_v62, %v3755_v50 }
 0xa0b   : > { %1718 = vrot.lane.b32.xlu1 %v1705_v46, %s3384_s20  ;;  %v1752_v46 = vmul.f32 %v1748_v39, %v4135_v34  ;;  %v360_v1 = vsel %vm358_vm8, %v3706_v18, %v3710_v22  ;;  %v307_v18 = vsel %vm303_vm0, %v3755_v50, %v3678_v63  ;;  %v414_v50 = vsel %vm274_vm1, %v3735_v42, %v3708_v19 }
 0xa0c   : > { %v415_v42 = vsel %vm274_vm1, %v3708_v19, %v3684_v3  ;;  %v452_v19 = vsel %vm248_vm9, %v3602_v7, %v3606_v12 }
 0xa10   : > { %1722 = vrot.lane.b32.xlu0 %v1707_v27, %s3384_s20  ;;  %v1782_v27 = vld [vmem:[#allocation3 + $0x40] ss:$8 sm:$0x3] }
 0xa11   : > { %v1785_v30 = vperm.slane %v1782_v27, 1 }
 0xa12   : > { %1726 = vrot.lane.b32.xlu2 %v1709_v36, %s3384_s20  ;;  %v1784_v36 = vperm.slane %v1782_v27, 0 }
 0xa13   : > { %1724 = vrot.lane.b32.xlu1 %v1708_v54, %s3384_s20  ;;  %v3231_v54 = vld [vmem:[#allocation2 + $0xb0] sm:$0x80] }
 0xa18   : > { %1759 = vrot.lane.b32.xlu0 %v1751_v35, %s3385_s24  ;;  %v253_v35 = vmul.f32 %v3231_v54, %v3571_v53  ;;  %v3234_v54 = vld [vmem:[#allocation2 + $0x10] sm:$0x80] }
 0xa1a   : > { %1763 = vrot.lane.b32.xlu2 %v1753_v21, %s3385_s24  ;;  %v314_v39 = vadd.f32 %v304_v44, %v253_v35  ;;  %v305_v21 = vsel %vm303_vm0, %v3753_v49, %v3674_v61  ;;  %v255_v44 = vmul.f32 %v3234_v54, %v3581_v59  ;;  %v412_v49 = vsel %vm274_vm1, %v3726_v31, %v3702_v16 }
 0xa1b   : > { %1761 = vrot.lane.b32.xlu1 %v1752_v46, %s3385_s24  ;;  %v362_v31 = vsel %vm358_vm8, %v3712_v23, %v3720_v28 }
 0xa1c   : > { %v369_v46 = vadd.f32 %v359_v41, %v314_v39  ;;  %v361_v41 = vsel %vm358_vm8, %v3686_v5, %v3712_v23  ;;  %v413_v5 = vsel %vm274_vm1, %v3702_v16, %v3680_v0  ;;  %v451_v23 = vsel %vm248_vm9, %v3595_v4, %v3593_v2 }
 0xa1d   : > { %v504_v16 = vsel %vm503_vm10, %v3743_v45, %v3714_v24 }
 0xa1e   : > { %v422_v39 = vadd.f32 %v412_v49, %v369_v46 }
 0xa20   : > { %1765 = vrot.lane.b32.xlu0 %v1754_v10, %s3385_s24  ;;  %v3232_v10 = vld [vmem:[#allocation2] sm:$0x80]  ;;  %v459_v46 = vadd.f32 %v3595_v4, %v422_v39 }
 0xa21   : > { %v254_v27 = vmul.f32 %v3232_v10, %v249_v33 }
 0xa22   : > { %1788 = vrot.lane.b32.xlu2 %v1785_v30, %s3388_s8  ;;  %v3233_v30 = vld [vmem:[#allocation2 + $0x60] sm:$0x7f] }
 0xa23   : > { %1786 = vrot.lane.b32.xlu1 %v1784_v36, %s3388_s8  ;;  %v256_v36 = vmul.f32 %v3233_v30, %v3571_v53  ;;  %v315_v35 = vadd.f32 %v305_v21, %v254_v27  ;;  %v316_v53 = vadd.f32 %v3674_v61, %v255_v44  ;;  %v3235_v30 = vld [vmem:[#allocation2 + $0x28] sm:$0x7f] }
 0xa24   : > { %v257_v54 = vmul.f32 %v3235_v30, %v249_v33 }
 0xa25   : > { %v317_v62 = vadd.f32 %v306_v17, %v256_v36  ;;  %v370_v10 = vadd.f32 %v360_v1, %v315_v35  ;;  %v371_v61 = vadd.f32 %v3710_v22, %v316_v53  ;;  %v514_v22 = vadd.f32 %v3743_v45, %v459_v46  ;;  %v4289_v45 = vld [vmem:[#allocation2 + $0x10] sm:$0xff] }
 0xa26   : > { %v318_v27 = vadd.f32 %v307_v18, %v257_v54  ;;  %5359 = vst [vmem:[#allocation103_spill] sm:$0xff] %v4289_v45  ;;  %v702_v39 = vmul.f32 %v4289_v45, %v3767_v57  ;;  %v559_v53 = vsel %vm558_vm11, %v3696_v11, %v3757_v51  ;;  %v3237_v54 = vld [vmem:[#allocation2 + $0x40] sm:$0xff]  ;;  %v5420_v45 = vld [vmem:[#allocation69_spill] sm:$0xff] }
 0xa27   : > { %v372_v21 = vadd.f32 %v361_v41, %v317_v62  ;;  %v423_v17 = vadd.f32 %v413_v5, %v370_v10  ;;  %v424_v1 = vadd.f32 %v3680_v0, %v371_v61  ;;  %v505_v0 = vsel %vm503_vm10, %v3714_v24, %v3688_v6  ;;  %v3238_v5 = vld [vmem:[#allocation2 + $0x28] sm:$0xff] }
 0xa28   : > { %v373_v33 = vadd.f32 %v362_v31, %v318_v27  ;;  %v569_v62 = vadd.f32 %v3696_v11, %v514_v22  ;;  %v560_v24 = vsel %vm558_vm11, %v3757_v51, %v3690_v8  ;;  %v614_v11 = vsel %vm613_vm12, %v3698_v14, %v3716_v25 }
 0xa29   : > { %v425_v36 = vadd.f32 %v414_v50, %v372_v21  ;;  %v460_v44 = vadd.f32 %v451_v23, %v423_v17  ;;  %v461_v4 = vadd.f32 %v3593_v2, %v424_v1  ;;  %v506_v2 = vsel %vm503_vm10, %v3748_v38, %v3718_v26  ;;  %v5362_v1 = vld [vmem:[#allocation19_spill] sm:$0xff] }
 0xa2a   : > { %v426_v35 = vadd.f32 %v415_v42, %v373_v33  ;;  %v4313_v21 = vmul.f32 %v3237_v54, %v3785_v37  ;;  %v615_v8 = vsel %vm613_vm12, %v3716_v25, %v3751_v20  ;;  %v708_v31 = vrot.slane %v702_v39, 1  ;;  %v5363_v42 = vld [vmem:[#allocation18_spill] sm:$0xff] }
 0xa2b   : > { %v462_v49 = vadd.f32 %v3602_v7, %v425_v36  ;;  %v515_v41 = vadd.f32 %v504_v16, %v460_v44  ;;  %v516_v6 = vadd.f32 %v505_v0, %v461_v4  ;;  %v698_v7 = vsel %vm248_vm9, %v3767_v57, %v3785_v37  ;;  %v5361_v36 = vld [vmem:[#allocation20_spill] sm:$0xff]  ;;  %v5365_v4 = vld [vmem:[#allocation23_spill] sm:$0xff] }
 0xa2c   : > { %v463_v18 = vadd.f32 %v452_v19, %v426_v35  ;;  %v561_v57 = vsel %vm558_vm11, %v3700_v15, %v3759_v52  ;;  %v703_v46 = vmul.f32 %v3238_v5, %v698_v7  ;;  %v670_v25 = vsel %vm668_vm13, %v3781_v47, %v3769_v58  ;;  %v5364_v35 = vld [vmem:[#allocation16_spill] sm:$0xff] }
 0xa2d   : > { %v517_v10 = vadd.f32 %v3748_v38, %v462_v49  ;;  %v570_v30 = vadd.f32 %v559_v53, %v515_v41  ;;  %v624_v38 = vadd.f32 %v3698_v14, %v569_v62  ;;  %v571_v27 = vadd.f32 %v560_v24, %v516_v6  ;;  %v5360_v14 = vld [vmem:[#allocation14_spill] sm:$0xff]  ;;  %v5367_v24 = vld [vmem:[#allocation28_spill] sm:$0xff] }
 0xa2e   : > { %v518_v51 = vadd.f32 %v506_v2, %v463_v18  ;;  %v616_v50 = vsel %vm613_vm12, %v5360_v14, %v3722_v29  ;;  %v5256_v33 = vrot.slane %v4313_v21, 1  ;;  %v748_v23 = vsel %vm303_vm0, %v5362_v1, %v5361_v36  ;;  %v5366_v41 = vld [vmem:[#allocation22_spill] sm:$0xff] }
 0xa2f   : > { %v625_v61 = vadd.f32 %v614_v11, %v570_v30  ;;  %v572_v17 = vadd.f32 %v3700_v15, %v517_v10  ;;  %v679_v37 = vadd.f32 %v3763_v55, %v624_v38  ;;  %v626_v20 = vadd.f32 %v615_v8, %v571_v27  ;;  %v5369_v10 = vld [vmem:[#allocation21_spill] sm:$0xff]  ;;  %v5370_v38 = vld [vmem:[#allocation24_spill] sm:$0xff] }
 0xa30   : > { %v573_v16 = vadd.f32 %v561_v57, %v518_v51  ;;  %v669_v44 = vsel %vm668_vm13, %v3763_v55, %v3781_v47  ;;  %v671_v49 = vsel %vm668_vm13, %v5364_v35, %v5363_v42  ;;  %v709_v0 = vrot.slane %v703_v46, 1  ;;  %v5368_v55 = vld [vmem:[#allocation25_spill] sm:$0xff] }
 0xa31   : > { %v627_v15 = vadd.f32 %v5360_v14, %v572_v17  ;;  %v714_v22 = vadd.f32 %v708_v31, %v679_v37  ;;  %v681_v58 = vadd.f32 %v670_v25, %v626_v20  ;;  %v787_v62 = vsel %vm358_vm8, %v5366_v41, %v5365_v4  ;;  %v5371_v37 = vld [vmem:[#allocation26_spill] sm:$0xff]  ;;  %v5372_v20 = vld [vmem:[#allocation27_spill] sm:$0xff] }
 0xa32   : > { %v628_v39 = vadd.f32 %v616_v50, %v573_v16  ;;  %v680_v6 = vadd.f32 %v669_v44, %v625_v61  ;;  %v826_v47 = vsel %vm274_vm1, %v5368_v55, %v5367_v24  ;;  %v749_v7 = vsel %vm303_vm0, %v5361_v36, %v5369_v10  ;;  %v5373_v16 = vld [vmem:[#allocation30_spill] sm:$0xff]  ;;  %v5375_v44 = vld [vmem:[#allocation40_spill] sm:$0xff] }
 0xa33   : > { %v753_v19 = vadd.f32 %v748_v23, %v714_v22  ;;  %v682_v53 = vadd.f32 %v5364_v35, %v627_v15  ;;  %v716_v2 = vadd.f32 %v5256_v33, %v681_v58  ;;  %v788_v57 = vsel %vm358_vm8, %v5365_v4, %v5370_v38  ;;  %v5374_v22 = vld [vmem:[#allocation42_spill] sm:$0xff]  ;;  %v5380_v55 = vld [vmem:[#allocation36_spill] sm:$0xff]  ;;  %v5415_v33 = vld [vmem:[#allocation67_spill] sm:$0xff] }
 0xa34   : > { %v683_v18 = vadd.f32 %v671_v49, %v628_v39  ;;  %v715_v54 = vadd.f32 %v709_v0, %v680_v6  ;;  %v1041_v58 = vmul.f32 %v5375_v44, %v5374_v22  ;;  %v5377_v39 = vld [vmem:[#allocation29_spill] sm:$0xff]  ;;  %v5379_v6 = vld [vmem:[#allocation31_spill] sm:$0xff]  ;;  %v5388_v22 = vld [vmem:[#allocation38_spill] sm:$0xff] }
 0xa35   : > { %v792_v30 = vadd.f32 %v787_v62, %v753_v19  ;;  %v717_v11 = vadd.f32 %v708_v31, %v682_v53  ;;  %v755_v8 = vadd.f32 %v5369_v10, %v716_v2  ;;  %v827_v31 = vsel %vm274_vm1, %v5367_v24, %v5372_v20  ;;  %v5378_v53 = vld [vmem:[#allocation32_spill] sm:$0xff] }
 0xa36   : > { %v718_v51 = vadd.f32 %v709_v0, %v683_v18  ;;  %v754_v5 = vadd.f32 %v749_v7, %v715_v54  ;;  %v5376_v0 = vld [vmem:[#allocation33_spill] sm:$0xff]  ;;  %v854_v19 = vsel %vm248_vm9, %v5371_v37, %v5377_v39  ;;  %v4375_v2 = vsel %vm503_vm10, %v5379_v6, %v5378_v53  ;;  %v5381_v18 = vld [vmem:[#allocation43_spill] sm:$0xff] }
 0xa37   : > { %v831_v27 = vadd.f32 %v826_v47, %v792_v30  ;;  %v756_v46 = vadd.f32 %v748_v23, %v717_v11  ;;  %v794_v61 = vadd.f32 %v5370_v38, %v755_v8  ;;  %v892_v24 = vsel %vm503_vm10, %v5373_v16, %v5379_v6  ;;  %v5382_v8 = vld [vmem:[#allocation35_spill] sm:$0xff]  ;;  %v4417_v6 = vpop.permute.xlu0 %1667 }
 0xa38   : > { %v757_v17 = vadd.f32 %v749_v7, %v718_v51  ;;  %v793_v14 = vadd.f32 %v788_v57, %v754_v5  ;;  %v1044_v7 = vmul.f32 %v5375_v44, %v5381_v18  ;;  %v1054_v30 = vrot.slane %v1041_v58, 2  ;;  %v5383_v51 = vld [vmem:[#allocation34_spill] sm:$0xff]  ;;  %v5389_v58 = vld [vmem:[#allocation37_spill] sm:$0xff] }
 0xa39   : > { %v858_v25 = vadd.f32 %v5371_v37, %v831_v27  ;;  %v795_v50 = vadd.f32 %v787_v62, %v756_v46  ;;  %v833_v36 = vadd.f32 %v5372_v20, %v794_v61  ;;  %v5384_v61 = vld [vmem:[#allocation39_spill] sm:$0xff] }
 0xa3a   : > { %v796_v1 = vadd.f32 %v788_v57, %v757_v17  ;;  %v832_v35 = vadd.f32 %v827_v31, %v793_v14  ;;  %v4387_v57 = vsel %vm558_vm11, %v5383_v51, %v5382_v8  ;;  %v5392_v8 = vld [vmem:[#allocation56_spill] sm:$0xff] }
 0xa3b   : > { %v897_v15 = vadd.f32 %v5373_v16, %v858_v25  ;;  %v834_v23 = vadd.f32 %v826_v47, %v795_v50  ;;  %v860_v62 = vadd.f32 %v5377_v39, %v833_v36  ;;  %v931_v50 = vsel %vm558_vm11, %v5376_v0, %v5383_v51  ;;  %v5386_v36 = vld [vmem:[#allocation47_spill] sm:$0xff]  ;;  %v5393_v51 = vld [vmem:[#allocation64_spill] sm:$0xff] }
 0xa3c   : > { %v835_v49 = vadd.f32 %v827_v31, %v796_v1  ;;  %v859_v11 = vadd.f32 %v854_v19, %v832_v35  ;;  %v5387_v1 = vld [vmem:[#allocation46_spill] sm:$0xff]  ;;  %v1057_v35 = vrot.slane %v1044_v7, 2 }
 0xa3d   : > { %v936_v4 = vadd.f32 %v5376_v0, %v897_v15  ;;  %v861_v41 = vadd.f32 %v5371_v37, %v834_v23  ;;  %v899_v46 = vadd.f32 %v4375_v2, %v860_v62  ;;  %v5385_v37 = vld [vmem:[#allocation45_spill] sm:$0xff]  ;;  %v4407_v23 = vsel %vm613_vm12, %v5389_v58, %v5388_v22  ;;  %v5391_v62 = vld [vmem:[#allocation52_spill] sm:$0xff] }
 0xa3e   : > { %v862_v5 = vadd.f32 %v854_v19, %v835_v49  ;;  %v1037_v25 = vsel %vm248_vm9, %v5375_v44, %v5385_v37  ;;  %v898_v31 = vadd.f32 %v892_v24, %v859_v11  ;;  %v5390_v19 = vld [vmem:[#allocation54_spill] sm:$0xff] }
 0xa3f   : > { %v975_v47 = vadd.f32 %v5380_v55, %v936_v4  ;;  %v900_v54 = vadd.f32 %v5373_v16, %v861_v41  ;;  %v1121_v16 = vsel %vm303_vm0, %v5387_v1, %v5386_v36  ;;  %v938_v15 = vadd.f32 %v4387_v57, %v899_v46  ;;  %v3239_v4 = vld [vmem:[#allocation2 + $0x40] sm:$0xfe] }
 0xa40   : > { %v1042_v49 = vmul.f32 %v1037_v25, %v3896_v13  ;;  %v4411_v41 = vmul.f32 %v3239_v4, %v5385_v37  ;;  %v1183_v53 = vsel %vm358_vm8, %v5391_v62, %v5390_v19  ;;  %v937_v7 = vadd.f32 %v931_v50, %v898_v31  ;;  %v5398_v4 = vld [vmem:[#allocation48_spill] sm:$0xff] }
 0xa41   : > { %v1014_v17 = vadd.f32 %v5384_v61, %v975_v47  ;;  %v939_v14 = vadd.f32 %v5376_v0, %v900_v54  ;;  %v1045_v0 = vmul.f32 %v1037_v25, %v3902_v9  ;;  %v901_v47 = vadd.f32 %v892_v24, %v862_v5  ;;  %v5395_v25 = vld [vmem:[#allocation44_spill] sm:$0xff] }
 0xa42   : > { %v970_v13 = vsel %vm613_vm12, %v5380_v55, %v5389_v58  ;;  %v977_v54 = vadd.f32 %v4407_v23, %v938_v15  ;;  %v1245_v9 = vsel %vm274_vm1, %v5393_v51, %v5392_v8  ;;  %v1058_v5 = vsel %vm1053_vm7, %v1054_v30, %v1057_v35  ;;  %v5399_v51 = vld [vmem:[#allocation55_spill] sm:$0xff] }
 0xa43   : > { %v1069_v44 = vadd.f32 %v1054_v30, %v1014_v17  ;;  %v978_v18 = vadd.f32 %v5380_v55, %v939_v14  ;;  %v5394_v17 = vld [vmem:[#allocation41_spill] sm:$0xff]  ;;  %v1009_v55 = vsel %vm668_vm13, %v5384_v61, %v5395_v25  ;;  %v1055_v14 = vrot.slane %v1042_v49, 2 }
 0xa44   : > { %v4431_v24 = vsel %vm668_vm13, %v5395_v25, %v5394_v17  ;;  %v5255_v1 = vrot.slane %v4411_v41, 2  ;;  %v940_v22 = vadd.f32 %v931_v50, %v901_v47  ;;  %v976_v58 = vadd.f32 %v970_v13, %v937_v7  ;;  %v5401_v17 = vld [vmem:[#allocation66_spill] sm:$0xff] }
 0xa45   : > { %v1131_v11 = vadd.f32 %v1121_v16, %v1069_v44  ;;  %v1017_v46 = vadd.f32 %v5384_v61, %v978_v18  ;;  %5396 = vst [vmem:[#allocation14_spill] sm:$0xff] %v4431_v24  ;;  %v1059_v16 = vrot.slane %v1045_v0, 2  ;;  %v5397_v44 = vld [vmem:[#allocation49_spill] sm:$0xff]  ;;  %v1016_v30 = vadd.f32 %v4431_v24, %v977_v54  ;;  %v5402_v47 = vld [vmem:[#allocation50_spill] sm:$0xff] }
 0xa46   : > { %v1123_v62 = vsel %vm303_vm0, %v5398_v4, %v5397_v44  ;;  %v5400_v61 = vld [vmem:[#allocation53_spill] sm:$0xff]  ;;  %v1122_v7 = vsel %vm303_vm0, %v5386_v36, %v5402_v47 }
 0xa47   : > { %v1193_v31 = vadd.f32 %v1183_v53, %v1131_v11  ;;  %v1072_v35 = vadd.f32 %v1058_v5, %v1017_v46  ;;  %v979_v53 = vadd.f32 %v970_v13, %v940_v22  ;;  %v1015_v11 = vadd.f32 %v1009_v55, %v976_v58  ;;  %v5403_v13 = vld [vmem:[#allocation57_spill] sm:$0xff]  ;;  %v5405_v22 = vld [vmem:[#allocation68_spill] sm:$0xff] }
 0xa48   : > { %v1185_v49 = vsel %vm358_vm8, %v5400_v61, %v5399_v51  ;;  %v1071_v50 = vadd.f32 %v5255_v1, %v1016_v30  ;;  %v5404_v5 = vld [vmem:[#allocation65_spill] sm:$0xff]  ;;  %v5407_v61 = vld [vmem:[#allocation62_spill] sm:$0xff] }
 0xa49   : > { %v1255_v18 = vadd.f32 %v1245_v9, %v1193_v31  ;;  %v1060_v9 = vsel %vm1053_vm7, %v1055_v14, %v1059_v16  ;;  %v1134_v25 = vadd.f32 %v1123_v62, %v1072_v35  ;;  %v1018_v54 = vadd.f32 %v1009_v55, %v979_v53  ;;  %v4465_v62 = vpop.permute.xlu0 %1673  ;;  %v5408_v35 = vld [vmem:[#allocation74_spill] sm:$0xff] }
 0xa4a   : > { %v1070_v46 = vadd.f32 %v1055_v14, %v1015_v11  ;;  %v1247_v31 = vsel %vm274_vm1, %v5404_v5, %v5403_v13  ;;  %v1133_v4 = vadd.f32 %v5402_v47, %v1071_v50  ;;  %v1184_v36 = vsel %vm358_vm8, %v5390_v19, %v5407_v61  ;;  %v5410_v5 = vld [vmem:[#allocation59_spill] sm:$0xff] }
 0xa4b   : > { %v1298_v0 = vadd.f32 %v5401_v17, %v1255_v18  ;;  %v5406_v18 = vld [vmem:[#allocation51_spill] sm:$0xff]  ;;  %v1196_v16 = vadd.f32 %v1185_v49, %v1134_v25  ;;  %v1073_v14 = vadd.f32 %v1060_v9, %v1018_v54 }
 0xa4c   : > { %v1124_v30 = vsel %vm303_vm0, %v5397_v44, %v5406_v18  ;;  %v1132_v55 = vadd.f32 %v1122_v7, %v1070_v46  ;;  %v1195_v11 = vadd.f32 %v5407_v61, %v1133_v4  ;;  %v1246_v44 = vsel %vm274_vm1, %v5392_v8, %v5410_v5  ;;  %v5411_v9 = vld [vmem:[#allocation87_spill] sm:$0xff]  ;;  %v5412_v46 = vld [vmem:[#allocation60_spill] sm:$0xff]  ;;  %v5414_v8 = vld [vmem:[#allocation85_spill] sm:$0xff] }
 0xa4d   : > { %v1360_v58 = vadd.f32 %v5405_v22, %v1298_v0  ;;  %v5409_v0 = vld [vmem:[#allocation63_spill] sm:$0xff]  ;;  %v1258_v47 = vadd.f32 %v1247_v31, %v1196_v16  ;;  %v1135_v19 = vadd.f32 %v1124_v30, %v1073_v14  ;;  %v1573_v25 = vmul.f32 %v5411_v9, %v4147_v32  ;;  %v5413_v31 = vld [vmem:[#allocation61_spill] sm:$0xff] }
 0xa4e   : > { %v1186_v50 = vsel %vm358_vm8, %v5399_v51, %v5409_v0  ;;  %v1194_v49 = vadd.f32 %v1184_v36, %v1132_v55  ;;  %v1257_v54 = vadd.f32 %v5410_v5, %v1195_v11  ;;  %v1248_v51 = vsel %vm274_vm1, %v5403_v13, %v5412_v46  ;;  %v5416_v36 = vld [vmem:[#allocation70_spill] sm:$0xff]  ;;  %v5417_v14 = vld [vmem:[#allocation95_spill] sm:$0xff]  ;;  %v5418_v32 = vld [vmem:[#allocation93_spill] sm:$0xff] }
 0xa4f   : > { %v1422_v53 = vadd.f32 %v5408_v35, %v1360_v58  ;;  %v1301_v58 = vadd.f32 %v5413_v31, %v1258_v47  ;;  %v1197_v4 = vadd.f32 %v1186_v50, %v1135_v19  ;;  %v1291_v30 = vsel %vm248_vm9, %v5413_v31, %v5415_v33  ;;  %v5419_v5 = vld [vmem:[#allocation72_spill] sm:$0xff]  ;;  %v5421_v50 = vld [vmem:[#allocation58_spill] sm:$0xff] }
 0xa50   : > { %v1256_v61 = vadd.f32 %v1246_v44, %v1194_v49  ;;  %v1351_v13 = vsel %vm503_vm10, %v5420_v45, %v5419_v5  ;;  %v1290_v44 = vsel %vm248_vm9, %v5401_v17, %v5421_v50  ;;  %v1300_v19 = vadd.f32 %v5421_v50, %v1257_v54  ;;  %v5422_v49 = vld [vmem:[#allocation76_spill] sm:$0xff]  ;;  %v5426_v0 = vld [vmem:[#allocation78_spill] sm:$0xff]  ;;  %v5427_v5 = vld [vmem:[#allocation75_spill] sm:$0xff] }
 0xa51   : > { %v1484_v7 = vadd.f32 %v4093_v48, %v1422_v53  ;;  %v1363_v55 = vadd.f32 %v5416_v36, %v1301_v58  ;;  %v1622_v53 = vsel %vm303_vm0, %v5418_v32, %v5417_v14  ;;  %v1259_v11 = vadd.f32 %v1248_v51, %v1197_v4  ;;  %v5423_v31 = vld [vmem:[#allocation100_spill] sm:$0xff]  ;;  %v5424_v58 = vld [vmem:[#allocation99_spill] sm:$0xff]  ;;  %v4504_v32 = vld [vmem:[#allocation2 + $0xa0] sm:$0x80] }
 0xa52   : > { %v1675_v33 = vsel %vm358_vm8, %v5424_v58, %v5423_v31  ;;  %5425 = vst [vmem:[#allocation20_spill] sm:$0xff] %v4504_v32  ;;  %v1299_v4 = vadd.f32 %v1290_v44, %v1256_v61  ;;  %v1350_v17 = vsel %vm503_vm10, %v5405_v22, %v5420_v45  ;;  %v5428_v54 = vld [vmem:[#allocation71_spill] sm:$0xff]  ;;  %v1362_v50 = vadd.f32 %v1351_v13, %v1300_v19  ;;  %v5429_v58 = vld [vmem:[#allocation80_spill] sm:$0xff]  ;;  %v5431_v61 = vld [vmem:[#allocation81_spill] sm:$0xff] }
 0xa53   : > { %v1546_v16 = vadd.f32 %v5414_v8, %v1484_v7  ;;  %v1425_v7 = vadd.f32 %v5422_v49, %v1363_v55  ;;  %v1302_v51 = vadd.f32 %v1291_v30, %v1259_v11  ;;  %v1352_v55 = vsel %vm503_vm10, %v5416_v36, %v5428_v54  ;;  %v5430_v30 = vld [vmem:[#allocation83_spill] sm:$0xff]  ;;  %v5433_v54 = vld [vmem:[#allocation88_spill] sm:$0xff] }
 0xa54   : > { %v1475_v11 = vsel %vm613_vm12, %v5431_v61, %v5430_v30  ;;  %v1412_v22 = vsel %vm558_vm11, %v5408_v35, %v5427_v5  ;;  %v1361_v19 = vadd.f32 %v1350_v17, %v1299_v4  ;;  %v1474_v35 = vsel %vm613_vm12, %v4093_v48, %v5431_v61  ;;  %v5437_v4 = vld [vmem:[#allocation94_spill] sm:$0xff]  ;;  %v4545_v17 = vld [vmem:[#allocation2 + $0x58] sm:$0x7f] }
 0xa55   : > { %v1579_v47 = vadd.f32 %v1573_v25, %v1546_v16  ;;  %v1413_v25 = vsel %vm558_vm11, %v5427_v5, %v5426_v0  ;;  %v1487_v18 = vadd.f32 %v5429_v58, %v1425_v7  ;;  %v1576_v0 = vmul.f32 %v5411_v9, %v4156_v56  ;;  %v5432_v7 = vld [vmem:[#allocation86_spill] sm:$0xff] }
 0xa56   : > { %v1424_v36 = vadd.f32 %v1413_v25, %v1362_v50  ;;  %v5434_v56 = vld [vmem:[#allocation90_spill] sm:$0xff]  ;;  %v5435_v25 = vld [vmem:[#allocation92_spill] sm:$0xff] }
 0xa57   : > { %v1632_v16 = vadd.f32 %v1622_v53, %v1579_v47  ;;  %v1549_v30 = vadd.f32 %v5432_v7, %v1487_v18  ;;  %v5436_v50 = vld [vmem:[#allocation96_spill] sm:$0xff]  ;;  %v1536_v48 = vsel %vm668_vm13, %v5414_v8, %v5434_v56 }
 0xa58   : > { %v1486_v5 = vadd.f32 %v1475_v11, %v1424_v36  ;;  %v1624_v18 = vsel %vm303_vm0, %v5437_v4, %v5436_v50  ;;  %v5439_v11 = vld [vmem:[#allocation102_spill] sm:$0xff]  ;;  %v5440_v36 = vld [vmem:[#allocation101_spill] sm:$0xff] }
 0xa59   : > { %v1685_v53 = vadd.f32 %v1675_v33, %v1632_v16  ;;  %v1537_v33 = vsel %vm668_vm13, %v5434_v56, %v5433_v54  ;;  %v1423_v54 = vadd.f32 %v1412_v22, %v1361_v19  ;;  %v1677_v4 = vsel %vm358_vm8, %v5440_v36, %v5439_v11  ;;  %v5441_v19 = vld [vmem:[#allocation82_spill] sm:$0xff] }
 0xa5a   : > { %v1548_v61 = vadd.f32 %v1537_v33, %v1486_v5  ;;  %v1476_v8 = vsel %vm613_vm12, %v5429_v58, %v5441_v19 }
 0xa64   : > { %v4389_v27 = vpop.permute.xlu2 %1720 }
 0xa6c   : > { %v4438_v15 = vpop.permute.xlu2 %1726 }
 0xa74   : > { %v4475_v1 = vpop.permute.xlu2 %1763 }
 0xa7a   : > { %v1717_v46 = vpop.permute.xlu0 %1716 }
 0xa7c   : > { %v4516_v24 = vpop.permute.xlu2 %1788 }
 0xa7d   : > { %v1719_v47 = vpop.permute.xlu1 %1718  ;;  %v1796_v45 = vmul.f32 %v4516_v24, %v4504_v32 }
 0xa7e   : > { %v1728_v13 = vsel %vm274_vm1, %v1717_v46, %v1719_v47  ;;  %v1729_v44 = vsel %vm274_vm1, %v1719_v47, %v4389_v27  ;;  %v1569_v46 = vsel %vm248_vm9, %v5411_v9, %v5435_v25  ;;  %v1364_v47 = vadd.f32 %v1352_v55, %v1302_v51 }
 0xa7f   : > { %v1738_v16 = vadd.f32 %v1728_v13, %v1685_v53  ;;  %1810 = vrot.lane.b32.xlu2 %v1796_v45, %s3392_s21  ;;  %v5438_v53 = vld [vmem:[#allocation77_spill] sm:$0xff]  ;;  %v1582_v13 = vadd.f32 %v1576_v0, %v1549_v30  ;;  %v1575_v9 = vmul.f32 %v5435_v25, %v4135_v34  ;;  %v1485_v51 = vadd.f32 %v1474_v35, %v1423_v54  ;;  %v5443_v54 = vld [vmem:[#allocation91_spill] sm:$0xff] }
 0xa80   : > { %v1414_v45 = vsel %vm558_vm11, %v5422_v49, %v5438_v53  ;;  %v1574_v55 = vmul.f32 %v1569_v46, %v4149_v60  ;;  %v1799_v49 = vmul.f32 %v4516_v24, %v4545_v17  ;;  %v5442_v25 = vld [vmem:[#allocation97_spill] sm:$0xff] }
 0xa81   : > { %v1635_v22 = vadd.f32 %v1624_v18, %v1582_v13  ;;  %v1426_v0 = vadd.f32 %v1414_v45, %v1364_v47  ;;  %v1547_v30 = vadd.f32 %v1536_v48, %v1485_v51  ;;  %v1581_v5 = vadd.f32 %v1575_v9, %v1548_v61 }
 0xa82   : > { %v1723_v32 = vpop.permute.xlu0 %1722  ;;  %v1623_v36 = vsel %vm303_vm0, %v5417_v14, %v5442_v25  ;;  %v1538_v47 = vsel %vm668_vm13, %v5432_v7, %v5443_v54  ;;  %v1577_v48 = vmul.f32 %v1569_v46, %v4158_v40  ;;  %v1676_v14 = vsel %vm358_vm8, %v5423_v31, %v4417_v6 }
 0xa83   : > { %v1688_v56 = vadd.f32 %v1677_v4, %v1635_v22  ;;  %v1580_v45 = vadd.f32 %v1574_v55, %v1547_v30  ;;  %v1488_v58 = vadd.f32 %v1476_v8, %v1426_v0  ;;  %v1634_v9 = vadd.f32 %v5442_v25, %v1581_v5  ;;  %v5444_v55 = vld [vmem:[#allocation98_spill] sm:$0xff] }
 0xa84   : > { %v1625_v22 = vsel %vm303_vm0, %v5436_v50, %v5444_v55  ;;  %v1678_v31 = vsel %vm358_vm8, %v5439_v11, %v4465_v62 }
 0xa85   : > { %v1725_v33 = vpop.permute.xlu1 %1724  ;;  %v1550_v4 = vadd.f32 %v1538_v47, %v1488_v58  ;;  %v1687_v7 = vadd.f32 %v4417_v6, %v1634_v9 }
 0xa86   : > { %v1730_v35 = vsel %vm274_vm1, %v1723_v32, %v1725_v33  ;;  %v1731_v18 = vsel %vm274_vm1, %v1725_v33, %v4438_v15  ;;  %v1633_v32 = vadd.f32 %v1623_v36, %v1580_v45 }
 0xa87   : > { %v1741_v13 = vadd.f32 %v1730_v35, %v1688_v56  ;;  %1816 = vrot.lane.b32.xlu2 %v1799_v49, %s3392_s21  ;;  %v1583_v25 = vadd.f32 %v1577_v48, %v1550_v4  ;;  %v1740_v0 = vadd.f32 %v4389_v27, %v1687_v7  ;;  %v5445_v7 = vld [vmem:[#allocation12_spill] sm:$0xff] }
 0xa88   : > { %v1686_v49 = vadd.f32 %v1676_v14, %v1633_v32 }
 0xa89   : > { %v4580_v61 = vadd.f32 %v4475_v1, %v1741_v13  ;;  %v1636_v56 = vadd.f32 %v1625_v22, %v1583_v25  ;;  %v5446_v25 = vld [vmem:[#allocation13_spill] sm:$0xff] }
 0xa8a   : > { %v1760_v51 = vpop.permute.xlu0 %1759  ;;  %v1739_v8 = vadd.f32 %v1729_v44, %v1686_v49 }
 0xa8b   : > { %v4586_v46 = vadd.f32 %v1760_v51, %v1738_v16  ;;  %v1689_v50 = vadd.f32 %v1678_v31, %v1636_v56  ;;  %v5447_v31 = vld [vmem:[#allocation15_spill] sm:$0xff] }
 0xa8d   : > { %v1762_v30 = vpop.permute.xlu1 %1761  ;;  %v1742_v36 = vadd.f32 %v1731_v18, %v1689_v50  ;;  %v3241_v50 = vld [vmem:[#allocation2 + $0x18] sm:$0x1] }
 0xa8e   : > { %v1767_v6 = vsel %vm248_vm9, %v1760_v51, %v1762_v30  ;;  %v4593_v33 = vadd.f32 %v1762_v30, %v1740_v0  ;;  %v507_v51 = vsel %vm503_vm10, %v3718_v26, %v5445_v7  ;;  %v562_v0 = vsel %vm558_vm11, %v3759_v52, %v5446_v25  ;;  %v5460_v7 = vld [vmem:[#allocation89_spill] sm:$0xff] }
 0xa8f   : > { %v4595_v5 = vadd.f32 %v1767_v6, %v1739_v8  ;;  %v5448_v8 = vld [vmem:[#allocation17_spill] sm:$0xff]  ;;  %v5449_v26 = vrot.slane %v4313_v21, 1  ;;  %v5450_v21 = vrot.slane %v4411_v41, 2 }
 0xa92   : > { %v4597_v16 = vpop.permute.xlu0 %1765 }
 0xa93   : > { %v1768_v27 = vsel %vm248_vm9, %v4475_v1, %v4597_v16  ;;  %v1835_v1 = vld [vmem:[#allocation3 + $0x41] ss:$8 sm:$0x3] }
 0xa94   : > { %v4602_v35 = vadd.f32 %v1768_v27, %v1742_v36  ;;  %v1837_v58 = vperm.slane %v1835_v1, 0  ;;  %v1838_v48 = vperm.slane %v1835_v1, 1  ;;  %v1046_v36 = vmul.f32 %v3241_v50, %v5385_v37  ;;  %v5454_v1 = vld [vmem:[#allocation60_spill] sm:$0xff] }
 0xa95   : > { %v1787_v11 = vpop.permute.xlu1 %1786 }
 0xa96   : > { %v1790_v44 = vsel %vm474_vm3, %v1787_v11, %v4516_v24  ;;  %v1794_v47 = vmul.f32 %v1787_v11, %v4149_v60  ;;  %v1797_v18 = vmul.f32 %v1787_v11, %v4158_v40  ;;  %v3240_v24 = vld [vmem:[#allocation2 + $0x40] sm:$0x7f]  ;;  %v1061_v11 = vrot.slane %v1046_v36, 2 }
 0xa97   : > { %v1795_v45 = vmul.f32 %v1790_v44, %v4135_v34  ;;  %v1798_v13 = vmul.f32 %v1790_v44, %v4141_v43  ;;  %v258_v9 = vmul.f32 %v3240_v24, %v3581_v59  ;;  %v617_v59 = vsel %vm613_vm12, %v3722_v29, %v5447_v31 }
 0xa98   : > { %1806 = vrot.lane.b32.xlu0 %v1794_v47, %s3392_s21  ;;  %v5451_v47 = vld [vmem:[#allocation14_spill] sm:$0xff] }
 0xa99   : > { %1808 = vrot.lane.b32.xlu1 %v1795_v45, %s3392_s21  ;;  %v319_v14 = vadd.f32 %v3678_v63, %v258_v9 }
 0xa9b   : > { %v374_v32 = vadd.f32 %v3720_v28, %v319_v14  ;;  %v5459_v14 = vld [vmem:[#allocation84_spill] sm:$0xff] }
 0xa9d   : > { %v427_v4 = vadd.f32 %v3684_v3, %v374_v32  ;;  %v672_v3 = vsel %vm668_vm13, %v5363_v42, %v5448_v8  ;;  %v1477_v32 = vsel %vm613_vm12, %v5441_v19, %v5459_v14 }
 0xa9f   : > { %v464_v22 = vadd.f32 %v3606_v12, %v427_v4 }
 0xaa0   : > { %1812 = vrot.lane.b32.xlu0 %v1797_v18, %s3392_s21 }
 0xaa1   : > { %1814 = vrot.lane.b32.xlu1 %v1798_v13, %s3392_s21  ;;  %v519_v49 = vadd.f32 %v507_v51, %v464_v22  ;;  %v5453_v13 = vld [vmem:[#allocation63_spill] sm:$0xff]  ;;  %v1539_v51 = vsel %vm668_vm13, %v5443_v54, %v5460_v7 }
 0xaa3   : > { %v574_v63 = vadd.f32 %v562_v0, %v519_v49  ;;  %v5461_v49 = vld [vmem:[#allocation92_spill] sm:$0xff] }
 0xaa4   : > { %v1578_v25 = vmul.f32 %v5461_v49, %v4141_v43 }
 0xaa5   : > { %v629_v28 = vadd.f32 %v617_v59, %v574_v63 }
 0xaa7   : > { %v684_v30 = vadd.f32 %v672_v3, %v629_v28 }
 0xaa8   : > { %1839 = vrot.lane.b32.xlu0 %v1837_v58, %s3389_s17  ;;  %v5455_v58 = vld [vmem:[#allocation73_spill] sm:$0xff] }
 0xaa9   : > { %1841 = vrot.lane.b32.xlu1 %v1838_v48, %s3389_s17  ;;  %v719_v56 = vadd.f32 %v5449_v26, %v684_v30 }
 0xaab   : > { %v758_v12 = vadd.f32 %v5369_v10, %v719_v56  ;;  %v1062_v10 = vsel %vm1053_vm7, %v5450_v21, %v1061_v11  ;;  %v5462_v11 = vld [vmem:[#allocation20_spill] sm:$0xff]  ;;  %v1888_v21 = vld [vmem:[#allocation3 + $0x42] ss:$8 sm:$0x3] }
 0xaad   : > { %v797_v6 = vadd.f32 %v5370_v38, %v758_v12 }
 0xaaf   : > { %v836_v52 = vadd.f32 %v5372_v20, %v797_v6  ;;  %v5452_v20 = vld [vmem:[#allocation51_spill] sm:$0xff] }
 0xab1   : > { %v863_v29 = vadd.f32 %v5377_v39, %v836_v52 }
 0xab3   : > { %v902_v27 = vadd.f32 %v4375_v2, %v863_v29  ;;  %v5456_v2 = vld [vmem:[#allocation71_spill] sm:$0xff] }
 0xab4   : > { %v1353_v48 = vsel %vm503_vm10, %v5456_v2, %v5455_v58 }
 0xab5   : > { %v941_v42 = vadd.f32 %v4387_v57, %v902_v27  ;;  %v5457_v57 = vld [vmem:[#allocation67_spill] sm:$0xff] }
 0xab7   : > { %v980_v44 = vadd.f32 %v4407_v23, %v941_v42  ;;  %v5458_v23 = vld [vmem:[#allocation79_spill] sm:$0xff] }
 0xab8   : > { %v1415_v41 = vsel %vm558_vm11, %v5438_v53, %v5458_v23  ;;  %v1941_v23 = vld [vmem:[#allocation3 + $0x43] ss:$8 sm:$0x3] }
 0xab9   : > { %v1019_v38 = vadd.f32 %v5451_v47, %v980_v44  ;;  %v1891_v47 = vperm.slane %v1888_v21, 1 }
 0xabb   : > { %v1074_v45 = vadd.f32 %v1062_v10, %v1019_v38  ;;  %v1890_v10 = vperm.slane %v1888_v21, 0 }
 0xabd   : > { %v1136_v18 = vadd.f32 %v5452_v20, %v1074_v45 }
 0xabf   : > { %v1198_v37 = vadd.f32 %v5453_v13, %v1136_v18 }
 0xac1   : > { %v1260_v39 = vadd.f32 %v5454_v1, %v1198_v37 }
 0xac3   : > { %v1303_v24 = vadd.f32 %v5457_v57, %v1260_v39 }
 0xac5   : > { %v1365_v9 = vadd.f32 %v1353_v48, %v1303_v24 }
 0xac7   : > { %v1427_v4 = vadd.f32 %v1415_v41, %v1365_v9  ;;  %v1943_v41 = vperm.slane %v1941_v23, 0 }
 0xac9   : > { %v1489_v22 = vadd.f32 %v1477_v32, %v1427_v4 }
 0xacb   : > { %v1551_v0 = vadd.f32 %v1539_v51, %v1489_v22 }
 0xacd   : > { %v1584_v63 = vadd.f32 %v1578_v25, %v1551_v0 }
 0xacf   : > { %v1637_v28 = vadd.f32 %v5444_v55, %v1584_v63 }
 0xad1   : > { %v1690_v26 = vadd.f32 %v4465_v62, %v1637_v28 }
 0xad3   : > { %v1743_v56 = vadd.f32 %v4438_v15, %v1690_v26  ;;  %v3242_v26 = vld [vmem:[#allocation2 + $0x50] sm:$0x80] }
 0xad5   : > { %v1780_v6 = vadd.f32 %v4597_v16, %v1743_v56 }
 0xad9   : > { %v1811_v31 = vpop.permute.xlu2 %1810 }
 0xae1   : > { %v1817_v52 = vpop.permute.xlu2 %1816 }
 0xb0a   : > { %v1807_v59 = vpop.permute.xlu0 %1806 }
 0xb0b   : > { %v1828_v53 = vadd.f32 %v1807_v59, %v4586_v46  ;;  %v1809_v8 = vpop.permute.xlu1 %1808 }
 0xb0c   : > { %v1818_v3 = vsel %vm503_vm10, %v1807_v59, %v1809_v8  ;;  %v1819_v19 = vsel %vm503_vm10, %v1809_v8, %v1811_v31  ;;  %v1944_v31 = vperm.slane %v1941_v23, 1 }
 0xb0d   : > { %v1829_v30 = vadd.f32 %v1818_v3, %v4595_v5  ;;  %v1830_v54 = vadd.f32 %v1819_v19, %v4593_v33 }
 0xb12   : > { %v1813_v12 = vpop.permute.xlu0 %1812 }
 0xb13   : > { %v1831_v46 = vadd.f32 %v1813_v12, %v4580_v61  ;;  %v1815_v50 = vpop.permute.xlu1 %1814 }
 0xb14   : > { %v1820_v36 = vsel %vm503_vm10, %v1813_v12, %v1815_v50  ;;  %v1821_v29 = vsel %vm503_vm10, %v1815_v50, %v1817_v52 }
 0xb15   : > { %v1832_v55 = vadd.f32 %v1820_v36, %v4602_v35  ;;  %v1833_v5 = vadd.f32 %v1821_v29, %v1780_v6  ;;  %v3244_v36 = vld [vmem:[#allocation2 + $0x68] sm:$0x7f] }
 0xb1a   : > { %v1840_v27 = vpop.permute.xlu0 %1839 }
 0xb1b   : > { %v1847_v33 = vmul.f32 %v1840_v27, %v4149_v60  ;;  %v1842_v62 = vpop.permute.xlu1 %1841  ;;  %v1850_v61 = vmul.f32 %v1840_v27, %v4158_v40 }
 0xb1c   : > { %v1843_v15 = vsel %vm529_vm4, %v1840_v27, %v1842_v62  ;;  %v1849_v42 = vmul.f32 %v1842_v62, %v5462_v11  ;;  %v1852_v35 = vmul.f32 %v1842_v62, %v4545_v17  ;;  %v1998_v62 = vld [vmem:[#allocation3 + $0x44] ss:$8 sm:$0x3] }
 0xb1d   : > { %v1848_v16 = vmul.f32 %v1843_v15, %v4135_v34  ;;  %1859 = vrot.lane.b32.xlu2 %v1847_v33, %s3393_s22  ;;  %v1851_v44 = vmul.f32 %v1843_v15, %v4141_v43  ;;  %v3245_v15 = vld [vmem:[#allocation2 + $0x30] sm:$0x7f]  ;;  %v2001_v21 = vperm.slane %v1998_v62, 1 }
 0xb1e   : > { %1863 = vrot.lane.b32.xlu1 %v1849_v42, %s3393_s22 }
 0xb1f   : > { %1861 = vrot.lane.b32.xlu0 %v1848_v16, %s3393_s22  ;;  %v2029_v16 = vld [vmem:[#allocation3 + $0x45] ss:$8 sm:$0x3] }
 0xb25   : > { %1865 = vrot.lane.b32.xlu2 %v1850_v61, %s3393_s22 }
 0xb26   : > { %1869 = vrot.lane.b32.xlu1 %v1852_v35, %s3393_s22  ;;  %v2031_v35 = vperm.slane %v2029_v16, 0 }
 0xb27   : > { %1867 = vrot.lane.b32.xlu0 %v1851_v44, %s3393_s22 }
 0xb2d   : > { %1892 = vrot.lane.b32.xlu2 %v1890_v10, %s3390_s18 }
 0xb2f   : > { %1894 = vrot.lane.b32.xlu0 %v1891_v47, %s3390_s18 }
 0xb77   : > { %v1860_v38 = vpop.permute.xlu2 %1859 }
 0xb78   : > { %v1881_v45 = vadd.f32 %v1860_v38, %v1828_v53 }
 0xb7f   : > { %v1866_v20 = vpop.permute.xlu2 %1865 }
 0xb80   : > { %v1884_v18 = vadd.f32 %v1866_v20, %v1831_v46  ;;  %v3243_v46 = vld [vmem:[#allocation2 + $0x70] sm:$0x80] }
 0xb87   : > { %v1893_v13 = vpop.permute.xlu2 %1892 }
 0xb88   : > { %v1900_v37 = vmul.f32 %v1893_v13, %v4149_v60  ;;  %v1903_v1 = vmul.f32 %v1893_v13, %v4158_v40 }
 0xb8a   : > { %1912 = vrot.lane.b32.xlu1 %v1900_v37, %s3394_s26 }
 0xb90   : > { %v1864_v39 = vpop.permute.xlu1 %1863 }
 0xb91   : > { %v1862_v58 = vpop.permute.xlu0 %1861 }
 0xb92   : > { %v1871_v2 = vsel %vm558_vm11, %v1860_v38, %v1862_v58  ;;  %v1872_v48 = vsel %vm558_vm11, %v1862_v58, %v1864_v39  ;;  %1918 = vrot.lane.b32.xlu1 %v1903_v1, %s3394_s26  ;;  %v2068_v39 = vld [vmem:[#allocation3 + $0x46] ss:$8 sm:$0x3] }
 0xb93   : > { %v1882_v57 = vadd.f32 %v1871_v2, %v1829_v30  ;;  %v1883_v24 = vadd.f32 %v1872_v48, %v1830_v54  ;;  %v2070_v2 = vperm.slane %v2068_v39, 0 }
 0xb98   : > { %v1870_v9 = vpop.permute.xlu1 %1869 }
 0xb99   : > { %v1868_v14 = vpop.permute.xlu0 %1867 }
 0xb9a   : > { %v1873_v60 = vsel %vm558_vm11, %v1866_v20, %v1868_v14  ;;  %v1874_v32 = vsel %vm558_vm11, %v1868_v14, %v1870_v9  ;;  %1945 = vrot.lane.b32.xlu1 %v1943_v41, %s3395_s27  ;;  %v5463_v20 = vld [vmem:[#allocation103_spill] sm:$0xff] }
 0xb9b   : > { %v1885_v40 = vadd.f32 %v1873_v60, %v1832_v55  ;;  %v1886_v4 = vadd.f32 %v1874_v32, %v1833_v5 }
 0xba1   : > { %v1895_v7 = vpop.permute.xlu0 %1894 }
 0xba2   : > { %v1896_v51 = vsel %vm584_vm5, %v1893_v13, %v1895_v7  ;;  %v1902_v22 = vmul.f32 %v1895_v7, %v5462_v11  ;;  %v1905_v25 = vmul.f32 %v1895_v7, %v4545_v17 }
 0xba3   : > { %v1901_v49 = vmul.f32 %v1896_v51, %v4135_v34  ;;  %v1904_v0 = vmul.f32 %v1896_v51, %v4141_v43 }
 0xba4   : > { %1916 = vrot.lane.b32.xlu0 %v1902_v22, %s3394_s26 }
 0xba5   : > { %1914 = vrot.lane.b32.xlu2 %v1901_v49, %s3394_s26  ;;  %v4741_v49 = vld [vmem:[#allocation2 + $0x68] sm:$0xff] }
 0xbac   : > { %1922 = vrot.lane.b32.xlu0 %v1905_v25, %s3394_s26 }
 0xbad   : > { %1920 = vrot.lane.b32.xlu2 %v1904_v0, %s3394_s26 }
 0xbb5   : > { %1947 = vrot.lane.b32.xlu2 %v1944_v31, %s3395_s27 }
 0xbfc   : > { %v1913_v59 = vpop.permute.xlu1 %1912 }
 0xbfd   : > { %v1934_v63 = vadd.f32 %v1913_v59, %v1881_v45 }
 0xbff   : > { %v1915_v53 = vpop.permute.xlu2 %1914 }
 0xc00   : > { %v1924_v34 = vsel %vm613_vm12, %v1913_v59, %v1915_v53 }
 0xc01   : > { %v1935_v8 = vadd.f32 %v1924_v34, %v1882_v57 }
 0xc04   : > { %v1919_v3 = vpop.permute.xlu1 %1918 }
 0xc05   : > { %v1937_v19 = vadd.f32 %v1919_v3, %v1884_v18 }
 0xc07   : > { %v1921_v28 = vpop.permute.xlu2 %1920 }
 0xc08   : > { %v1926_v30 = vsel %vm613_vm12, %v1919_v3, %v1921_v28  ;;  %v4749_v3 = vld [vmem:[#allocation2 + $0x30] sm:$0xff] }
 0xc09   : > { %v1938_v54 = vadd.f32 %v1926_v30, %v1885_v40 }
 0xc0c   : > { %v1946_v43 = vpop.permute.xlu1 %1945 }
 0xc0d   : > { %v1953_v56 = vmul.f32 %v3242_v26, %v1946_v43  ;;  %v1956_v29 = vmul.f32 %v3244_v36, %v1946_v43 }
 0xc0f   : > { %1965 = vrot.lane.b32.xlu0 %v1953_v56, %s3396_s3  ;;  %v1948_v12 = vpop.permute.xlu2 %1947  ;;  %v2071_v56 = vperm.slane %v2068_v39, 1 }
 0xc10   : > { %v1949_v6 = vsel %vm639_vm6, %v1946_v43, %v1948_v12  ;;  %v1955_v52 = vmul.f32 %v1948_v12, %v5462_v11  ;;  %v1958_v27 = vmul.f32 %v1948_v12, %v4545_v17  ;;  %v2000_v11 = vperm.slane %v1998_v62, 0 }
 0xc11   : > { %v1954_v50 = vmul.f32 %v3243_v46, %v1949_v6  ;;  %v1957_v42 = vmul.f32 %v3245_v15, %v1949_v6  ;;  %v2032_v17 = vperm.slane %v2029_v16, 1 }
 0xc12   : > { %1969 = vrot.lane.b32.xlu2 %v1955_v52, %s3396_s3 }
 0xc13   : > { %1967 = vrot.lane.b32.xlu1 %v1954_v50, %s3396_s3 }
 0xc16   : > { %v1917_v55 = vpop.permute.xlu0 %1916 }
 0xc17   : > { %v1925_v5 = vsel %vm613_vm12, %v1915_v53, %v1917_v55  ;;  %1971 = vrot.lane.b32.xlu0 %v1956_v29, %s3396_s3 }
 0xc18   : > { %v1936_v33 = vadd.f32 %v1925_v5, %v1883_v24 }
 0xc1a   : > { %1975 = vrot.lane.b32.xlu2 %v1958_v27, %s3396_s3  ;;  %v2107_v27 = vld [vmem:[#allocation3 + $0x47] ss:$8 sm:$0x3] }
 0xc1b   : > { %1973 = vrot.lane.b32.xlu1 %v1957_v42, %s3396_s3 }
 0xc1e   : > { %v1923_v61 = vpop.permute.xlu0 %1922 }
 0xc1f   : > { %v1927_v44 = vsel %vm613_vm12, %v1921_v28, %v1923_v61  ;;  %2002 = vrot.lane.b32.xlu0 %v2000_v11, %s3385_s24  ;;  %v2109_v11 = vperm.slane %v2107_v27, 0  ;;  %v2110_v61 = vperm.slane %v2107_v27, 1 }
 0xc20   : > { %v1939_v10 = vadd.f32 %v1927_v44, %v1886_v4 }
 0xc22   : > { %2033 = vrot.lane.b32.xlu2 %v2031_v35, %s3384_s20 }
 0xc23   : > { %2004 = vrot.lane.b32.xlu1 %v2001_v21, %s3385_s24 }
 0xc27   : > { %2035 = vrot.lane.b32.xlu0 %v2032_v17, %s3384_s20 }
 0xc6c   : > { %v1970_v47 = vpop.permute.xlu2 %1969 }
 0xc74   : > { %v1976_v38 = vpop.permute.xlu2 %1975 }
 0xc7c   : > { %v2034_v45 = vpop.permute.xlu2 %2033 }
 0xc7d   : > { %v2041_v18 = vmul.f32 %v5463_v20, %v2034_v45 }
 0xc7f   : > { %v2047_v13 = vrot.slane %v2041_v18, 1 }
 0xc81   : > { %v1966_v37 = vpop.permute.xlu0 %1965  ;;  %2050 = vrot.lane.b32.xlu1 %v2047_v13, %s3387_s25 }
 0xc82   : > { %v1987_v1 = vadd.f32 %v1966_v37, %v1934_v63 }
 0xc85   : > { %v1968_v58 = vpop.permute.xlu1 %1967 }
 0xc86   : > { %v1977_v48 = vsel %vm668_vm13, %v1966_v37, %v1968_v58  ;;  %v1978_v57 = vsel %vm668_vm13, %v1968_v58, %v1970_v47 }
 0xc87   : > { %v1988_v24 = vadd.f32 %v1977_v48, %v1935_v8  ;;  %v4733_v23 = vadd.f32 %v1978_v57, %v1936_v33 }
 0xc89   : > { %v1972_v41 = vpop.permute.xlu0 %1971  ;;  %2072 = vrot.lane.b32.xlu1 %v2070_v2, %s3386_s15  ;;  %v2146_v2 = vld [vmem:[#allocation3 + $0x50] ss:$8 sm:$0x3] }
 0xc8a   : > { %v1990_v9 = vadd.f32 %v1972_v41, %v1937_v19  ;;  %v2148_v57 = vperm.slane %v2146_v2, 0 }
 0xc8d   : > { %v1974_v14 = vpop.permute.xlu1 %1973 }
 0xc8e   : > { %v1979_v60 = vsel %vm668_vm13, %v1972_v41, %v1974_v14  ;;  %v1980_v32 = vsel %vm668_vm13, %v1974_v14, %v1976_v38  ;;  %v2152_v41 = vmul.f32 %v2148_v57, %v4741_v49 }
 0xc8f   : > { %v1991_v40 = vadd.f32 %v1979_v60, %v1938_v54  ;;  %v4738_v4 = vadd.f32 %v1980_v32, %v1939_v10 }
 0xc91   : > { %v2003_v7 = vpop.permute.xlu0 %2002 }
 0xc92   : > { %v2010_v51 = vmul.f32 %v5463_v20, %v2003_v7 }
 0xc94   : > { %v2016_v22 = vrot.slane %v2010_v51, 1  ;;  %v2156_v51 = vrot.slane %v2152_v41, 1 }
 0xc95   : > { %v4743_v25 = vpop.permute.xlu1 %2004 }
 0xc96   : > { %v2022_v0 = vadd.f32 %v2016_v22, %v1987_v1  ;;  %v2025_v31 = vadd.f32 %v2016_v22, %v1990_v9  ;;  %v2006_v59 = vsel %vm248_vm9, %v2003_v7, %v4743_v25 }
 0xc97   : > { %v2011_v63 = vmul.f32 %v2006_v59, %v4741_v49 }
 0xc99   : > { %v2017_v53 = vrot.slane %v2011_v63, 1  ;;  %v2036_v34 = vpop.permute.xlu0 %2035 }
 0xc9a   : > { %v2037_v8 = vsel %vm274_vm1, %v2034_v45, %v2036_v34  ;;  %v2043_v19 = vmul.f32 %v4749_v3, %v2036_v34 }
 0xc9b   : > { %v2023_v28 = vadd.f32 %v2017_v53, %v1988_v24  ;;  %v2026_v30 = vadd.f32 %v2017_v53, %v1991_v40  ;;  %v2042_v54 = vmul.f32 %v2037_v8, %v4741_v49  ;;  %v2149_v40 = vperm.slane %v2146_v2, 1 }
 0xc9c   : > { %v2049_v43 = vrot.slane %v2043_v19, 1  ;;  %v2012_v19 = vmul.f32 %v4749_v3, %v4743_v25 }
 0xc9d   : > { %v2048_v26 = vrot.slane %v2042_v54, 1 }
 0xc9e   : > { %2054 = vrot.lane.b32.xlu0 %v2049_v43, %s3387_s25  ;;  %v2018_v43 = vrot.slane %v2012_v19, 1 }
 0xc9f   : > { %2052 = vrot.lane.b32.xlu2 %v2048_v26, %s3387_s25 }
 0xca0   : > { %v2024_v26 = vadd.f32 %v2018_v43, %v4733_v23 }
 0xca7   : > { %2074 = vrot.lane.b32.xlu2 %v2071_v56, %s3386_s15  ;;  %v2027_v56 = vadd.f32 %v2018_v43, %v4738_v4 }
 0xcf3   : > { %v2051_v12 = vpop.permute.xlu1 %2050 }
 0xcf9   : > { %v2053_v6 = vpop.permute.xlu2 %2052 }
 0xcfa   : > { %v2056_v52 = vsel %vm303_vm0, %v2051_v12, %v2053_v6 }
 0xcfb   : > { %v2061_v46 = vadd.f32 %v2056_v52, %v2022_v0  ;;  %v2064_v50 = vadd.f32 %v2056_v52, %v2025_v31  ;;  %v2073_v36 = vpop.permute.xlu1 %2072  ;;  %v2153_v0 = vmul.f32 %v4749_v3, %v2149_v40 }
 0xcfc   : > { %v2080_v29 = vmul.f32 %v5463_v20, %v2073_v36 }
 0xcfd   : > { %v2157_v59 = vrot.slane %v2153_v0, 1 }
 0xcfe   : > { %v2086_v55 = vrot.slane %v2080_v29, 1 }
 0xd00   : > { %2089 = vrot.lane.b32.xlu0 %v2086_v55, %s3391_s19 }
 0xd01   : > { %v2075_v5 = vpop.permute.xlu2 %2074 }
 0xd02   : > { %v2082_v33 = vmul.f32 %v4749_v3, %v2075_v5  ;;  %v2076_v62 = vsel %vm329_vm2, %v2073_v36, %v2075_v5 }
 0xd03   : > { %v2081_v15 = vmul.f32 %v2076_v62, %v4741_v49 }
 0xd04   : > { %v2088_v42 = vrot.slane %v2082_v33, 1 }
 0xd05   : > { %v2087_v16 = vrot.slane %v2081_v15, 1 }
 0xd06   : > { %2093 = vrot.lane.b32.xlu2 %v2088_v42, %s3391_s19 }
 0xd07   : > { %2091 = vrot.lane.b32.xlu1 %v2087_v16, %s3391_s19 }
 0xd08   : > { %2111 = vrot.lane.b32.xlu0 %v2109_v11, %s3387_s25 }
 0xd0f   : > { %2113 = vrot.lane.b32.xlu1 %v2110_v61, %s3387_s25 }
 0xd10   : > { %v2055_v35 = vpop.permute.xlu0 %2054 }
 0xd11   : > { %v2057_v44 = vsel %vm303_vm0, %v2053_v6, %v2055_v35  ;;  %v2063_v12 = vadd.f32 %v2055_v35, %v2024_v26  ;;  %v2066_v6 = vadd.f32 %v2055_v35, %v2027_v56  ;;  %v2290_v56 = vld [vmem:[#allocation3 + $0x54] ss:$8 sm:$0x3] }
 0xd12   : > { %v2062_v21 = vadd.f32 %v2057_v44, %v2023_v28  ;;  %v2065_v10 = vadd.f32 %v2057_v44, %v2026_v30  ;;  %v4784_v28 = vld [vmem:[#allocation2 + $0x10] sm:$0xff] }
 0xd60   : > { %v2094_v47 = vpop.permute.xlu2 %2093 }
 0xd61   : > { %v2102_v52 = vadd.f32 %v2094_v47, %v2063_v12  ;;  %v2292_v12 = vperm.slane %v2290_v56, 0 }
 0xd72   : > { %v2090_v17 = vpop.permute.xlu0 %2089 }
 0xd79   : > { %v2092_v38 = vpop.permute.xlu1 %2091 }
 0xd7a   : > { %v2095_v45 = vsel %vm358_vm8, %v2090_v17, %v2092_v38  ;;  %v2096_v18 = vsel %vm358_vm8, %v2092_v38, %v2094_v47  ;;  %v2112_v58 = vpop.permute.xlu0 %2111  ;;  %v2212_v38 = vld [vmem:[#allocation3 + $0x52] ss:$8 sm:$0x3] }
 0xd7b   : > { %v2100_v13 = vadd.f32 %v2095_v45, %v2061_v46  ;;  %v2101_v37 = vadd.f32 %v2096_v18, %v2062_v21  ;;  %v2103_v1 = vadd.f32 %v2095_v45, %v2064_v50  ;;  %v2104_v39 = vadd.f32 %v2096_v18, %v2065_v10 }
 0xd7c   : > { %v2119_v48 = vmul.f32 %v5463_v20, %v2112_v58  ;;  %v2173_v20 = vld [vmem:[#allocation3 + $0x51] ss:$8 sm:$0x3]  ;;  %v2105_v46 = vadd.f32 %v2094_v47, %v2066_v6  ;;  %v2214_v45 = vperm.slane %v2212_v38, 0  ;;  %v2215_v18 = vperm.slane %v2212_v38, 1 }
 0xd7d   : > { %v2175_v31 = vperm.slane %v2173_v20, 0  ;;  %v2176_v63 = vperm.slane %v2173_v20, 1 }
 0xd7e   : > { %v2125_v24 = vrot.slane %v2119_v48, 1 }
 0xd80   : > { %2128 = vrot.lane.b32.xlu2 %v2125_v24, %s3384_s20 }
 0xd81   : > { %v2114_v9 = vpop.permute.xlu1 %2113 }
 0xd82   : > { %v2115_v14 = vsel %vm303_vm0, %v2112_v58, %v2114_v9  ;;  %v2121_v60 = vmul.f32 %v4749_v3, %v2114_v9 }
 0xd83   : > { %v2120_v32 = vmul.f32 %v2115_v14, %v4741_v49 }
 0xd84   : > { %v2127_v7 = vrot.slane %v2121_v60, 1 }
 0xd85   : > { %v2126_v22 = vrot.slane %v2120_v32, 1 }
 0xd86   : > { %2132 = vrot.lane.b32.xlu1 %v2127_v7, %s3384_s20 }
 0xd87   : > { %2130 = vrot.lane.b32.xlu0 %v2126_v22, %s3384_s20 }
 0xd88   : > { %2158 = vrot.lane.b32.xlu2 %v2156_v51, %s3385_s24 }
 0xd8e   : > { %2177 = vrot.lane.b32.xlu1 %v2175_v31, %s3388_s8 }
 0xd8f   : > { %2160 = vrot.lane.b32.xlu0 %v2157_v59, %s3385_s24 }
 0xd90   : > { %2179 = vrot.lane.b32.xlu2 %v2176_v63, %s3388_s8  ;;  %v2251_v63 = vld [vmem:[#allocation3 + $0x53] ss:$8 sm:$0x3] }
 0xdda   : > { %v2129_v53 = vpop.permute.xlu2 %2128 }
 0xde2   : > { %v2159_v34 = vpop.permute.xlu2 %2158 }
 0xdea   : > { %v2180_v8 = vpop.permute.xlu2 %2179 }
 0xdeb   : > { %v2187_v30 = vmul.f32 %v4784_v28, %v2180_v8 }
 0xded   : > { %v2193_v54 = vrot.slane %v2187_v30, 1 }
 0xdef   : > { %2198 = vrot.lane.b32.xlu2 %v2193_v54, %s3392_s21 }
 0xdf8   : > { %v2133_v50 = vpop.permute.xlu1 %2132 }
 0xdf9   : > { %v2141_v36 = vadd.f32 %v2133_v50, %v2102_v52  ;;  %v2144_v29 = vadd.f32 %v2133_v50, %v2105_v46  ;;  %v2131_v25 = vpop.permute.xlu0 %2130 }
 0xdfa   : > { %v2134_v55 = vsel %vm274_vm1, %v2129_v53, %v2131_v25  ;;  %v2135_v5 = vsel %vm274_vm1, %v2131_v25, %v2133_v50  ;;  %v2253_v53 = vperm.slane %v2251_v63, 0 }
 0xdfb   : > { %v2139_v27 = vadd.f32 %v2134_v55, %v2100_v13  ;;  %v2140_v33 = vadd.f32 %v2135_v5, %v2101_v37  ;;  %v2142_v62 = vadd.f32 %v2134_v55, %v2103_v1  ;;  %v2143_v15 = vadd.f32 %v2135_v5, %v2104_v39 }
 0xdfd   : > { %v2166_v42 = vadd.f32 %v2159_v34, %v2139_v27  ;;  %v2169_v23 = vadd.f32 %v2159_v34, %v2142_v62 }
 0xe00   : > { %v2178_v11 = vpop.permute.xlu1 %2177 }
 0xe01   : > { %v2181_v4 = vsel %vm474_vm3, %v2178_v11, %v2180_v8  ;;  %v2185_v16 = vmul.f32 %v2178_v11, %v4741_v49  ;;  %v2161_v61 = vpop.permute.xlu0 %2160 }
 0xe02   : > { %v2186_v35 = vmul.f32 %v4749_v3, %v2181_v4  ;;  %v2162_v44 = vsel %vm248_vm9, %v2159_v34, %v2161_v61  ;;  %v2168_v1 = vadd.f32 %v2161_v61, %v2141_v36  ;;  %v2171_v39 = vadd.f32 %v2161_v61, %v2144_v29 }
 0xe03   : > { %v2191_v21 = vrot.slane %v2185_v16, 1  ;;  %v2167_v10 = vadd.f32 %v2162_v44, %v2140_v33  ;;  %v2170_v17 = vadd.f32 %v2162_v44, %v2143_v15  ;;  %v2254_v34 = vperm.slane %v2251_v63, 1  ;;  %v2507_v63 = vld [vmem:[#allocation3 + $0x60] ss:$8 sm:$0x3] }
 0xe04   : > { %v2192_v47 = vrot.slane %v2186_v35, 1 }
 0xe05   : > { %2194 = vrot.lane.b32.xlu0 %v2191_v21, %s3392_s21 }
 0xe06   : > { %2196 = vrot.lane.b32.xlu1 %v2192_v47, %s3392_s21 }
 0xe0d   : > { %2216 = vrot.lane.b32.xlu0 %v2214_v45, %s3389_s17 }
 0xe0e   : > { %2218 = vrot.lane.b32.xlu1 %v2215_v18, %s3389_s17 }
 0xe49   : > { %v2199_v13 = vpop.permute.xlu2 %2198 }
 0xe77   : > { %v2195_v37 = vpop.permute.xlu0 %2194 }
 0xe78   : > { %v2205_v58 = vadd.f32 %v2195_v37, %v2166_v42  ;;  %v2208_v2 = vadd.f32 %v2195_v37, %v2169_v23  ;;  %v2197_v48 = vpop.permute.xlu1 %2196  ;;  %v2293_v23 = vperm.slane %v2290_v56, 1 }
 0xe79   : > { %v2200_v57 = vsel %vm503_vm10, %v2195_v37, %v2197_v48  ;;  %v2201_v24 = vsel %vm503_vm10, %v2197_v48, %v2199_v13 }
 0xe7a   : > { %v2206_v41 = vadd.f32 %v2200_v57, %v2167_v10  ;;  %v2207_v9 = vadd.f32 %v2201_v24, %v2168_v1  ;;  %v2209_v14 = vadd.f32 %v2200_v57, %v2170_v17  ;;  %v2210_v60 = vadd.f32 %v2201_v24, %v2171_v39  ;;  %v2337_v1 = vld [vmem:[#allocation3 + $0x55] ss:$8 sm:$0x3] }
 0xe7b   : > { %v2340_v48 = vperm.slane %v2337_v1, 1 }
 0xe7f   : > { %v2217_v32 = vpop.permute.xlu0 %2216 }
 0xe80   : > { %v2224_v40 = vmul.f32 %v2217_v32, %v4741_v49  ;;  %v2219_v7 = vpop.permute.xlu1 %2218 }
 0xe81   : > { %v2220_v51 = vsel %vm529_vm4, %v2217_v32, %v2219_v7  ;;  %v2226_v22 = vmul.f32 %v4784_v28, %v2219_v7 }
 0xe82   : > { %v2230_v20 = vrot.slane %v2224_v40, 1  ;;  %v2225_v0 = vmul.f32 %v4749_v3, %v2220_v51 }
 0xe83   : > { %v2232_v31 = vrot.slane %v2226_v22, 1 }
 0xe84   : > { %v2231_v59 = vrot.slane %v2225_v0, 1  ;;  %2233 = vrot.lane.b32.xlu2 %v2230_v20, %s3393_s22 }
 0xe85   : > { %2237 = vrot.lane.b32.xlu1 %v2232_v31, %s3393_s22 }
 0xe86   : > { %2235 = vrot.lane.b32.xlu0 %v2231_v59, %s3393_s22 }
 0xe8c   : > { %2255 = vrot.lane.b32.xlu2 %v2253_v53, %s3390_s18 }
 0xe8e   : > { %2257 = vrot.lane.b32.xlu0 %v2254_v34, %s3390_s18  ;;  %v2509_v34 = vperm.slane %v2507_v63, 0 }
 0xede   : > { %v2234_v8 = vpop.permute.xlu2 %2233 }
 0xedf   : > { %v2244_v19 = vadd.f32 %v2234_v8, %v2205_v58  ;;  %v2247_v30 = vadd.f32 %v2234_v8, %v2208_v2  ;;  %v2339_v58 = vperm.slane %v2337_v1, 0  ;;  %v2383_v2 = vld [vmem:[#allocation3 + $0x56] ss:$8 sm:$0x3] }
 0xee0   : > { %v2736_v1 = vld [vmem:[#allocation3 + $0x64] ss:$8 sm:$0x3] }
 0xee6   : > { %v2256_v54 = vpop.permute.xlu2 %2255 }
 0xee7   : > { %v2263_v43 = vmul.f32 %v2256_v54, %v4741_v49 }
 0xee9   : > { %v2269_v26 = vrot.slane %v2263_v43, 1 }
 0xeeb   : > { %2272 = vrot.lane.b32.xlu1 %v2269_v26, %s3394_s26 }
 0xef3   : > { %2294 = vrot.lane.b32.xlu1 %v2292_v12, %s3395_s27 }
 0xef7   : > { %v2238_v6 = vpop.permute.xlu1 %2237 }
 0xef8   : > { %v2236_v52 = vpop.permute.xlu0 %2235 }
 0xef9   : > { %v2239_v46 = vsel %vm558_vm11, %v2234_v8, %v2236_v52  ;;  %v2240_v50 = vsel %vm558_vm11, %v2236_v52, %v2238_v6 }
 0xefa   : > { %v2245_v36 = vadd.f32 %v2239_v46, %v2206_v41  ;;  %v2246_v29 = vadd.f32 %v2240_v50, %v2207_v9  ;;  %v2248_v25 = vadd.f32 %v2239_v46, %v2209_v14  ;;  %v2249_v55 = vadd.f32 %v2240_v50, %v2210_v60  ;;  %v4835_v14 = vld [vmem:[#allocation2 + $0xa8] sm:$0xfe]  ;;  %v4837_v60 = vld [vmem:[#allocation2 + $0x80] sm:$0x1] }
 0xefb   : > { %v4853_v50 = vld [vmem:[#allocation2 + $0x68] sm:$0xfe] }
 0xf00   : > { %v2258_v5 = vpop.permute.xlu0 %2257 }
 0xf01   : > { %v2259_v27 = vsel %vm584_vm5, %v2256_v54, %v2258_v5  ;;  %v2265_v33 = vmul.f32 %v4784_v28, %v2258_v5 }
 0xf02   : > { %v2264_v62 = vmul.f32 %v4749_v3, %v2259_v27 }
 0xf03   : > { %v2271_v15 = vrot.slane %v2265_v33, 1 }
 0xf04   : > { %v2270_v42 = vrot.slane %v2264_v62, 1 }
 0xf05   : > { %2276 = vrot.lane.b32.xlu0 %v2271_v15, %s3394_s26  ;;  %v4866_v15 = vld [vmem:[#allocation2 + $0x30] sm:$0xfe] }
 0xf06   : > { %2274 = vrot.lane.b32.xlu2 %v2270_v42, %s3394_s26 }
 0xf0e   : > { %2296 = vrot.lane.b32.xlu2 %v2293_v23, %s3395_s27 }
 0xf5d   : > { %v2273_v11 = vpop.permute.xlu1 %2272 }
 0xf5e   : > { %v2283_v4 = vadd.f32 %v2273_v11, %v2244_v19  ;;  %v2286_v16 = vadd.f32 %v2273_v11, %v2247_v30 }
 0xf60   : > { %v2275_v61 = vpop.permute.xlu2 %2274 }
 0xf61   : > { %v2278_v35 = vsel %vm613_vm12, %v2273_v11, %v2275_v61 }
 0xf62   : > { %v2284_v44 = vadd.f32 %v2278_v35, %v2245_v36  ;;  %v2287_v21 = vadd.f32 %v2278_v35, %v2248_v25  ;;  %v4855_v36 = vld [vmem:[#allocation2 + $0xb8] sm:$0x1] }
 0xf65   : > { %v2295_v10 = vpop.permute.xlu1 %2294 }
 0xf66   : > { %v2302_v17 = vmul.f32 %v2295_v10, %v4741_v49  ;;  %v2385_v49 = vperm.slane %v2383_v2, 0 }
 0xf68   : > { %v2308_v47 = vrot.slane %v2302_v17, 1  ;;  %v2297_v38 = vpop.permute.xlu2 %2296 }
 0xf69   : > { %v2298_v45 = vsel %vm639_vm6, %v2295_v10, %v2297_v38  ;;  %v2304_v18 = vmul.f32 %v4784_v28, %v2297_v38 }
 0xf6a   : > { %v2303_v13 = vmul.f32 %v4749_v3, %v2298_v45  ;;  %2311 = vrot.lane.b32.xlu0 %v2308_v47, %s3396_s3  ;;  %v2386_v3 = vperm.slane %v2383_v2, 1  ;;  %v2445_v47 = vld [vmem:[#allocation3 + $0x57] ss:$8 sm:$0x3] }
 0xf6b   : > { %v2310_v37 = vrot.slane %v2304_v18, 1  ;;  %v2448_v38 = vperm.slane %v2445_v47, 1  ;;  %v2447_v45 = vperm.slane %v2445_v47, 0  ;;  %v2612_v18 = vld [vmem:[#allocation3 + $0x62] ss:$8 sm:$0x3] }
 0xf6c   : > { %v2309_v39 = vrot.slane %v2303_v13, 1  ;;  %v2615_v13 = vperm.slane %v2612_v18, 1  ;;  %v2674_v2 = vld [vmem:[#allocation3 + $0x63] ss:$8 sm:$0x3] }
 0xf6d   : > { %2315 = vrot.lane.b32.xlu2 %v2310_v37, %s3396_s3  ;;  %v2614_v37 = vperm.slane %v2612_v18, 0 }
 0xf6e   : > { %2313 = vrot.lane.b32.xlu1 %v2309_v39, %s3396_s3  ;;  %v2510_v39 = vperm.slane %v2507_v63, 1 }
 0xf72   : > { %2341 = vrot.lane.b32.xlu0 %v2339_v58, %s3385_s24  ;;  %v2738_v58 = vperm.slane %v2736_v1, 0 }
 0xf75   : > { %2387 = vrot.lane.b32.xlu2 %v2385_v49, %s3384_s20  ;;  %v2677_v49 = vperm.slane %v2674_v2, 1 }
 0xf76   : > { %2343 = vrot.lane.b32.xlu1 %v2340_v48, %s3385_s24  ;;  %v2798_v48 = vld [vmem:[#allocation3 + $0x65] ss:$8 sm:$0x3] }
 0xf77   : > { %v2277_v28 = vpop.permute.xlu0 %2276 }
 0xf78   : > { %v2279_v57 = vsel %vm613_vm12, %v2275_v61, %v2277_v28  ;;  %v2801_v28 = vperm.slane %v2798_v48, 1 }
 0xf79   : > { %v2285_v24 = vadd.f32 %v2279_v57, %v2246_v29  ;;  %v2288_v41 = vadd.f32 %v2279_v57, %v2249_v55  ;;  %v2800_v57 = vperm.slane %v2798_v48, 0 }
 0xf7a   : > { %2389 = vrot.lane.b32.xlu0 %v2386_v3, %s3384_s20  ;;  %v2676_v3 = vperm.slane %v2674_v2, 0 }
 0xfc7   : > { %v2316_v9 = vpop.permute.xlu2 %2315 }
 0xfcf   : > { %v2388_v32 = vpop.permute.xlu2 %2387 }
 0xfd0   : > { %v2395_v40 = vmul.f32 %v2388_v32, %v4835_v14  ;;  %v2398_v7 = vmul.f32 %v2388_v32, %v4837_v60 }
 0xfd2   : > { %v2407_v51 = vrot.slane %v2395_v40, 2  ;;  %v2410_v22 = vrot.slane %v2398_v7, 2 }
 0xfd4   : > { %2416 = vrot.lane.b32.xlu1 %v2407_v51, %s3387_s25  ;;  %v2411_v20 = vsel %vm1053_vm7, %v2407_v51, %v2410_v22 }
 0xfdc   : > { %v2312_v0 = vpop.permute.xlu0 %2311  ;;  %2422 = vrot.lane.b32.xlu1 %v2411_v20, %s3387_s25 }
 0xfdd   : > { %v2322_v31 = vadd.f32 %v2312_v0, %v2283_v4  ;;  %v2325_v59 = vadd.f32 %v2312_v0, %v2286_v16 }
 0xfe0   : > { %v2314_v53 = vpop.permute.xlu1 %2313 }
 0xfe1   : > { %v2317_v8 = vsel %vm668_vm13, %v2312_v0, %v2314_v53  ;;  %v2318_v19 = vsel %vm668_vm13, %v2314_v53, %v2316_v9 }
 0xfe2   : > { %v2323_v30 = vadd.f32 %v2317_v8, %v2284_v44  ;;  %v4846_v54 = vadd.f32 %v2318_v19, %v2285_v24  ;;  %v2326_v43 = vadd.f32 %v2317_v8, %v2287_v21  ;;  %v4848_v26 = vadd.f32 %v2318_v19, %v2288_v41  ;;  %v4887_v41 = vld [vmem:[#allocation2 + $0x20] sm:$0x1] }
 0xfe3   : > { %v2739_v24 = vperm.slane %v2736_v1, 1 }
 0xfe4   : > { %v2342_v56 = vpop.permute.xlu0 %2341  ;;  %2511 = vrot.lane.b32.xlu1 %v2509_v34, %s3387_s25 }
 0xfe5   : > { %v2349_v12 = vmul.f32 %v2342_v56, %v4835_v14  ;;  %v2352_v6 = vmul.f32 %v2342_v56, %v4837_v60 }
 0xfe7   : > { %v2361_v52 = vrot.slane %v2349_v12, 2  ;;  %v2364_v46 = vrot.slane %v2352_v6, 2 }
 0xfe8   : > { %v4857_v29 = vpop.permute.xlu1 %2343 }
 0xfe9   : > { %v2345_v25 = vsel %vm248_vm9, %v2342_v56, %v4857_v29  ;;  %v2376_v27 = vadd.f32 %v2361_v52, %v2322_v31  ;;  %v2365_v33 = vsel %vm1053_vm7, %v2361_v52, %v2364_v46 }
 0xfea   : > { %v2350_v55 = vmul.f32 %v2345_v25, %v4853_v50  ;;  %v2353_v5 = vmul.f32 %v2345_v25, %v4855_v36  ;;  %v4864_v62 = vadd.f32 %v2365_v33, %v2325_v59 }
 0xfec   : > { %v2362_v42 = vrot.slane %v2350_v55, 2  ;;  %v2366_v23 = vrot.slane %v2353_v5, 2  ;;  %v2390_v11 = vpop.permute.xlu0 %2389  ;;  %2618 = vrot.lane.b32.xlu1 %v2615_v13, %s3388_s8 }
 0xfed   : > { %v2391_v4 = vsel %vm274_vm1, %v2388_v32, %v2390_v11  ;;  %v2397_v16 = vmul.f32 %v2390_v11, %v4866_v15  ;;  %v2400_v9 = vmul.f32 %v2390_v11, %v4887_v41 }
 0xfee   : > { %v2396_v61 = vmul.f32 %v2391_v4, %v4853_v50  ;;  %v4871_v35 = vadd.f32 %v2362_v42, %v2323_v30  ;;  %v2367_v44 = vsel %vm1053_vm7, %v2362_v42, %v2366_v23  ;;  %v2399_v32 = vmul.f32 %v2391_v4, %v4855_v36  ;;  %v2569_v4 = vld [vmem:[#allocation3 + $0x61] ss:$8 sm:$0x3] }
 0xfef   : > { %v2409_v21 = vrot.slane %v2397_v16, 2  ;;  %v4874_v10 = vadd.f32 %v2367_v44, %v2326_v43  ;;  %v2414_v40 = vrot.slane %v2400_v9, 2  ;;  %v4905_v30 = vmul.f32 %v4857_v29, %v4866_v15 }
 0xff0   : > { %v2408_v17 = vrot.slane %v2396_v61, 2  ;;  %v2412_v7 = vrot.slane %v2399_v32, 2  ;;  %v2572_v13 = vperm.slane %v2569_v4, 1 }
 0xff1   : > { %2420 = vrot.lane.b32.xlu0 %v2409_v21, %s3387_s25  ;;  %v2415_v51 = vsel %vm1053_vm7, %v2409_v21, %v2414_v40  ;;  %v2363_v12 = vrot.slane %v4905_v30, 2 }
 0xff2   : > { %2418 = vrot.lane.b32.xlu2 %v2408_v17, %s3387_s25  ;;  %v2413_v22 = vsel %vm1053_vm7, %v2408_v17, %v2412_v7  ;;  %v2571_v17 = vperm.slane %v2569_v4, 0  ;;  %v2576_v48 = vmul.f32 %v2572_v13, %v4866_v15 }
 0xff3   : > { %v2378_v25 = vadd.f32 %v2363_v12, %v4846_v54 }
 0xff4   : > { %2740 = vrot.lane.b32.xlu1 %v2738_v58, %s3390_s18  ;;  %v2575_v18 = vmul.f32 %v2571_v17, %v4853_v50 }
 0xff6   : > { %v2583_v2 = vrot.slane %v2575_v18, 2 }
 0xff9   : > { %2451 = vrot.lane.b32.xlu0 %v2448_v38, %s3386_s15 }
 0xffa   : > { %2449 = vrot.lane.b32.xlu2 %v2447_v45, %s3386_s15  ;;  %s3017_s15 = sshll.u32 %s3013_s14, 4  ;;  %s3018_s15 = int_to_ptr.hbm [resolvable:$true] %s3017_s15 }
 0xffc   : > { %2804 = vrot.lane.b32.xlu1 %v2801_v28, %s3395_s27 }
0x1001   : > { %2616 = vrot.lane.b32.xlu0 %v2614_v37, %s3388_s8 }
0x1002   : > { %2513 = vrot.lane.b32.xlu2 %v2510_v39, %s3387_s25 }
0x1009   : > { %2680 = vrot.lane.b32.xlu0 %v2677_v49, %s3389_s17 }
0x100a   : > { %2678 = vrot.lane.b32.xlu2 %v2676_v3, %s3389_s17  ;;  %v2578_v3 = vmul.f32 %v2572_v13, %v4887_v41 }
0x100c   : > { %v2587_v32 = vrot.slane %v2578_v3, 2 }
0x1011   : > { %2802 = vrot.lane.b32.xlu0 %v2800_v57, %s3395_s27 }
0x1012   : > { %2742 = vrot.lane.b32.xlu2 %v2739_v24, %s3390_s18 }
0x1019   : > { %2426 = vrot.lane.b32.xlu0 %v2415_v51, %s3387_s25  ;;  %v4953_v51 = vld [vmem:[#allocation2 + $0x58] sm:$0xfe] }
0x101a   : > { %2424 = vrot.lane.b32.xlu2 %v2413_v22, %s3387_s25  ;;  %s3322_s25 = sshra.s32 %s3018_s15, 4  ;;  %s3323_s25 = int_to_ptr.hbm [resolvable:$true] %s3322_s25 }
0x101b   : > { %s3324_s8 = scalar_lea.hbm %s3323_s25, 16  ;;  %p3329_p11 = scmp.lt.s32.totalorder %s3323_s25, %s5192_s2 }
0x101c   : > { %p3325_p1 = scmp.ne.s32.totalorder %s3323_s25, %s3324_s8 }
0x101e   : > { %p3326_p4 = pnand %p3325_p1, %p3481_p3 }
0x1020   : > { %p3327_p8 = pneg %p3326_p4 }
0x1046   : > { %v2417_v20 = vpop.permute.xlu1 %2416 }
0x104c   : > { %v2419_v0 = vpop.permute.xlu2 %2418 }
0x104d   : > { %v2428_v31 = vsel %vm303_vm0, %v2417_v20, %v2419_v0 }
0x104e   : > { %v4898_v59 = vadd.f32 %v2428_v31, %v2376_v27  ;;  %v2423_v53 = vpop.permute.xlu1 %2422 }
0x1054   : > { %v2450_v63 = vpop.permute.xlu2 %2449 }
0x1055   : > { %v2457_v34 = vmul.f32 %v2450_v63, %v4835_v14  ;;  %v2460_v8 = vmul.f32 %v2450_v63, %v4837_v60 }
0x1056   : > { %v2512_v52 = vpop.permute.xlu1 %2511 }
0x1057   : > { %v2469_v19 = vrot.slane %v2457_v34, 2  ;;  %v2472_v43 = vrot.slane %v2460_v8, 2  ;;  %v2519_v46 = vmul.f32 %v2512_v52, %v4835_v14  ;;  %v2522_v11 = vmul.f32 %v2512_v52, %v4837_v60  ;;  %v4962_v8 = vld [vmem:[#allocation2 + $0x8] sm:$0x1] }
0x1059   : > { %2478 = vrot.lane.b32.xlu1 %v2469_v19, %s3391_s19  ;;  %v2473_v6 = vsel %vm1053_vm7, %v2469_v19, %v2472_v43  ;;  %v2531_v23 = vrot.slane %v2519_v46, 2  ;;  %v2534_v14 = vrot.slane %v2522_v11, 2 }
0x105c   : > { %v2514_v56 = vpop.permute.xlu2 %2513 }
0x105d   : > { %v2521_v57 = vmul.f32 %v2514_v56, %v4866_v15  ;;  %v2515_v24 = vsel %vm303_vm0, %v2512_v52, %v2514_v56 }
0x105e   : > { %v2520_v40 = vmul.f32 %v2515_v24, %v4853_v50  ;;  %v2619_v20 = vpop.permute.xlu1 %2618 }
0x105f   : > { %v2533_v7 = vrot.slane %v2521_v57, 2 }
0x1060   : > { %v2532_v31 = vrot.slane %v2520_v40, 2 }
0x1061   : > { %2484 = vrot.lane.b32.xlu1 %v2473_v6, %s3391_s19  ;;  %v2577_v6 = vmul.f32 %v2571_v17, %v4855_v36 }
0x1063   : > { %v2421_v55 = vpop.permute.xlu0 %2420 }
0x1064   : > { %v2429_v5 = vsel %vm303_vm0, %v2419_v0, %v2421_v55  ;;  %v4915_v27 = vadd.f32 %v2421_v55, %v2378_v25  ;;  %v4917_v33 = vpop.permute.xlu2 %2678  ;;  %v2524_v0 = vmul.f32 %v2514_v56, %v4887_v41  ;;  %v2629_v56 = vmul.f32 %v2619_v20, %v4962_v8 }
0x1065   : > { %v4920_v42 = vadd.f32 %v2429_v5, %v4871_v35  ;;  %v2535_v35 = vsel %vm1053_vm7, %v2531_v23, %v2534_v14  ;;  %v2585_v55 = vrot.slane %v2577_v6, 2 }
0x1066   : > { %v2538_v34 = vrot.slane %v2524_v0, 2  ;;  %v2643_v5 = vrot.slane %v2629_v56, 2 }
0x1067   : > { %v2586_v11 = vsel %vm1053_vm7, %v2583_v2, %v2585_v55 }
0x1068   : > { %v2539_v46 = vsel %vm1053_vm7, %v2533_v7, %v2538_v34 }
0x1069   : > { %2540 = vrot.lane.b32.xlu1 %v2531_v23, %s3384_s20 }
0x106b   : > { %v2452_v16 = vpop.permute.xlu0 %2451 }
0x106c   : > { %v2453_v54 = vsel %vm329_vm2, %v2450_v63, %v2452_v16  ;;  %v2459_v61 = vmul.f32 %v2452_v16, %v4866_v15  ;;  %v4926_v44 = vpop.permute.xlu2 %2742  ;;  %v2462_v38 = vmul.f32 %v2452_v16, %v4887_v41  ;;  %v2523_v63 = vmul.f32 %v2515_v24, %v4855_v36  ;;  %v2741_v24 = vpop.permute.xlu1 %2740 }
0x106d   : > { %v2458_v21 = vmul.f32 %v2453_v54, %v4853_v50  ;;  %v2461_v45 = vmul.f32 %v2453_v54, %v4855_v36  ;;  %v2750_v3 = vmul.f32 %v4926_v44, %v4953_v51  ;;  %v2748_v6 = vmul.f32 %v2741_v24, %v4853_v50 }
0x106e   : > { %v2471_v47 = vrot.slane %v2459_v61, 2  ;;  %v2476_v37 = vrot.slane %v2462_v38, 2  ;;  %v2536_v19 = vrot.slane %v2523_v63, 2  ;;  %v2751_v55 = vmul.f32 %v2741_v24, %v4855_v36 }
0x106f   : > { %v2470_v60 = vrot.slane %v2458_v21, 2  ;;  %v2474_v1 = vrot.slane %v2461_v45, 2 }
0x1070   : > { %2482 = vrot.lane.b32.xlu0 %v2471_v47, %s3391_s19  ;;  %v2477_v28 = vsel %vm1053_vm7, %v2471_v47, %v2476_v37  ;;  %v2537_v25 = vsel %vm1053_vm7, %v2532_v31, %v2536_v19 }
0x1071   : > { %2480 = vrot.lane.b32.xlu2 %v2470_v60, %s3391_s19  ;;  %2546 = vrot.lane.b32.xlu1 %v2535_v35, %s3384_s20  ;;  %v2475_v9 = vsel %vm1053_vm7, %v2470_v60, %v2474_v1 }
0x1073   : > { %v2617_v52 = vpop.permute.xlu0 %2616 }
0x1074   : > { %v4936_v39 = vpop.permute.xlu2 %2424  ;;  %v2620_v23 = vsel %vm474_vm3, %v2617_v52, %v2619_v20  ;;  %v2624_v61 = vmul.f32 %v2617_v52, %v4853_v50  ;;  %v2627_v60 = vmul.f32 %v2617_v52, %v4855_v36 }
0x1075   : > { %v2430_v58 = vsel %vm303_vm0, %v2423_v53, %v4936_v39  ;;  %v2626_v53 = vmul.f32 %v2619_v20, %v4953_v51  ;;  %v2625_v16 = vmul.f32 %v2620_v23, %v4866_v15  ;;  %v2628_v38 = vmul.f32 %v2620_v23, %v4887_v41 }
0x1076   : > { %v4941_v49 = vadd.f32 %v2430_v58, %v4864_v62  ;;  %v2584_v62 = vrot.slane %v2576_v48, 2  ;;  %v2636_v35 = vrot.slane %v2624_v61, 2  ;;  %v2639_v13 = vrot.slane %v2627_v60, 2 }
0x1077   : > { %v2638_v43 = vrot.slane %v2626_v53, 2  ;;  %v2637_v21 = vrot.slane %v2625_v16, 2  ;;  %v2641_v18 = vrot.slane %v2628_v38, 2  ;;  %v2805_v53 = vpop.permute.xlu1 %2804 }
0x1078   : > { %2488 = vrot.lane.b32.xlu0 %v2477_v28, %s3391_s19  ;;  %v2588_v22 = vsel %vm1053_vm7, %v2584_v62, %v2587_v32  ;;  %v2640_v48 = vsel %vm1053_vm7, %v2636_v35, %v2639_v13  ;;  %v2686_v28 = vmul.f32 %v4917_v33, %v4853_v50  ;;  %v2815_v56 = vmul.f32 %v2805_v53, %v4962_v8 }
0x1079   : > { %2486 = vrot.lane.b32.xlu2 %v2475_v9, %s3391_s19  ;;  %2589 = vrot.lane.b32.xlu1 %v2583_v2, %s3385_s24  ;;  %v2644_v14 = vsel %vm1053_vm7, %v2638_v43, %v2643_v5  ;;  %v2642_v58 = vsel %vm1053_vm7, %v2637_v21, %v2641_v18  ;;  %v2762_v9 = vrot.slane %v2750_v3, 2  ;;  %s3328_s19 = scalar_lea.hbm %s5192_s2, 32 }
0x107a   : > { %v2698_v32 = vrot.slane %v2686_v28, 2  ;;  %v2829_v5 = vrot.slane %v2815_v56, 2  ;;  %p3330_p9 = scmp.lt.s32.totalorder %s3328_s19, %s3324_s8 }
0x107b   : > { %v2681_v4 = vpop.permute.xlu0 %2680 }
0x107c   : > { %v2688_v54 = vmul.f32 %v2681_v4, %v4953_v51  ;;  %v2691_v47 = vmul.f32 %v2681_v4, %v4962_v8  ;;  %v2682_v37 = vsel %vm529_vm4, %v4917_v33, %v2681_v4  ;;  %p3331_p2 = por %p3330_p9, %p3329_p11 }
0x107d   : > { %v2687_v2 = vmul.f32 %v2682_v37, %v4866_v15  ;;  %v2690_v40 = vmul.f32 %v2682_v37, %v4887_v41 }
0x107e   : > { %v2700_v17 = vrot.slane %v2688_v54, 2  ;;  %v2705_v45 = vrot.slane %v2691_v47, 2  ;;  %p3332_p10 = pnand %p3331_p2, %p3327_p8 }
0x107f   : > { %v2699_v57 = vrot.slane %v2687_v2, 2  ;;  %v2703_v20 = vrot.slane %v2690_v40, 2 }
0x1080   : > { %2544 = vrot.lane.b32.xlu0 %v2533_v7, %s3384_s20  ;;  %v2706_v1 = vsel %vm1053_vm7, %v2700_v17, %v2705_v45  ;;  %v2689_v7 = vmul.f32 %v4917_v33, %v4855_v36 }
0x1081   : > { %2542 = vrot.lane.b32.xlu2 %v2532_v31, %s3384_s20  ;;  %2595 = vrot.lane.b32.xlu1 %v2588_v22, %s3385_s24  ;;  %v2744_v31 = vsel %vm584_vm5, %v2741_v24, %v4926_v44  ;;  %v2704_v34 = vsel %vm1053_vm7, %v2699_v57, %v2703_v20 }
0x1082   : > { %v2701_v0 = vrot.slane %v2689_v7, 2  ;;  %v2749_v19 = vmul.f32 %v2744_v31, %v4866_v15 }
0x1084   : > { %v2702_v33 = vsel %vm1053_vm7, %v2698_v32, %v2701_v0 }
0x1088   : > { %2550 = vrot.lane.b32.xlu0 %v2539_v46, %s3384_s20  ;;  %v2752_v46 = vmul.f32 %v2744_v31, %v4887_v41 }
0x1089   : > { %2548 = vrot.lane.b32.xlu2 %v2537_v25, %s3384_s20  ;;  %2649 = vrot.lane.b32.xlu1 %v2638_v43, %s3392_s21  ;;  %v2812_v43 = vmul.f32 %v2805_v53, %v4953_v51  ;;  %v2760_v25 = vrot.slane %v2748_v6, 2  ;;  %v2803_v51 = vpop.permute.xlu0 %2802  ;;  %s180_s20 = scalar_lea.vmem [#allocation8], %s3110_s4 }
0x108a   : > { %v2765_v23 = vrot.slane %v2752_v46, 2  ;;  %v2810_v61 = vmul.f32 %v2803_v51, %v4853_v50 }
0x108b   : > { %v2824_v52 = vrot.slane %v2812_v43, 2 }
0x108d   : > { %v2830_v4 = vsel %vm1053_vm7, %v2824_v52, %v2829_v5 }
0x1090   : > { %2593 = vrot.lane.b32.xlu0 %v2586_v11, %s3385_s24  ;;  %v2763_v11 = vrot.slane %v2751_v55, 2 }
0x1091   : > { %2591 = vrot.lane.b32.xlu2 %v2584_v62, %s3385_s24  ;;  %2655 = vrot.lane.b32.xlu1 %v2644_v14, %s3392_s21  ;;  %v2753_v62 = vmul.f32 %v4926_v44, %v4962_v8  ;;  %v2761_v44 = vrot.slane %v2749_v19, 2  ;;  %v2806_v14 = vsel %vm639_vm6, %v2803_v51, %v2805_v53  ;;  %s3015_s24 = sshll.u32 %s180_s20, 4  ;;  %s3016_s24 = int_to_ptr.vmem [resolvable:$true] %s3015_s24 }
0x1092   : > { %v2811_v16 = vmul.f32 %v2806_v14, %v4866_v15  ;;  %v2764_v54 = vsel %vm1053_vm7, %v2760_v25, %v2763_v11  ;;  %v2814_v47 = vmul.f32 %v2806_v14, %v4887_v41 }
0x1093   : > { %v2767_v22 = vrot.slane %v2753_v62, 2  ;;  %v2766_v8 = vsel %vm1053_vm7, %v2761_v44, %v2765_v23 }
0x1094   : > { %v2827_v15 = vrot.slane %v2814_v47, 2 }
0x1095   : > { %v2768_v63 = vsel %vm1053_vm7, %v2762_v9, %v2767_v22 }
0x1098   : > { %2647 = vrot.lane.b32.xlu0 %v2637_v21, %s3392_s21  ;;  %v2823_v21 = vrot.slane %v2811_v16, 2 }
0x1099   : > { %2645 = vrot.lane.b32.xlu2 %v2636_v35, %s3392_s21  ;;  %2711 = vrot.lane.b32.xlu1 %v2700_v17, %s3393_s22  ;;  %v2822_v17 = vrot.slane %v2810_v61, 2  ;;  %v2813_v35 = vmul.f32 %v2803_v51, %v4855_v36 }
0x109a   : > { %v2828_v50 = vsel %vm1053_vm7, %v2823_v21, %v2827_v15 }
0x109b   : > { %v2825_v45 = vrot.slane %v2813_v35, 2 }
0x109d   : > { %v2826_v37 = vsel %vm1053_vm7, %v2822_v17, %v2825_v45 }
0x10a0   : > { %2653 = vrot.lane.b32.xlu0 %v2642_v58, %s3392_s21 }
0x10a1   : > { %2651 = vrot.lane.b32.xlu2 %v2640_v48, %s3392_s21  ;;  %2717 = vrot.lane.b32.xlu1 %v2706_v1, %s3393_s22  ;;  %v2427_v48 = vpop.permute.xlu0 %2426 }
0x10a8   : > { %2709 = vrot.lane.b32.xlu0 %v2699_v57, %s3393_s22 }
0x10a9   : > { %2707 = vrot.lane.b32.xlu2 %v2698_v32, %s3393_s22  ;;  %2773 = vrot.lane.b32.xlu1 %v2762_v9, %s3394_s26 }
0x10b0   : > { %2715 = vrot.lane.b32.xlu0 %v2704_v34, %s3393_s22 }
0x10b1   : > { %2713 = vrot.lane.b32.xlu2 %v2702_v33, %s3393_s22  ;;  %2779 = vrot.lane.b32.xlu1 %v2768_v63, %s3394_s26 }
0x10b8   : > { %2771 = vrot.lane.b32.xlu0 %v2761_v44, %s3394_s26 }
0x10b9   : > { %2769 = vrot.lane.b32.xlu2 %v2760_v25, %s3394_s26  ;;  %2835 = vrot.lane.b32.xlu1 %v2824_v52, %s3396_s3 }
0x10c0   : > { %2777 = vrot.lane.b32.xlu0 %v2766_v8, %s3394_s26 }
0x10c1   : > { %2775 = vrot.lane.b32.xlu2 %v2764_v54, %s3394_s26  ;;  %2841 = vrot.lane.b32.xlu1 %v2830_v4, %s3396_s3 }
0x10c8   : > { %2833 = vrot.lane.b32.xlu0 %v2823_v21, %s3396_s3 }
0x10c9   : > { %2831 = vrot.lane.b32.xlu2 %v2822_v17, %s3396_s3 }
0x10cb   : > { %v2481_v38 = vpop.permute.xlu2 %2480  ;;  %v2479_v60 = vpop.permute.xlu1 %2478 }
0x10cc   : > { %v2490_v18 = vsel %vm358_vm8, %v2479_v60, %v2481_v38 }
0x10cd   : > { %v2500_v13 = vadd.f32 %v2490_v18, %v4898_v59  ;;  %v2354_v59 = vmul.f32 %v4857_v29, %v4887_v41  ;;  %v2431_v29 = vsel %vm303_vm0, %v4936_v39, %v2427_v48 }
0x10ce   : > { %v2442_v31 = vadd.f32 %v2431_v29, %v4874_v10 }
0x10cf   : > { %v2368_v9 = vrot.slane %v2354_v59, 2 }
0x10d0   : > { %2839 = vrot.lane.b32.xlu0 %v2828_v50, %s3396_s3 }
0x10d1   : > { %2837 = vrot.lane.b32.xlu2 %v2826_v37, %s3396_s3 }
0x10d3   : > { %v2487_v36 = vpop.permute.xlu2 %2486  ;;  %v2485_v1 = vpop.permute.xlu1 %2484 }
0x10d4   : > { %v2492_v58 = vsel %vm358_vm8, %v2485_v1, %v2487_v36 }
0x10d5   : > { %v2503_v2 = vadd.f32 %v2492_v58, %v4941_v49  ;;  %v2369_v49 = vsel %vm1053_vm7, %v2363_v12, %v2368_v9  ;;  %vm2979_vm7 = vcmask 1040384  }
0x10d6   : > { %v2381_v0 = vadd.f32 %v2369_v49, %v4848_v26 }
0x10d8   : > { %v2443_v41 = vadd.f32 %v2427_v48, %v2381_v0 }
0x10db   : > { %v2543_v3 = vpop.permute.xlu2 %2542  ;;  %v2541_v28 = vpop.permute.xlu1 %2540 }
0x10dc   : > { %v2552_v57 = vsel %vm274_vm1, %v2541_v28, %v2543_v3 }
0x10dd   : > { %v2562_v24 = vadd.f32 %v2552_v57, %v2500_v13 }
0x10e2   : > { %v2483_v62 = vpop.permute.xlu0 %2482 }
0x10e3   : > { %v2491_v32 = vsel %vm358_vm8, %v2481_v38, %v2483_v62  ;;  %v2502_v40 = vadd.f32 %v2483_v62, %v4915_v27  ;;  %v2549_v7 = vpop.permute.xlu2 %2548  ;;  %v2547_v22 = vpop.permute.xlu1 %2546 }
0x10e4   : > { %v2501_v20 = vadd.f32 %v2491_v32, %v4920_v42  ;;  %v2554_v13 = vsel %vm274_vm1, %v2547_v22, %v2549_v7 }
0x10e5   : > { %v2565_v37 = vadd.f32 %v2554_v13, %v2503_v2 }
0x10ea   : > { %v2489_v63 = vpop.permute.xlu0 %2488 }
0x10eb   : > { %v2493_v53 = vsel %vm358_vm8, %v2487_v36, %v2489_v63  ;;  %v2505_v27 = vadd.f32 %v2489_v63, %v2443_v41  ;;  %v2592_v34 = vpop.permute.xlu2 %2591  ;;  %v2590_v33 = vpop.permute.xlu1 %2589 }
0x10ec   : > { %v2504_v19 = vadd.f32 %v2493_v53, %v2442_v31  ;;  %v2597_v12 = vsel %vm248_vm9, %v2590_v33, %v2592_v34  ;;  %v2605_v18 = vadd.f32 %v2590_v33, %v2562_v24 }
0x10f2   : > { %v2545_v30 = vpop.permute.xlu0 %2544 }
0x10f3   : > { %v2553_v42 = vsel %vm274_vm1, %v2543_v3, %v2545_v30  ;;  %v2564_v43 = vadd.f32 %v2545_v30, %v2502_v40  ;;  %v2646_v26 = vpop.permute.xlu2 %2645  ;;  %v5061_v6 = vpop.permute.xlu1 %2595 }
0x10f4   : > { %v2563_v39 = vadd.f32 %v2553_v42, %v2501_v20  ;;  %v2667_v50 = vadd.f32 %v2646_v26, %v2605_v18 }
0x10f5   : > { %v2607_v44 = vadd.f32 %v2592_v34, %v2564_v43 }
0x10f6   : > { %v2606_v52 = vadd.f32 %v2597_v12, %v2563_v39 }
0x10fa   : > { %v2551_v10 = vpop.permute.xlu0 %2550 }
0x10fb   : > { %v2555_v56 = vsel %vm274_vm1, %v2549_v7, %v2551_v10  ;;  %v5064_v46 = vadd.f32 %v2551_v10, %v2505_v27  ;;  %v2652_v25 = vpop.permute.xlu2 %2651  ;;  %v2650_v5 = vpop.permute.xlu1 %2649 }
0x10fc   : > { %v2566_v55 = vadd.f32 %v2555_v56, %v2504_v19 }
0x1102   : > { %v2594_v23 = vpop.permute.xlu0 %2593 }
0x1103   : > { %v2708_v51 = vpop.permute.xlu2 %2707  ;;  %v2656_v11 = vpop.permute.xlu1 %2655  ;;  %v2598_v54 = vsel %vm248_vm9, %v2594_v23, %v5061_v6  ;;  %v2608_v1 = vadd.f32 %v2594_v23, %v2565_v37 }
0x1104   : > { %v2609_v21 = vadd.f32 %v2598_v54, %v2566_v55  ;;  %v2729_v36 = vadd.f32 %v2708_v51, %v2667_v50  ;;  %v2610_v55 = vadd.f32 %v5061_v6, %v5064_v46 }
0x1105   : > { %v2670_v57 = vadd.f32 %v2652_v25, %v2608_v1 }
0x110a   : > { %v2648_v14 = vpop.permute.xlu0 %2647 }
0x110b   : > { %v2657_v4 = vsel %vm503_vm10, %v2646_v26, %v2648_v14  ;;  %v5067_v8 = vpop.permute.xlu2 %2713  ;;  %v2712_v61 = vpop.permute.xlu1 %2711  ;;  %v2658_v29 = vsel %vm503_vm10, %v2648_v14, %v2650_v5 }
0x110c   : > { %v2668_v16 = vadd.f32 %v2657_v4, %v2606_v52  ;;  %v2732_v62 = vadd.f32 %v5067_v8, %v2670_v57  ;;  %v2669_v53 = vadd.f32 %v2658_v29, %v2607_v44 }
0x1112   : > { %v2654_v17 = vpop.permute.xlu0 %2653 }
0x1113   : > { %v2659_v47 = vsel %vm503_vm10, %v2652_v25, %v2654_v17  ;;  %v2770_v35 = vpop.permute.xlu2 %2769  ;;  %v2718_v60 = vpop.permute.xlu1 %2717  ;;  %v2660_v10 = vsel %vm503_vm10, %v2654_v17, %v2656_v11 }
0x1114   : > { %v5072_v15 = vadd.f32 %v2659_v47, %v2609_v21  ;;  %v2791_v58 = vadd.f32 %v2770_v35, %v2729_v36 }
0x111a   : > { %v2710_v38 = vpop.permute.xlu0 %2709 }
0x111b   : > { %v2776_v45 = vpop.permute.xlu2 %2775  ;;  %v2774_v28 = vpop.permute.xlu1 %2773  ;;  %v2719_v41 = vsel %vm558_vm11, %v2708_v51, %v2710_v38  ;;  %v2720_v31 = vsel %vm558_vm11, %v2710_v38, %v2712_v61 }
0x111c   : > { %v2794_v32 = vadd.f32 %v2776_v45, %v2732_v62  ;;  %v2730_v30 = vadd.f32 %v2719_v41, %v2668_v16  ;;  %v2731_v12 = vadd.f32 %v2720_v31, %v2669_v53  ;;  %v2672_v16 = vadd.f32 %v2660_v10, %v2610_v55 }
0x1122   : > { %v2716_v48 = vpop.permute.xlu0 %2715 }
0x1123   : > { %v2832_v3 = vpop.permute.xlu2 %2831  ;;  %v2780_v7 = vpop.permute.xlu1 %2779  ;;  %v2721_v14 = vsel %vm558_vm11, %v5067_v8, %v2716_v48  ;;  %v2722_v4 = vsel %vm558_vm11, %v2716_v48, %v2718_v60 }
0x1124   : > { %v2853_v59 = vadd.f32 %v2832_v3, %v2791_v58  ;;  %v2733_v6 = vadd.f32 %v2721_v14, %v5072_v15  ;;  %v2734_v46 = vadd.f32 %v2722_v4, %v2672_v16 }
0x1126   : > { %v3117_v9 = vmul.f32 -1.442695, %v2853_v59 }
0x1128   : > { %3203 = vpow2.f32 %v3117_v9 }
0x112a   : > { %v2772_v40 = vpop.permute.xlu0 %2771 }
0x112b   : > { %v2838_v49 = vpop.permute.xlu2 %2837  ;;  %v2781_v34 = vsel %vm613_vm12, %v2770_v35, %v2772_v40  ;;  %v2782_v33 = vsel %vm613_vm12, %v2772_v40, %v2774_v28  ;;  %v2836_v43 = vpop.permute.xlu1 %2835 }
0x112c   : > { %v2856_v24 = vadd.f32 %v2838_v49, %v2794_v32  ;;  %v2792_v39 = vadd.f32 %v2781_v34, %v2730_v30  ;;  %v2793_v52 = vadd.f32 %v2782_v33, %v2731_v12 }
0x112e   : > { %v3204_v20 = vpop.eup %3203  ;;  %v3120_v22 = vmul.f32 -1.442695, %v2856_v24 }
0x112f   : > { %v5076_v2 = vadd.f32 1.0, %v3204_v20 }
0x1130   : > { %3205 = vpow2.f32 %v3120_v22 }
0x1131   : > { %3207 = vrcp.f32 %v5076_v2  ;;  %vm2888_vm15 = vweird.f32 %v5076_v2  ;;  %v2892_v8 = vand.u32 2147483647, %v5076_v2  ;;  %v2894_v38 = vand.u32 2147483648, %v5076_v2 }
0x1132   : > { %v2778_v0 = vpop.permute.xlu0 %2777 }
0x1133   : > { %v2783_v21 = vsel %vm613_vm12, %v2776_v45, %v2778_v0  ;;  %v2784_v17 = vsel %vm613_vm12, %v2778_v0, %v2780_v7  ;;  %v2842_v13 = vpop.permute.xlu1 %2841  ;;  %v2895_v57 = vor.u32 1.1754944e-38, %v2894_v38  ;;  %vm2893_vm2 = vcmp.eq.f32.partialorder %v2892_v8, 8.507059e+37 }
0x1134   : > { %v2795_v45 = vadd.f32 %v2783_v21, %v2733_v6  ;;  %v2796_v18 = vadd.f32 %v2784_v17, %v2734_v46 }
0x1136   : > { %v3206_v63 = vpop.eup %3205 }
0x1137   : > { %v5082_v27 = vpop.eup %3207  ;;  %v5086_v19 = vadd.f32 1.0, %v3206_v63 }
0x1138   : > { %v2884_v42 = vmul.f32 %v5082_v27, %v5076_v2  ;;  %vm2889_vm14 = vweird.f32 %v5082_v27 }
0x1139   : > { %3209 = vrcp.f32 %v5086_v19  ;;  %vm5109_vm0 = vmor %vm2888_vm15, %vm2889_vm14  ;;  %v2937_v15 = vand.u32 2147483647, %v5086_v19  ;;  %v2939_v48 = vand.u32 2147483648, %v5086_v19  ;;  %vm2933_vm3 = vweird.f32 %v5086_v19 }
0x113a   : > { %v2885_v26 = vsub.f32 1.0, %v2884_v42  ;;  %v2834_v44 = vpop.permute.xlu0 %2833 }
0x113b   : > { %v2843_v56 = vsel %vm668_vm13, %v2832_v3, %v2834_v44  ;;  %v2844_v25 = vsel %vm668_vm13, %v2834_v44, %v2836_v43  ;;  %v2940_v7 = vor.u32 1.1754944e-38, %v2939_v48  ;;  %vm2938_vm5 = vcmp.eq.f32.partialorder %v2937_v15, 8.507059e+37 }
0x113c   : > { %v2854_v5 = vadd.f32 %v2843_v56, %v2792_v39  ;;  %v2855_v23 = vadd.f32 %v2844_v25, %v2793_v52  ;;  %v2886_v51 = vmul.f32 %v5082_v27, %v2885_v26 }
0x113e   : > { %v3118_v54 = vmul.f32 -1.442695, %v2854_v5  ;;  %v3119_v61 = vmul.f32 -1.442695, %v2855_v23  ;;  %v2887_v47 = vadd.f32 %v5082_v27, %v2886_v51 }
0x113f   : > { %v3210_v11 = vpop.eup %3209 }
0x1140   : > { %v2929_v35 = vmul.f32 %v3210_v11, %v5086_v19  ;;  %3211 = vpow2.f32 %v3118_v54  ;;  %v2891_v58 = vsel %vm5109_vm0, %v5082_v27, %v2887_v47  ;;  %vm2934_vm1 = vweird.f32 %v3210_v11 }
0x1141   : > { %3213 = vpow2.f32 %v3119_v61  ;;  %v2896_v20 = vsel %vm2893_vm2, %v2895_v57, %v2891_v58  ;;  %vm2935_vm4 = vmor %vm2933_vm3, %vm2934_vm1 }
0x1142   : > { %v2930_v60 = vsub.f32 1.0, %v2929_v35  ;;  %v2840_v50 = vpop.permute.xlu0 %2839  ;;  %v2980_v29 = vrot.slane %v2896_v20, 7 }
0x1143   : > { %v2845_v36 = vsel %vm668_vm13, %v2838_v49, %v2840_v50  ;;  %v2846_v1 = vsel %vm668_vm13, %v2840_v50, %v2842_v13 }
0x1144   : > { %v2857_v3 = vadd.f32 %v2845_v36, %v2795_v45  ;;  %v2858_v28 = vadd.f32 %v2846_v1, %v2796_v18  ;;  %v2931_v59 = vmul.f32 %v3210_v11, %v2930_v60 }
0x1146   : > { %v3212_v9 = vpop.eup %3211  ;;  %v3121_v62 = vmul.f32 -1.442695, %v2857_v3  ;;  %v2932_v32 = vadd.f32 %v3210_v11, %v2931_v59  ;;  %v3122_v24 = vmul.f32 -1.442695, %v2858_v28 }
0x1147   : > { %v3214_v40 = vpop.eup %3213  ;;  %v2878_v49 = vadd.f32 1.0, %v3212_v9 }
0x1148   : > { %v5121_v22 = vadd.f32 1.0, %v3214_v40  ;;  %3215 = vpow2.f32 %v3121_v62  ;;  %v2936_v2 = vsel %vm2935_vm4, %v3210_v11, %v2932_v32 }
0x1149   : > { %3217 = vrcp.f32 %v2878_v49  ;;  %v2941_v0 = vsel %vm2938_vm5, %v2940_v7, %v2936_v2  ;;  %v2907_v39 = vand.u32 2147483647, %v2878_v49  ;;  %vm2903_vm9 = vweird.f32 %v2878_v49 }
0x114a   : > { %3219 = vrcp.f32 %v5121_v22  ;;  %v2981_v41 = vrot.slane %v2941_v0, 7  ;;  %v2909_v25 = vand.u32 2147483648, %v2878_v49  ;;  %vm2918_vm11 = vweird.f32 %v5121_v22 }
0x114b   : > { %3221 = vpow2.f32 %v3122_v24  ;;  %vm5127_vm10 = vcmp.eq.f32.partialorder %v2907_v39, 8.507059e+37  ;;  %v2924_v54 = vand.u32 2147483648, %v5121_v22  ;;  %v2922_v6 = vand.u32 2147483647, %v5121_v22 }
0x114c   : > { %v2982_v31 = vsel %vm2979_vm7, %v2980_v29, %v2981_v41  ;;  %v2910_v47 = vor.u32 1.1754944e-38, %v2909_v25 }
0x114d   : > { %2989 = vrot.lane.b32.xlu2 %v2982_v31, %s3395_s27  ;;  %v2925_v37 = vor.u32 1.1754944e-38, %v2924_v54  ;;  %vm2923_vm4 = vcmp.eq.f32.partialorder %v2922_v6, 8.507059e+37 }
0x114e   : > { %v3216_v63 = vpop.eup %3215 }
0x114f   : > { %v3218_v53 = vpop.eup %3217  ;;  %v2881_v27 = vadd.f32 1.0, %v3216_v63 }
0x1150   : > { %v3220_v34 = vpop.eup %3219  ;;  %v2899_v33 = vmul.f32 %v3218_v53, %v2878_v49  ;;  %vm2904_vm8 = vweird.f32 %v3218_v53 }
0x1151   : > { %v3222_v19 = vpop.eup %3221  ;;  %v2914_v30 = vmul.f32 %v3220_v34, %v5121_v22  ;;  %3223 = vrcp.f32 %v2881_v27  ;;  %v2954_v51 = vand.u32 2147483648, %v2881_v27  ;;  %vm5132_vm12 = vmor %vm2903_vm9, %vm2904_vm8  ;;  %vm2919_vm13 = vweird.f32 %v3220_v34 }
0x1152   : > { %v2900_v12 = vsub.f32 1.0, %v2899_v33  ;;  %v2882_v42 = vadd.f32 1.0, %v3222_v19  ;;  %v2952_v21 = vand.u32 2147483647, %v2881_v27  ;;  %vm2948_vm15 = vweird.f32 %v2881_v27  ;;  %vm5142_vm0 = vmor %vm2918_vm11, %vm2919_vm13 }
0x1153   : > { %v2915_v43 = vsub.f32 1.0, %v2914_v30  ;;  %v2955_v35 = vor.u32 1.1754944e-38, %v2954_v51 }
0x1154   : > { %3225 = vrcp.f32 %v2882_v42  ;;  %v2901_v26 = vmul.f32 %v3218_v53, %v2900_v12  ;;  %v2967_v38 = vand.u32 2147483647, %v2882_v42  ;;  %v2969_v60 = vand.u32 2147483648, %v2882_v42 }
0x1155   : > { %v2916_v44 = vmul.f32 %v3220_v34, %v2915_v43  ;;  %vm2953_vm3 = vcmp.eq.f32.partialorder %v2952_v21, 8.507059e+37  ;;  %vm2963_vm5 = vweird.f32 %v2882_v42 }
0x1156   : > { %v2902_v56 = vadd.f32 %v3218_v53, %v2901_v26  ;;  %v2970_v3 = vor.u32 1.1754944e-38, %v2969_v60  ;;  %vm2968_vm9 = vcmp.eq.f32.partialorder %v2967_v38, 8.507059e+37 }
0x1157   : > { %v3224_v52 = vpop.eup %3223  ;;  %v2917_v16 = vadd.f32 %v3220_v34, %v2916_v44 }
0x1158   : > { %v2944_v10 = vmul.f32 %v3224_v52, %v2881_v27  ;;  %v2906_v61 = vsel %vm5132_vm12, %v3218_v53, %v2902_v56  ;;  %vm2949_vm14 = vweird.f32 %v3224_v52 }
0x1159   : > { %v2911_v45 = vsel %vm5127_vm10, %v2910_v47, %v2906_v61  ;;  %vm2950_vm1 = vmor %vm2948_vm15, %vm2949_vm14  ;;  %v2921_v18 = vsel %vm5142_vm0, %v3220_v34, %v2917_v16 }
0x115a   : > { %v3226_v55 = vpop.eup %3225  ;;  %v2945_v5 = vsub.f32 1.0, %v2944_v10  ;;  %v2983_v1 = vrot.slane %v2911_v45, 7  ;;  %v2926_v48 = vsel %vm2923_vm4, %v2925_v37, %v2921_v18 }
0x115b   : > { %v2959_v14 = vmul.f32 %v3226_v55, %v2882_v42  ;;  %vm2964_vm2 = vweird.f32 %v3226_v55  ;;  %v2986_v9 = vrot.slane %v2926_v48, 7 }
0x115c   : > { %v2946_v11 = vmul.f32 %v3224_v52, %v2945_v5  ;;  %vm2965_vm8 = vmor %vm2963_vm5, %vm2964_vm2 }
0x115d   : > { %v2960_v17 = vsub.f32 1.0, %v2959_v14 }
0x115e   : > { %v2947_v46 = vadd.f32 %v3224_v52, %v2946_v11 }
0x115f   : > { %v2961_v13 = vmul.f32 %v3226_v55, %v2960_v17 }
0x1160   : > { %v2951_v50 = vsel %vm2950_vm1, %v3224_v52, %v2947_v46 }
0x1161   : > { %v2956_v15 = vsel %vm2953_vm3, %v2955_v35, %v2951_v50  ;;  %v2962_v36 = vadd.f32 %v3226_v55, %v2961_v13 }
0x1162   : > { %v2984_v58 = vrot.slane %v2956_v15, 7 }
0x1163   : > { %v2966_v28 = vsel %vm2965_vm8, %v3226_v55, %v2962_v36 }
0x1164   : > { %v2985_v59 = vsel %vm2979_vm7, %v2983_v1, %v2984_v58  ;;  %v2971_v57 = vsel %vm2968_vm9, %v2970_v3, %v2966_v28 }
0x1165   : > { %2991 = vrot.lane.b32.xlu0 %v2985_v59, %s3395_s27  ;;  %v2987_v62 = vrot.slane %v2971_v57, 7 }
0x1167   : > { %v2988_v32 = vsel %vm2979_vm7, %v2986_v9, %v2987_v62 }
0x1168   : > { %2993 = vrot.lane.b32.xlu1 %v2988_v32, %s3395_s27 }
0x11a7   : > { %v2990_v40 = vpop.permute.xlu2 %2989 }
0x11d7   : > { %v2992_v49 = vpop.permute.xlu0 %2991 }
0x11d8   : > { %v2995_v24 = vsel %vm639_vm6, %v2990_v40, %v2992_v49 }
0x11d9   : > { %2999 = vst [vmem:[%s180_s20] sm:$0xff] %v2995_v24 }
0x11da   : > { %v2994_v20 = vpop.permute.xlu1 %2993 }
0x11db   : > { %v2996_v7 = vsel %vm639_vm6, %v2992_v49, %v2994_v20 }
0x11dc   : > { %3000 = vst [vmem:[%s180_s20 + $0x8] sm:$0xff] %v2996_v7 }
0x11dd   : > { %3335 = shalt.err (!%p3332_p10)
}
0x11de   : > { %3136 = dma.vmem_to_hbm [thread:$0]  (%p3481_p3), %s3016_s24, 256, %s3018_s15, %s3002_s13  }
0x11df PF: > { %s3029_s30 = sand.u32 1, %s3366_s9   ;;  %p5472_p12 = scmp.ge.s32.totalorder %s3378_s12, 2 }
0x11e0   : > { %s3030_s26 = scalar_lea.sflag [#allocation5], %s3029_s30 }
0x11e1   : > { %p3147_p13 = pnand %p5472_p12, %p3447_p6 }
0x11e3   : > { %p3148_p0 = pneg %p3147_p13 }
0x11e5   : > { %3361 = dma.done.wait (%p3148_p0), %s3030_s26, 256  }
0x11e6   : > { %3363 = vsyncadd (%p3148_p0), %s3030_s26, 4294967040  ;;  %p16_p5 = scmp.ge.s32.totalorder %s3465_s23, 4   ;;  %s5473_s9 = smov %s3370_s10 }
0x11e7   : > { %s5474_s10 = smov %s3374_s11  ;;  %s5475_s11 = smov %s3477_s28 }
0x11e8   : > { %s5476_s12 = smov %s3465_s23  ;;  %18 = sbr.rel (!%p16_p5) target bundleno = 6 (0x6), region = 134 }
0x11ed   :  { %3036 = vsyncpa [#allocation4], 1 }
0x11ee   :  { %3038 = vsyncpa [#allocation4 + $0x1], 1 }
0x11ef   :  { %3039 = vsyncpa [#allocation7], 1 }
0x11f0   :  { %3041 = vsyncpa [#allocation7 + $0x1], 1 }
0x11f1   :  { %3042 = vsyncpa [#allocation5], 1 }
0x11f2   :  { %3044 = vsyncpa [#allocation5 + $0x1], 1 }

</bundles_post_ra>
